<compile_context>
chip_gen: v5e
topology: v5e:2x2
jax: 0.10.0
libtpu: 0.0.40
codegen_flags: <defaults>
</compile_context>

<pallas_src>
import functools

import numpy as np
import jax
import jax.numpy as jnp
from jax.experimental import pallas as pl
from jax.experimental.pallas import tpu as pltpu


def _round_up(x, m):
    return ((x + m - 1) // m) * m


# ConvTranspose2d(kernel=4, stride=2, padding=1): output row oh = 2*p - 1 + kh.
# For oh = 2*P + r the contributing (input-row shift dh, kernel tap kh) pairs are:
_TAPS = {0: ((0, 1), (-1, 3)), 1: ((0, 2), (1, 0))}   # parity -> ((dh, kh), ...)


# ----------------------------------------------------------------------------
# Fused kernel: conv1 (1x1+ReLU) -> deconv core -> overlap-add -> bias + ReLU.
# One grid program per batch element; everything stays in VMEM.
# ----------------------------------------------------------------------------
def _decoder_block_kernel(x_ref, w1_ref, b1_ref, wd_ref, b2_ref, qmask_ref,
                          o_ref, midp_ref, *, H, W, PAD):
    HW = H * W
    cmid = w1_ref.shape[1]
    cout = o_ref.shape[-1]

    # conv1: (HW, Cin) @ (Cin, Cmid), single full-K MXU step, fused bias+ReLU.
    mid = jnp.dot(x_ref[0], w1_ref[...], preferred_element_type=jnp.float32)
    mid = jnp.maximum(mid + b1_ref[...], 0.0)

    # Stage mid in a row-padded VMEM scratch: PAD zero rows above/below provide
    # the one-input-row halo the stride-2 overlap-add needs, so row shifts
    # become static slices of the scratch (no data movement, no HBM).
    zpad = jnp.zeros((PAD, cmid), jnp.float32)
    midp_ref[pl.ds(0, PAD), :] = zpad
    midp_ref[pl.ds(PAD + HW, PAD), :] = zpad
    midp_ref[pl.ds(PAD, HW), :] = mid

    mask_prev = qmask_ref[0]   # (HW, 1): 0 where q == 0      (used for dw = -1)
    mask_next = qmask_ref[1]   # (HW, 1): 0 where q == W - 1  (used for dw = +1)

    # One output-parity plane (r, s) at a time: sum of 4 shifted mid slices times
    # the matching folded deconv(+conv2) tap weights, f32 MXU accumulation, then
    # effective bias (deconv bias folded in) + ReLU.
    for r in (0, 1):
        for s in (0, 1):
            acc = jnp.zeros((HW, cout), jnp.float32)
            for dh, kh in _TAPS[r]:
                for dw, kw in _TAPS[s]:
                    m = midp_ref[pl.ds(PAD + dh * W + dw, HW), :]
                    if dw == 1:
                        m = m * mask_next
                    elif dw == -1:
                        m = m * mask_prev
                    acc = acc + jnp.dot(m.astype(jnp.bfloat16),
                                        wd_ref[kh * 4 + kw],
                                        preferred_element_type=jnp.float32)
            o_ref[0, r, s] = jnp.maximum(acc + b2_ref[...], 0.0)


# ----------------------------------------------------------------------------
# Parameters (PyTorch layouts, deterministic synthetic init) + hoisted prep.
# ----------------------------------------------------------------------------
def init_params(key, in_channels, out_channels):
    cmid = in_channels // 4
    k1, k2, k3, k4, k5, k6 = jax.random.split(key, 6)

    def conv_w(k, cout, cin, ksz):
        return (jax.random.normal(k, (cout, cin, ksz, ksz), jnp.float32)
                / np.sqrt(cin * ksz * ksz))

    return {
        'conv1_w': conv_w(k1, cmid, in_channels, 1),           # (Cmid, Cin, 1, 1)
        'conv1_b': 0.01 * jax.random.normal(k2, (cmid,), jnp.float32),
        'deconv_w': (jax.random.normal(k3, (cmid, cmid, 4, 4), jnp.float32)
                     / np.sqrt(cmid * 16)),                    # (Cin=Cmid, Cout=Cmid, 4, 4)
        'deconv_b': 0.01 * jax.random.normal(k4, (cmid,), jnp.float32),
        'conv2_w': conv_w(k5, out_channels, cmid, 1),          # (Cout, Cmid, 1, 1)
        'conv2_b': 0.01 * jax.random.normal(k6, (out_channels,), jnp.float32),
    }


def prepare_params(params):
    """One-time weight preprocessing: layouts, bf16 cast, exact weight/bias folding."""
    cmid = params['conv1_w'].shape[0]
    cout = params['conv2_w'].shape[0]
    w1 = jnp.transpose(params['conv1_w'][:, :, 0, 0], (1, 0))          # (Cin, Cmid)
    w2 = jnp.transpose(params['conv2_w'][:, :, 0, 0], (1, 0))          # (Cmid, Cout)
    # Fold conv2 (1x1, linear pre-ReLU) into the deconv weights -> per-tap weights
    # wd_taps[kh*4+kw, i, c] = sum_o deconv_w[i, o, kh, kw] * w2[o, c].
    wd_taps = jnp.einsum('iokl,oc->klic', params['deconv_w'], w2).reshape(16, cmid, cout)
    # Fold the deconv bias into conv2's bias (exact).
    b2_eff = params['deconv_b'] @ w2 + params['conv2_b']
    return {
        'w1': w1.astype(jnp.bfloat16),
        'b1': params['conv1_b'].reshape(1, cmid).astype(jnp.float32),
        'wd_taps': wd_taps.astype(jnp.bfloat16),
        'b2_eff': b2_eff.reshape(1, cout).astype(jnp.float32),
    }


# ----------------------------------------------------------------------------
# Forward pass (matches DecoderBlock.forward), NCHW in / NCHW out.
# ----------------------------------------------------------------------------
def decoder_block_forward(prep, x_nchw):
    n, cin, h, w = x_nchw.shape
    w1, b1 = prep['w1'], prep['b1']
    wd, b2 = prep['wd_taps'], prep['b2_eff']
    cmid, cout = w1.shape[1], wd.shape[-1]
    hw = h * w
    pad = _round_up(w + 1, 16)   # zero-row halo for the overlap-add slices

    # NCHW -> (N, H*W, Cin) bf16 (single fused XLA transpose + cast).
    x = jnp.transpose(x_nchw, (0, 2, 3, 1)).reshape(n, hw, cin).astype(jnp.bfloat16)

    # 0/1 masks that kill contributions whose q index would wrap across a row
    # boundary in the flattened (p*W + q) layout.
    q = jnp.arange(hw, dtype=jnp.int32) % w
    qmask = jnp.stack([(q != 0), (q != w - 1)]).astype(jnp.float32).reshape(2, hw, 1)

    kernel = functools.partial(_decoder_block_kernel, H=h, W=w, PAD=pad)
    out = pl.pallas_call(
        kernel,
        out_shape=jax.ShapeDtypeStruct((n, 2, 2, hw, cout), jnp.float32),
        grid_spec=pltpu.PrefetchScalarGridSpec(
            num_scalar_prefetch=0,
            grid=(n,),
            in_specs=[
                pl.BlockSpec((1, hw, cin), lambda i: (i, 0, 0)),       # x (per batch)
                pl.BlockSpec((cin, cmid), lambda i: (0, 0)),           # w1 (resident)
                pl.BlockSpec((1, cmid), lambda i: (0, 0)),             # b1
                pl.BlockSpec((16, cmid, cout), lambda i: (0, 0, 0)),   # folded deconv taps
                pl.BlockSpec((1, cout), lambda i: (0, 0)),             # b2_eff
                pl.BlockSpec((2, hw, 1), lambda i: (0, 0, 0)),         # q-boundary masks
            ],
            out_specs=pl.BlockSpec((1, 2, 2, hw, cout),
                                   lambda i: (i, 0, 0, 0, 0)),
            scratch_shapes=[pltpu.VMEM((hw + 2 * pad, cmid), jnp.float32)],
        ),
        compiler_params=pltpu.CompilerParams(
            dimension_semantics=("parallel",)),
    )(x, w1, b1, wd, b2, qmask)

    # (N, r, s, H*W, Cout) -> NCHW: (P, r) -> 2P+r and (Q, s) -> 2Q+s.
    out = out.reshape(n, 2, 2, h, w, cout)
    out = jnp.transpose(out, (0, 5, 3, 1, 4, 2))        # (N, Cout, H, r, W, s)
    return out.reshape(n, cout, 2 * h, 2 * w)


# ----------------------------------------------------------------------------
# Pure-XLA f32 reference (for a loose numerical check of the bf16 Pallas path).
# ----------------------------------------------------------------------------
def decoder_block_ref(params, x_nchw):
    x = jnp.transpose(x_nchw, (0, 2, 3, 1))
    h = jnp.einsum('nhwc,oc->nhwo', x, params['conv1_w'][:, :, 0, 0]) + params['conv1_b']
    h = jnp.maximum(h, 0.0)
    wd = params['deconv_w']
    # ConvTranspose2d(k=4,s=2,p=1) == dilated conv with spatially flipped kernel, pad 2.
    k = jnp.transpose(wd[:, :, ::-1, ::-1], (2, 3, 0, 1))              # (kh, kw, I, O)
    d = jax.lax.conv_general_dilated(
        h, k, window_strides=(1, 1), padding=[(2, 2), (2, 2)],
        lhs_dilation=(2, 2), rhs_dilation=(1, 1),
        dimension_numbers=('NHWC', 'HWIO', 'NHWC')) + params['deconv_b']
    o = jnp.einsum('nhwc,oc->nhwo', d, params['conv2_w'][:, :, 0, 0]) + params['conv2_b']
    o = jnp.maximum(o, 0.0)
    return jnp.transpose(o, (0, 3, 1, 2))


if __name__ == "__main__":
    in_channels, out_channels = 128, 64
    batch, height, width = 2, 16, 16

    key = jax.random.PRNGKey(0)
    kp, kx = jax.random.split(key)
    params = init_params(kp, in_channels, out_channels)
    prep = prepare_params(params)
    x = jax.random.normal(kx, (batch, in_channels, height, width), jnp.float32)

    fwd = jax.jit(decoder_block_forward)
    out = jax.block_until_ready(fwd(prep, x))

    assert out.shape == (batch, out_channels, 2 * height, 2 * width), out.shape
    assert out.dtype == jnp.float32
    assert bool(jnp.isfinite(out).all())

    # Loose check vs the f32 XLA reference (bf16 MXU operands -> small drift).
    ref = jax.block_until_ready(decoder_block_ref(params, x))
    err = float(jnp.max(jnp.abs(out - ref)))
    assert err < 0.1, f"max abs err vs reference: {err}"

    print("KERNEL_OK")
</pallas_src>

<mosaic_0001>
module attributes {stable_mosaic.version = 11 : i64} {
  func.func @_decoder_block_kernel(%arg0: i32, %arg1: memref<1x256x128xbf16, #tpu.memory_space<vmem>>, %arg2: memref<128x32xbf16, #tpu.memory_space<vmem>>, %arg3: memref<1x32xf32, #tpu.memory_space<vmem>>, %arg4: memref<16x32x64xbf16, #tpu.memory_space<vmem>>, %arg5: memref<1x64xf32, #tpu.memory_space<vmem>>, %arg6: memref<2x256x1xf32, #tpu.memory_space<vmem>>, %arg7: memref<1x2x2x256x64xf32, #tpu.memory_space<vmem>>, %arg8: memref<320x32xf32, #tpu.memory_space<vmem>>) attributes {dimension_semantics = [#tpu.dimension_semantics<parallel>], iteration_bounds = array<i64: 2>, scalar_prefetch = 0 : i64, scratch_operands = 1 : i64, tpu.core_type = #tpu.core_type<tc>, window_params = [{transform_indices = @transform_0, window_bounds = array<i64: 1, 256, 128>}, {pipeline_mode = #tpu.pipeline_mode<synchronous>, transform_indices = @transform_1, window_bounds = array<i64: 128, 32>}, {pipeline_mode = #tpu.pipeline_mode<synchronous>, transform_indices = @transform_2, window_bounds = array<i64: 1, 32>}, {pipeline_mode = #tpu.pipeline_mode<synchronous>, transform_indices = @transform_3, window_bounds = array<i64: 16, 32, 64>}, {pipeline_mode = #tpu.pipeline_mode<synchronous>, transform_indices = @transform_4, window_bounds = array<i64: 1, 64>}, {pipeline_mode = #tpu.pipeline_mode<synchronous>, transform_indices = @transform_5, window_bounds = array<i64: 2, 256, 1>}, {transform_indices = @transform_6, window_bounds = array<i64: 1, 2, 2, 256, 64>}]} {
    %c0 = arith.constant 0 : index
    %c0_0 = arith.constant 0 : index
    %c0_1 = arith.constant 0 : index
    %0 = vector.load %arg1[%c0, %c0_0, %c0_1] : memref<1x256x128xbf16, #tpu.memory_space<vmem>>, vector<1x256x128xbf16>
    %1 = vector.shape_cast %0 : vector<1x256x128xbf16> to vector<256x128xbf16>
    %c0_2 = arith.constant 0 : index
    %c0_3 = arith.constant 0 : index
    %2 = vector.load %arg2[%c0_2, %c0_3] : memref<128x32xbf16, #tpu.memory_space<vmem>>, vector<128x32xbf16>
    %cst = arith.constant dense<0.000000e+00> : vector<256x32xf32>
    %3 = tpu.matmul %1, %2, %cst {dimension_numbers = #tpu.dot_dimension_numbers<[1], [0], [0], [1], [0, 0, 1, 1], [], []>} : vector<256x128xbf16>, vector<128x32xbf16>, vector<256x32xf32> -> vector<256x32xf32>
    %c0_4 = arith.constant 0 : index
    %c0_5 = arith.constant 0 : index
    %4 = vector.load %arg3[%c0_4, %c0_5] : memref<1x32xf32, #tpu.memory_space<vmem>>, vector<1x32xf32>
    %5 = vector.broadcast %4 : vector<1x32xf32> to vector<256x32xf32>
    %6 = arith.addf %3, %5 : vector<256x32xf32>
    %cst_6 = arith.constant 0.000000e+00 : f32
    %7 = vector.broadcast %cst_6 : f32 to vector<256x32xf32>
    %8 = arith.maximumf %6, %7 : vector<256x32xf32>
    %cst_7 = arith.constant 0.000000e+00 : f32
    %9 = vector.broadcast %cst_7 : f32 to vector<32x32xf32>
    %c0_8 = arith.constant 0 : index
    %c0_9 = arith.constant 0 : index
    %10 = vector.load %arg8[%c0_8, %c0_9] : memref<320x32xf32, #tpu.memory_space<vmem>>, vector<32x32xf32>
    tpu.vector_store %arg8[%c0_8, %c0_9], %9 {strides = array<i32>} : memref<320x32xf32, #tpu.memory_space<vmem>>, vector<32x32xf32>,
    %c288 = arith.constant 288 : index
    %c0_10 = arith.constant 0 : index
    %11 = vector.load %arg8[%c288, %c0_10] : memref<320x32xf32, #tpu.memory_space<vmem>>, vector<32x32xf32>
    tpu.vector_store %arg8[%c288, %c0_10], %9 {strides = array<i32>} : memref<320x32xf32, #tpu.memory_space<vmem>>, vector<32x32xf32>,
    %c32 = arith.constant 32 : index
    %c0_11 = arith.constant 0 : index
    %12 = vector.load %arg8[%c32, %c0_11] : memref<320x32xf32, #tpu.memory_space<vmem>>, vector<256x32xf32>
    tpu.vector_store %arg8[%c32, %c0_11], %8 {strides = array<i32>} : memref<320x32xf32, #tpu.memory_space<vmem>>, vector<256x32xf32>,
    %c0_12 = arith.constant 0 : index
    %c0_13 = arith.constant 0 : index
    %c0_14 = arith.constant 0 : index
    %13 = vector.load %arg6[%c0_12, %c0_13, %c0_14] : memref<2x256x1xf32, #tpu.memory_space<vmem>>, vector<1x256x1xf32>
    %14 = vector.shape_cast %13 : vector<1x256x1xf32> to vector<256x1xf32>
    %c1 = arith.constant 1 : index
    %c0_15 = arith.constant 0 : index
    %c0_16 = arith.constant 0 : index
    %15 = vector.load %arg6[%c1, %c0_15, %c0_16] : memref<2x256x1xf32, #tpu.memory_space<vmem>>, vector<1x256x1xf32>
    %16 = vector.shape_cast %15 : vector<1x256x1xf32> to vector<256x1xf32>
    %cst_17 = arith.constant 0.000000e+00 : f32
    %17 = vector.broadcast %cst_17 : f32 to vector<256x64xf32>
    %c32_18 = arith.constant 32 : index
    %c0_19 = arith.constant 0 : index
    %18 = vector.load %arg8[%c32_18, %c0_19] : memref<320x32xf32, #tpu.memory_space<vmem>>, vector<256x32xf32>
    %19 = arith.truncf %18 : vector<256x32xf32> to vector<256x32xbf16>
    %c5 = arith.constant 5 : index
    %c0_20 = arith.constant 0 : index
    %c0_21 = arith.constant 0 : index
    %20 = vector.load %arg4[%c5, %c0_20, %c0_21] : memref<16x32x64xbf16, #tpu.memory_space<vmem>>, vector<1x32x64xbf16>
    %21 = vector.shape_cast %20 : vector<1x32x64xbf16> to vector<32x64xbf16>
    %cst_22 = arith.constant dense<0.000000e+00> : vector<256x64xf32>
    %22 = tpu.matmul %19, %21, %cst_22 {dimension_numbers = #tpu.dot_dimension_numbers<[1], [0], [0], [1], [0, 0, 1, 1], [], []>} : vector<256x32xbf16>, vector<32x64xbf16>, vector<256x64xf32> -> vector<256x64xf32>
    %23 = arith.addf %17, %22 : vector<256x64xf32>
    %c31 = arith.constant 31 : index
    %c0_23 = arith.constant 0 : index
    %24 = vector.load %arg8[%c31, %c0_23] : memref<320x32xf32, #tpu.memory_space<vmem>>, vector<256x32xf32>
    %25 = vector.broadcast %14 : vector<256x1xf32> to vector<256x32xf32>
    %26 = arith.mulf %24, %25 : vector<256x32xf32>
    %27 = arith.truncf %26 : vector<256x32xf32> to vector<256x32xbf16>
    %c7 = arith.constant 7 : index
    %c0_24 = arith.constant 0 : index
    %c0_25 = arith.constant 0 : index
    %28 = vector.load %arg4[%c7, %c0_24, %c0_25] : memref<16x32x64xbf16, #tpu.memory_space<vmem>>, vector<1x32x64xbf16>
    %29 = vector.shape_cast %28 : vector<1x32x64xbf16> to vector<32x64xbf16>
    %cst_26 = arith.constant dense<0.000000e+00> : vector<256x64xf32>
    %30 = tpu.matmul %27, %29, %cst_26 {dimension_numbers = #tpu.dot_dimension_numbers<[1], [0], [0], [1], [0, 0, 1, 1], [], []>} : vector<256x32xbf16>, vector<32x64xbf16>, vector<256x64xf32> -> vector<256x64xf32>
    %31 = arith.addf %23, %30 : vector<256x64xf32>
    %c16 = arith.constant 16 : index
    %c0_27 = arith.constant 0 : index
    %32 = vector.load %arg8[%c16, %c0_27] : memref<320x32xf32, #tpu.memory_space<vmem>>, vector<256x32xf32>
    %33 = arith.truncf %32 : vector<256x32xf32> to vector<256x32xbf16>
    %c13 = arith.constant 13 : index
    %c0_28 = arith.constant 0 : index
    %c0_29 = arith.constant 0 : index
    %34 = vector.load %arg4[%c13, %c0_28, %c0_29] : memref<16x32x64xbf16, #tpu.memory_space<vmem>>, vector<1x32x64xbf16>
    %35 = vector.shape_cast %34 : vector<1x32x64xbf16> to vector<32x64xbf16>
    %cst_30 = arith.constant dense<0.000000e+00> : vector<256x64xf32>
    %36 = tpu.matmul %33, %35, %cst_30 {dimension_numbers = #tpu.dot_dimension_numbers<[1], [0], [0], [1], [0, 0, 1, 1], [], []>} : vector<256x32xbf16>, vector<32x64xbf16>, vector<256x64xf32> -> vector<256x64xf32>
    %37 = arith.addf %31, %36 : vector<256x64xf32>
    %c15 = arith.constant 15 : index
    %c0_31 = arith.constant 0 : index
    %38 = vector.load %arg8[%c15, %c0_31] : memref<320x32xf32, #tpu.memory_space<vmem>>, vector<256x32xf32>
    %39 = vector.broadcast %14 : vector<256x1xf32> to vector<256x32xf32>
    %40 = arith.mulf %38, %39 : vector<256x32xf32>
    %41 = arith.truncf %40 : vector<256x32xf32> to vector<256x32xbf16>
    %c15_32 = arith.constant 15 : index
    %c0_33 = arith.constant 0 : index
    %c0_34 = arith.constant 0 : index
    %42 = vector.load %arg4[%c15_32, %c0_33, %c0_34] : memref<16x32x64xbf16, #tpu.memory_space<vmem>>, vector<1x32x64xbf16>
    %43 = vector.shape_cast %42 : vector<1x32x64xbf16> to vector<32x64xbf16>
    %cst_35 = arith.constant dense<0.000000e+00> : vector<256x64xf32>
    %44 = tpu.matmul %41, %43, %cst_35 {dimension_numbers = #tpu.dot_dimension_numbers<[1], [0], [0], [1], [0, 0, 1, 1], [], []>} : vector<256x32xbf16>, vector<32x64xbf16>, vector<256x64xf32> -> vector<256x64xf32>
    %45 = arith.addf %37, %44 : vector<256x64xf32>
    %c0_36 = arith.constant 0 : index
    %c0_37 = arith.constant 0 : index
    %46 = vector.load %arg5[%c0_36, %c0_37] : memref<1x64xf32, #tpu.memory_space<vmem>>, vector<1x64xf32>
    %47 = vector.broadcast %46 : vector<1x64xf32> to vector<256x64xf32>
    %48 = arith.addf %45, %47 : vector<256x64xf32>
    %cst_38 = arith.constant 0.000000e+00 : f32
    %49 = vector.broadcast %cst_38 : f32 to vector<256x64xf32>
    %50 = arith.maximumf %48, %49 : vector<256x64xf32>
    %c0_39 = arith.constant 0 : index
    %c0_40 = arith.constant 0 : index
    %c0_41 = arith.constant 0 : index
    %c0_42 = arith.constant 0 : index
    %c0_43 = arith.constant 0 : index
    %51 = vector.load %arg7[%c0_39, %c0_40, %c0_41, %c0_42, %c0_43] : memref<1x2x2x256x64xf32, #tpu.memory_space<vmem>>, vector<1x1x1x256x64xf32>
    %52 = vector.shape_cast %51 : vector<1x1x1x256x64xf32> to vector<256x64xf32>
    %53 = vector.shape_cast %50 : vector<256x64xf32> to vector<1x1x1x256x64xf32>
    tpu.vector_store %arg7[%c0_39, %c0_40, %c0_41, %c0_42, %c0_43], %53 {strides = array<i32>} : memref<1x2x2x256x64xf32, #tpu.memory_space<vmem>>, vector<1x1x1x256x64xf32>,
    %cst_44 = arith.constant 0.000000e+00 : f32
    %54 = vector.broadcast %cst_44 : f32 to vector<256x64xf32>
    %c32_45 = arith.constant 32 : index
    %c0_46 = arith.constant 0 : index
    %55 = vector.load %arg8[%c32_45, %c0_46] : memref<320x32xf32, #tpu.memory_space<vmem>>, vector<256x32xf32>
    %56 = arith.truncf %55 : vector<256x32xf32> to vector<256x32xbf16>
    %c6 = arith.constant 6 : index
    %c0_47 = arith.constant 0 : index
    %c0_48 = arith.constant 0 : index
    %57 = vector.load %arg4[%c6, %c0_47, %c0_48] : memref<16x32x64xbf16, #tpu.memory_space<vmem>>, vector<1x32x64xbf16>
    %58 = vector.shape_cast %57 : vector<1x32x64xbf16> to vector<32x64xbf16>
    %cst_49 = arith.constant dense<0.000000e+00> : vector<256x64xf32>
    %59 = tpu.matmul %56, %58, %cst_49 {dimension_numbers = #tpu.dot_dimension_numbers<[1], [0], [0], [1], [0, 0, 1, 1], [], []>} : vector<256x32xbf16>, vector<32x64xbf16>, vector<256x64xf32> -> vector<256x64xf32>
    %60 = arith.addf %54, %59 : vector<256x64xf32>
    %c33 = arith.constant 33 : index
    %c0_50 = arith.constant 0 : index
    %61 = vector.load %arg8[%c33, %c0_50] : memref<320x32xf32, #tpu.memory_space<vmem>>, vector<256x32xf32>
    %62 = vector.broadcast %16 : vector<256x1xf32> to vector<256x32xf32>
    %63 = arith.mulf %61, %62 : vector<256x32xf32>
    %64 = arith.truncf %63 : vector<256x32xf32> to vector<256x32xbf16>
    %c4 = arith.constant 4 : index
    %c0_51 = arith.constant 0 : index
    %c0_52 = arith.constant 0 : index
    %65 = vector.load %arg4[%c4, %c0_51, %c0_52] : memref<16x32x64xbf16, #tpu.memory_space<vmem>>, vector<1x32x64xbf16>
    %66 = vector.shape_cast %65 : vector<1x32x64xbf16> to vector<32x64xbf16>
    %cst_53 = arith.constant dense<0.000000e+00> : vector<256x64xf32>
    %67 = tpu.matmul %64, %66, %cst_53 {dimension_numbers = #tpu.dot_dimension_numbers<[1], [0], [0], [1], [0, 0, 1, 1], [], []>} : vector<256x32xbf16>, vector<32x64xbf16>, vector<256x64xf32> -> vector<256x64xf32>
    %68 = arith.addf %60, %67 : vector<256x64xf32>
    %c16_54 = arith.constant 16 : index
    %c0_55 = arith.constant 0 : index
    %69 = vector.load %arg8[%c16_54, %c0_55] : memref<320x32xf32, #tpu.memory_space<vmem>>, vector<256x32xf32>
    %70 = arith.truncf %69 : vector<256x32xf32> to vector<256x32xbf16>
    %c14 = arith.constant 14 : index
    %c0_56 = arith.constant 0 : index
    %c0_57 = arith.constant 0 : index
    %71 = vector.load %arg4[%c14, %c0_56, %c0_57] : memref<16x32x64xbf16, #tpu.memory_space<vmem>>, vector<1x32x64xbf16>
    %72 = vector.shape_cast %71 : vector<1x32x64xbf16> to vector<32x64xbf16>
    %cst_58 = arith.constant dense<0.000000e+00> : vector<256x64xf32>
    %73 = tpu.matmul %70, %72, %cst_58 {dimension_numbers = #tpu.dot_dimension_numbers<[1], [0], [0], [1], [0, 0, 1, 1], [], []>} : vector<256x32xbf16>, vector<32x64xbf16>, vector<256x64xf32> -> vector<256x64xf32>
    %74 = arith.addf %68, %73 : vector<256x64xf32>
    %c17 = arith.constant 17 : index
    %c0_59 = arith.constant 0 : index
    %75 = vector.load %arg8[%c17, %c0_59] : memref<320x32xf32, #tpu.memory_space<vmem>>, vector<256x32xf32>
    %76 = vector.broadcast %16 : vector<256x1xf32> to vector<256x32xf32>
    %77 = arith.mulf %75, %76 : vector<256x32xf32>
    %78 = arith.truncf %77 : vector<256x32xf32> to vector<256x32xbf16>
    %c12 = arith.constant 12 : index
    %c0_60 = arith.constant 0 : index
    %c0_61 = arith.constant 0 : index
    %79 = vector.load %arg4[%c12, %c0_60, %c0_61] : memref<16x32x64xbf16, #tpu.memory_space<vmem>>, vector<1x32x64xbf16>
    %80 = vector.shape_cast %79 : vector<1x32x64xbf16> to vector<32x64xbf16>
    %cst_62 = arith.constant dense<0.000000e+00> : vector<256x64xf32>
    %81 = tpu.matmul %78, %80, %cst_62 {dimension_numbers = #tpu.dot_dimension_numbers<[1], [0], [0], [1], [0, 0, 1, 1], [], []>} : vector<256x32xbf16>, vector<32x64xbf16>, vector<256x64xf32> -> vector<256x64xf32>
    %82 = arith.addf %74, %81 : vector<256x64xf32>
    %c0_63 = arith.constant 0 : index
    %c0_64 = arith.constant 0 : index
    %83 = vector.load %arg5[%c0_63, %c0_64] : memref<1x64xf32, #tpu.memory_space<vmem>>, vector<1x64xf32>
    %84 = vector.broadcast %83 : vector<1x64xf32> to vector<256x64xf32>
    %85 = arith.addf %82, %84 : vector<256x64xf32>
    %cst_65 = arith.constant 0.000000e+00 : f32
    %86 = vector.broadcast %cst_65 : f32 to vector<256x64xf32>
    %87 = arith.maximumf %85, %86 : vector<256x64xf32>
    %c0_66 = arith.constant 0 : index
    %c0_67 = arith.constant 0 : index
    %c1_68 = arith.constant 1 : index
    %c0_69 = arith.constant 0 : index
    %c0_70 = arith.constant 0 : index
    %88 = vector.load %arg7[%c0_66, %c0_67, %c1_68, %c0_69, %c0_70] : memref<1x2x2x256x64xf32, #tpu.memory_space<vmem>>, vector<1x1x1x256x64xf32>
    %89 = vector.shape_cast %88 : vector<1x1x1x256x64xf32> to vector<256x64xf32>
    %90 = vector.shape_cast %87 : vector<256x64xf32> to vector<1x1x1x256x64xf32>
    tpu.vector_store %arg7[%c0_66, %c0_67, %c1_68, %c0_69, %c0_70], %90 {strides = array<i32>} : memref<1x2x2x256x64xf32, #tpu.memory_space<vmem>>, vector<1x1x1x256x64xf32>,
    %cst_71 = arith.constant 0.000000e+00 : f32
    %91 = vector.broadcast %cst_71 : f32 to vector<256x64xf32>
    %c32_72 = arith.constant 32 : index
    %c0_73 = arith.constant 0 : index
    %92 = vector.load %arg8[%c32_72, %c0_73] : memref<320x32xf32, #tpu.memory_space<vmem>>, vector<256x32xf32>
    %93 = arith.truncf %92 : vector<256x32xf32> to vector<256x32xbf16>
    %c9 = arith.constant 9 : index
    %c0_74 = arith.constant 0 : index
    %c0_75 = arith.constant 0 : index
    %94 = vector.load %arg4[%c9, %c0_74, %c0_75] : memref<16x32x64xbf16, #tpu.memory_space<vmem>>, vector<1x32x64xbf16>
    %95 = vector.shape_cast %94 : vector<1x32x64xbf16> to vector<32x64xbf16>
    %cst_76 = arith.constant dense<0.000000e+00> : vector<256x64xf32>
    %96 = tpu.matmul %93, %95, %cst_76 {dimension_numbers = #tpu.dot_dimension_numbers<[1], [0], [0], [1], [0, 0, 1, 1], [], []>} : vector<256x32xbf16>, vector<32x64xbf16>, vector<256x64xf32> -> vector<256x64xf32>
    %97 = arith.addf %91, %96 : vector<256x64xf32>
    %c31_77 = arith.constant 31 : index
    %c0_78 = arith.constant 0 : index
    %98 = vector.load %arg8[%c31_77, %c0_78] : memref<320x32xf32, #tpu.memory_space<vmem>>, vector<256x32xf32>
    %99 = vector.broadcast %14 : vector<256x1xf32> to vector<256x32xf32>
    %100 = arith.mulf %98, %99 : vector<256x32xf32>
    %101 = arith.truncf %100 : vector<256x32xf32> to vector<256x32xbf16>
    %c11 = arith.constant 11 : index
    %c0_79 = arith.constant 0 : index
    %c0_80 = arith.constant 0 : index
    %102 = vector.load %arg4[%c11, %c0_79, %c0_80] : memref<16x32x64xbf16, #tpu.memory_space<vmem>>, vector<1x32x64xbf16>
    %103 = vector.shape_cast %102 : vector<1x32x64xbf16> to vector<32x64xbf16>
    %cst_81 = arith.constant dense<0.000000e+00> : vector<256x64xf32>
    %104 = tpu.matmul %101, %103, %cst_81 {dimension_numbers = #tpu.dot_dimension_numbers<[1], [0], [0], [1], [0, 0, 1, 1], [], []>} : vector<256x32xbf16>, vector<32x64xbf16>, vector<256x64xf32> -> vector<256x64xf32>
    %105 = arith.addf %97, %104 : vector<256x64xf32>
    %c48 = arith.constant 48 : index
    %c0_82 = arith.constant 0 : index
    %106 = vector.load %arg8[%c48, %c0_82] : memref<320x32xf32, #tpu.memory_space<vmem>>, vector<256x32xf32>
    %107 = arith.truncf %106 : vector<256x32xf32> to vector<256x32xbf16>
    %c1_83 = arith.constant 1 : index
    %c0_84 = arith.constant 0 : index
    %c0_85 = arith.constant 0 : index
    %108 = vector.load %arg4[%c1_83, %c0_84, %c0_85] : memref<16x32x64xbf16, #tpu.memory_space<vmem>>, vector<1x32x64xbf16>
    %109 = vector.shape_cast %108 : vector<1x32x64xbf16> to vector<32x64xbf16>
    %cst_86 = arith.constant dense<0.000000e+00> : vector<256x64xf32>
    %110 = tpu.matmul %107, %109, %cst_86 {dimension_numbers = #tpu.dot_dimension_numbers<[1], [0], [0], [1], [0, 0, 1, 1], [], []>} : vector<256x32xbf16>, vector<32x64xbf16>, vector<256x64xf32> -> vector<256x64xf32>
    %111 = arith.addf %105, %110 : vector<256x64xf32>
    %c47 = arith.constant 47 : index
    %c0_87 = arith.constant 0 : index
    %112 = vector.load %arg8[%c47, %c0_87] : memref<320x32xf32, #tpu.memory_space<vmem>>, vector<256x32xf32>
    %113 = vector.broadcast %14 : vector<256x1xf32> to vector<256x32xf32>
    %114 = arith.mulf %112, %113 : vector<256x32xf32>
    %115 = arith.truncf %114 : vector<256x32xf32> to vector<256x32xbf16>
    %c3 = arith.constant 3 : index
    %c0_88 = arith.constant 0 : index
    %c0_89 = arith.constant 0 : index
    %116 = vector.load %arg4[%c3, %c0_88, %c0_89] : memref<16x32x64xbf16, #tpu.memory_space<vmem>>, vector<1x32x64xbf16>
    %117 = vector.shape_cast %116 : vector<1x32x64xbf16> to vector<32x64xbf16>
    %cst_90 = arith.constant dense<0.000000e+00> : vector<256x64xf32>
    %118 = tpu.matmul %115, %117, %cst_90 {dimension_numbers = #tpu.dot_dimension_numbers<[1], [0], [0], [1], [0, 0, 1, 1], [], []>} : vector<256x32xbf16>, vector<32x64xbf16>, vector<256x64xf32> -> vector<256x64xf32>
    %119 = arith.addf %111, %118 : vector<256x64xf32>
    %c0_91 = arith.constant 0 : index
    %c0_92 = arith.constant 0 : index
    %120 = vector.load %arg5[%c0_91, %c0_92] : memref<1x64xf32, #tpu.memory_space<vmem>>, vector<1x64xf32>
    %121 = vector.broadcast %120 : vector<1x64xf32> to vector<256x64xf32>
    %122 = arith.addf %119, %121 : vector<256x64xf32>
    %cst_93 = arith.constant 0.000000e+00 : f32
    %123 = vector.broadcast %cst_93 : f32 to vector<256x64xf32>
    %124 = arith.maximumf %122, %123 : vector<256x64xf32>
    %c0_94 = arith.constant 0 : index
    %c1_95 = arith.constant 1 : index
    %c0_96 = arith.constant 0 : index
    %c0_97 = arith.constant 0 : index
    %c0_98 = arith.constant 0 : index
    %125 = vector.load %arg7[%c0_94, %c1_95, %c0_96, %c0_97, %c0_98] : memref<1x2x2x256x64xf32, #tpu.memory_space<vmem>>, vector<1x1x1x256x64xf32>
    %126 = vector.shape_cast %125 : vector<1x1x1x256x64xf32> to vector<256x64xf32>
    %127 = vector.shape_cast %124 : vector<256x64xf32> to vector<1x1x1x256x64xf32>
    tpu.vector_store %arg7[%c0_94, %c1_95, %c0_96, %c0_97, %c0_98], %127 {strides = array<i32>} : memref<1x2x2x256x64xf32, #tpu.memory_space<vmem>>, vector<1x1x1x256x64xf32>,
    %cst_99 = arith.constant 0.000000e+00 : f32
    %128 = vector.broadcast %cst_99 : f32 to vector<256x64xf32>
    %c32_100 = arith.constant 32 : index
    %c0_101 = arith.constant 0 : index
    %129 = vector.load %arg8[%c32_100, %c0_101] : memref<320x32xf32, #tpu.memory_space<vmem>>, vector<256x32xf32>
    %130 = arith.truncf %129 : vector<256x32xf32> to vector<256x32xbf16>
    %c10 = arith.constant 10 : index
    %c0_102 = arith.constant 0 : index
    %c0_103 = arith.constant 0 : index
    %131 = vector.load %arg4[%c10, %c0_102, %c0_103] : memref<16x32x64xbf16, #tpu.memory_space<vmem>>, vector<1x32x64xbf16>
    %132 = vector.shape_cast %131 : vector<1x32x64xbf16> to vector<32x64xbf16>
    %cst_104 = arith.constant dense<0.000000e+00> : vector<256x64xf32>
    %133 = tpu.matmul %130, %132, %cst_104 {dimension_numbers = #tpu.dot_dimension_numbers<[1], [0], [0], [1], [0, 0, 1, 1], [], []>} : vector<256x32xbf16>, vector<32x64xbf16>, vector<256x64xf32> -> vector<256x64xf32>
    %134 = arith.addf %128, %133 : vector<256x64xf32>
    %c33_105 = arith.constant 33 : index
    %c0_106 = arith.constant 0 : index
    %135 = vector.load %arg8[%c33_105, %c0_106] : memref<320x32xf32, #tpu.memory_space<vmem>>, vector<256x32xf32>
    %136 = vector.broadcast %16 : vector<256x1xf32> to vector<256x32xf32>
    %137 = arith.mulf %135, %136 : vector<256x32xf32>
    %138 = arith.truncf %137 : vector<256x32xf32> to vector<256x32xbf16>
    %c8 = arith.constant 8 : index
    %c0_107 = arith.constant 0 : index
    %c0_108 = arith.constant 0 : index
    %139 = vector.load %arg4[%c8, %c0_107, %c0_108] : memref<16x32x64xbf16, #tpu.memory_space<vmem>>, vector<1x32x64xbf16>
    %140 = vector.shape_cast %139 : vector<1x32x64xbf16> to vector<32x64xbf16>
    %cst_109 = arith.constant dense<0.000000e+00> : vector<256x64xf32>
    %141 = tpu.matmul %138, %140, %cst_109 {dimension_numbers = #tpu.dot_dimension_numbers<[1], [0], [0], [1], [0, 0, 1, 1], [], []>} : vector<256x32xbf16>, vector<32x64xbf16>, vector<256x64xf32> -> vector<256x64xf32>
    %142 = arith.addf %134, %141 : vector<256x64xf32>
    %c48_110 = arith.constant 48 : index
    %c0_111 = arith.constant 0 : index
    %143 = vector.load %arg8[%c48_110, %c0_111] : memref<320x32xf32, #tpu.memory_space<vmem>>, vector<256x32xf32>
    %144 = arith.truncf %143 : vector<256x32xf32> to vector<256x32xbf16>
    %c2 = arith.constant 2 : index
    %c0_112 = arith.constant 0 : index
    %c0_113 = arith.constant 0 : index
    %145 = vector.load %arg4[%c2, %c0_112, %c0_113] : memref<16x32x64xbf16, #tpu.memory_space<vmem>>, vector<1x32x64xbf16>
    %146 = vector.shape_cast %145 : vector<1x32x64xbf16> to vector<32x64xbf16>
    %cst_114 = arith.constant dense<0.000000e+00> : vector<256x64xf32>
    %147 = tpu.matmul %144, %146, %cst_114 {dimension_numbers = #tpu.dot_dimension_numbers<[1], [0], [0], [1], [0, 0, 1, 1], [], []>} : vector<256x32xbf16>, vector<32x64xbf16>, vector<256x64xf32> -> vector<256x64xf32>
    %148 = arith.addf %142, %147 : vector<256x64xf32>
    %c49 = arith.constant 49 : index
    %c0_115 = arith.constant 0 : index
    %149 = vector.load %arg8[%c49, %c0_115] : memref<320x32xf32, #tpu.memory_space<vmem>>, vector<256x32xf32>
    %150 = vector.broadcast %16 : vector<256x1xf32> to vector<256x32xf32>
    %151 = arith.mulf %149, %150 : vector<256x32xf32>
    %152 = arith.truncf %151 : vector<256x32xf32> to vector<256x32xbf16>
    %c0_116 = arith.constant 0 : index
    %c0_117 = arith.constant 0 : index
    %c0_118 = arith.constant 0 : index
    %153 = vector.load %arg4[%c0_116, %c0_117, %c0_118] : memref<16x32x64xbf16, #tpu.memory_space<vmem>>, vector<1x32x64xbf16>
    %154 = vector.shape_cast %153 : vector<1x32x64xbf16> to vector<32x64xbf16>
    %cst_119 = arith.constant dense<0.000000e+00> : vector<256x64xf32>
    %155 = tpu.matmul %152, %154, %cst_119 {dimension_numbers = #tpu.dot_dimension_numbers<[1], [0], [0], [1], [0, 0, 1, 1], [], []>} : vector<256x32xbf16>, vector<32x64xbf16>, vector<256x64xf32> -> vector<256x64xf32>
    %156 = arith.addf %148, %155 : vector<256x64xf32>
    %c0_120 = arith.constant 0 : index
    %c0_121 = arith.constant 0 : index
    %157 = vector.load %arg5[%c0_120, %c0_121] : memref<1x64xf32, #tpu.memory_space<vmem>>, vector<1x64xf32>
    %158 = vector.broadcast %157 : vector<1x64xf32> to vector<256x64xf32>
    %159 = arith.addf %156, %158 : vector<256x64xf32>
    %cst_122 = arith.constant 0.000000e+00 : f32
    %160 = vector.broadcast %cst_122 : f32 to vector<256x64xf32>
    %161 = arith.maximumf %159, %160 : vector<256x64xf32>
    %c0_123 = arith.constant 0 : index
    %c1_124 = arith.constant 1 : index
    %c1_125 = arith.constant 1 : index
    %c0_126 = arith.constant 0 : index
    %c0_127 = arith.constant 0 : index
    %162 = vector.load %arg7[%c0_123, %c1_124, %c1_125, %c0_126, %c0_127] : memref<1x2x2x256x64xf32, #tpu.memory_space<vmem>>, vector<1x1x1x256x64xf32>
    %163 = vector.shape_cast %162 : vector<1x1x1x256x64xf32> to vector<256x64xf32>
    %164 = vector.shape_cast %161 : vector<256x64xf32> to vector<1x1x1x256x64xf32>
    tpu.vector_store %arg7[%c0_123, %c1_124, %c1_125, %c0_126, %c0_127], %164 {strides = array<i32>} : memref<1x2x2x256x64xf32, #tpu.memory_space<vmem>>, vector<1x1x1x256x64xf32>,
    return
  }
  func.func @transform_0(%arg0: i32) -> (i32, i32, i32) {
    %c0_i32 = arith.constant 0 : i32
    %c0_i32_0 = arith.constant 0 : i32
    %c0_i32_1 = arith.constant 0 : i32
    return %arg0, %c0_i32, %c0_i32_0 : i32, i32, i32
  }
  func.func @transform_1(%arg0: i32) -> (i32, i32) {
    %c0_i32 = arith.constant 0 : i32
    %c0_i32_0 = arith.constant 0 : i32
    %c0_i32_1 = arith.constant 0 : i32
    return %c0_i32, %c0_i32_0 : i32, i32
  }
  func.func @transform_2(%arg0: i32) -> (i32, i32) {
    %c0_i32 = arith.constant 0 : i32
    %c0_i32_0 = arith.constant 0 : i32
    %c0_i32_1 = arith.constant 0 : i32
    return %c0_i32, %c0_i32_0 : i32, i32
  }
  func.func @transform_3(%arg0: i32) -> (i32, i32, i32) {
    %c0_i32 = arith.constant 0 : i32
    %c0_i32_0 = arith.constant 0 : i32
    %c0_i32_1 = arith.constant 0 : i32
    %c0_i32_2 = arith.constant 0 : i32
    return %c0_i32, %c0_i32_0, %c0_i32_1 : i32, i32, i32
  }
  func.func @transform_4(%arg0: i32) -> (i32, i32) {
    %c0_i32 = arith.constant 0 : i32
    %c0_i32_0 = arith.constant 0 : i32
    %c0_i32_1 = arith.constant 0 : i32
    return %c0_i32, %c0_i32_0 : i32, i32
  }
  func.func @transform_5(%arg0: i32) -> (i32, i32, i32) {
    %c0_i32 = arith.constant 0 : i32
    %c0_i32_0 = arith.constant 0 : i32
    %c0_i32_1 = arith.constant 0 : i32
    %c0_i32_2 = arith.constant 0 : i32
    return %c0_i32, %c0_i32_0, %c0_i32_1 : i32, i32, i32
  }
  func.func @transform_6(%arg0: i32) -> (i32, i32, i32, i32, i32) {
    %c0_i32 = arith.constant 0 : i32
    %c0_i32_0 = arith.constant 0 : i32
    %c0_i32_1 = arith.constant 0 : i32
    %c0_i32_2 = arith.constant 0 : i32
    %c0_i32_3 = arith.constant 0 : i32
    return %arg0, %c0_i32, %c0_i32_0, %c0_i32_1, %c0_i32_2 : i32, i32, i32, i32, i32
  }
}

</mosaic_0001>

<bundles_post_ra>
// kernel: decoder_block_forward.1
= control target key start
LH: loop header
LB: loop body
LE: loop exit
PB: predicated region body
PF: predicated region fallthrough
CT: control target
= control target key end

     0   :  { %s6049_s21 = smov 0   ;;  %s9248_s0 = inlined_call_operand.vmem [shape: bf16[2,256,128], index: 0, kind: input, shape index: {}]   ;;  %s9249_s1 = inlined_call_operand.vmem [shape: bf16[128,32], index: 1, kind: input, shape index: {}]   ;;  %s9250_s2 = inlined_call_operand.vmem [shape: f32[1,32], index: 2, kind: input, shape index: {}]   ;;  %s9251_s3 = inlined_call_operand.vmem [shape: bf16[16,32,64], index: 3, kind: input, shape index: {}]   ;;  %s9252_s4 = inlined_call_operand.vmem [shape: f32[1,64], index: 4, kind: input, shape index: {}]   ;;  %s9253_s5 = inlined_call_operand.vmem [shape: f32[2,256,1], index: 5, kind: input, shape index: {}]   ;;  %s9254_s6 = inlined_call_operand.vmem [shape: f32[2,2,2,256,64], index: 6, kind: output, shape index: {}]  }
   0x1 LB: > { %s5198_s22 = sadd.s32 4294967295, %s6010_s21   ;;  %p5202_p0 = scmp.ge.s32.totalorder %s6010_s21, 1  ;;  %s6010_s21 = sphi %s6049_s21, %s16_s21  }
   0x2   : > { %p212_p1 = scmp.lt.s32.totalorder %s6010_s21, 3 }
   0x4   : > { %p213_p2 = pnand %p5202_p0, %p212_p1 }
   0x6   : > { %216 = sbr.rel (%p213_p2) target bundleno = 1612 (0x64c), region = 44 }
   0xb   : > { %v633_v0 = vld [vmem:[%s9253_s5 + $0xb0] sm:$0xff]  ;;  %v623_v1 = vld [vmem:[%s9253_s5 + $0x60] sm:$0xff]  ;;  %v5902_v2 = vld [vmem:[%s9249_s1 + $0x38] sm:$0xff]  ;;  %v6012_v3 = vmov 0   ;;  %p242_p3 = scmp.lt.s32.totalorder %s5198_s22, 1  ;;  %vm570_vm0 = vcmask 261120  }
   0xc   : > { %5952 = vset.pattern.permute.xlu1 %v6012_v3  ;;  %5951 = vset.pattern.permute.xlu0 %v6012_v3  ;;  %v613_v4 = vld [vmem:[%s9253_s5 + $0x10] sm:$0xff]  ;;  %v634_v6 = vld [vmem:[%s9253_s5 + $0xb8] sm:$0xff]  ;;  %v624_v7 = vld [vmem:[%s9253_s5 + $0x68] sm:$0xff]  ;;  %vm1840_vm1 = vcmask 523264  }
   0xd   : > { %873 = vperm.xlu1 %5952, %v633_v0   ;;  %823 = vperm.xlu0 %5951, %v623_v1   ;;  %v5901_v5 = vld [vmem:[%s9249_s1 + $0x30] sm:$0xff]  ;;  %v5900_v8 = vld [vmem:[%s9249_s1 + $0x28] sm:$0xff]  ;;  %v614_v9 = vld [vmem:[%s9253_s5 + $0x18] sm:$0xff]  ;;  %s9996_s22 = smov (!%p242_p3, %s5198_s22), 1 }
   0xe   : > { %449 = vmatpush.bf16.msra.mxu0 %v5902_v2  ;;  %5953 = vset.pattern.permute.xlu2 %v6012_v3  ;;  %v5899_v10 = vld [vmem:[%s9249_s1 + $0x20] sm:$0xff]  ;;  %v626_v11 = vld [vmem:[%s9253_s5 + $0x78] sm:$0xff]  ;;  %v625_v12 = vld [vmem:[%s9253_s5 + $0x70] sm:$0xff]  ;;  %s5877_s15 = sshll.u32 %s9996_s22, 7  ;;  %s5878_s17 = sshll.u32 %s9996_s22, 10 }
   0xf   : > { %773 = vperm.xlu2 %5953, %v613_v4   ;;  %v5898_v13 = vld [vmem:[%s9249_s1 + $0x18] sm:$0xff]  ;;  %v635_v14 = vld [vmem:[%s9253_s5 + $0xc0] sm:$0xff]  ;;  %v5897_v15 = vld [vmem:[%s9249_s1 + $0x10] sm:$0xff]  ;;  %s6127_s20 = scalar_lea.vmem %s9248_s0, %s5877_s15  ;;  %s7482_s23 = scalar_lea.vmem %s9254_s6, %s5878_s17 }
  0x10   : > { %v636_v16 = vld [vmem:[%s9253_s5 + $0xc8] sm:$0xff]  ;;  %v615_v17 = vld [vmem:[%s9253_s5 + $0x20] sm:$0xff]  ;;  %v637_v24 = vld [vmem:[%s9253_s5 + $0xd0] sm:$0xff] }
  0x11   : > { %v5896_v18 = vld [vmem:[%s9249_s1 + $0x8] sm:$0xff]  ;;  %v5895_v20 = vld [vmem:[%s9249_s1] sm:$0xff]  ;;  %v638_v25 = vld [vmem:[%s9253_s5 + $0xd8] sm:$0xff] }
  0x12   : > { %450 = vmatpush.bf16.msra.mxu0 %v5901_v5  ;;  %v616_v19 = vld [vmem:[%s9253_s5 + $0x28] sm:$0xff]  ;;  %v627_v21 = vld [vmem:[%s9253_s5 + $0x80] sm:$0xff]  ;;  %v617_v26 = vld [vmem:[%s9253_s5 + $0x30] sm:$0xff] }
  0x13   : > { %v628_v22 = vld [vmem:[%s9253_s5 + $0x88] sm:$0xff]  ;;  %v5879_v23 = vld [vmem:[%s6127_s20] sm:$0xff]  ;;  %v618_v27 = vld [vmem:[%s9253_s5 + $0x38] sm:$0xff] }
  0x14   : > { %v629_v28 = vld [vmem:[%s9253_s5 + $0x90] sm:$0xff]  ;;  %v630_v29 = vld [vmem:[%s9253_s5 + $0x98] sm:$0xff]  ;;  %v5880_v30 = vld [vmem:[%s6127_s20 + $0x8] sm:$0xff] }
  0x15   : > { %878 = vperm.xlu1 %5952, %v634_v6   ;;  %828 = vperm.xlu0 %5951, %v624_v7   ;;  %v639_v31 = vld [vmem:[%s9253_s5 + $0xe0] sm:$0xff]  ;;  %v640_v32 = vld [vmem:[%s9253_s5 + $0xe8] sm:$0xff]  ;;  %v5881_v37 = vld [vmem:[%s6127_s20 + $0x10] sm:$0xff] }
  0x16   : > { %451 = vmatpush.bf16.msra.mxu0 %v5900_v8  ;;  %v619_v33 = vld [vmem:[%s9253_s5 + $0x40] sm:$0xff]  ;;  %v620_v34 = vld [vmem:[%s9253_s5 + $0x48] sm:$0xff]  ;;  %v641_v38 = vld [vmem:[%s9253_s5 + $0xf0] sm:$0xff] }
  0x17   : > { %778 = vperm.xlu2 %5953, %v614_v9   ;;  %v631_v35 = vld [vmem:[%s9253_s5 + $0xa0] sm:$0xff]  ;;  %v632_v36 = vld [vmem:[%s9253_s5 + $0xa8] sm:$0xff]  ;;  %v642_v39 = vld [vmem:[%s9253_s5 + $0xf8] sm:$0xff] }
  0x18   : > { %v621_v40 = vld [vmem:[%s9253_s5 + $0x50] sm:$0xff]  ;;  %v622_v41 = vld [vmem:[%s9253_s5 + $0x58] sm:$0xff]  ;;  %v612_v42 = vld [vmem:[%s9253_s5 + $0x8] sm:$0xff] }
  0x19   : > { %v611_v43 = vld [vmem:[%s9253_s5] sm:$0xff]  ;;  %v5882_v44 = vld [vmem:[%s6127_s20 + $0x18] sm:$0xff]  ;;  %v5305_v46 = vld [vmem:[%s9253_s5 + $0x110] sm:$0xff] }
  0x1a   : > { %452 = vmatpush.bf16.msra.mxu0 %v5899_v10  ;;  %v5303_v45 = vld [vmem:[%s9253_s5 + $0x100] sm:$0xff]  ;;  %v5304_v47 = vld [vmem:[%s9253_s5 + $0x108] sm:$0xff]  ;;  %v5306_v48 = vld [vmem:[%s9253_s5 + $0x118] sm:$0xff]  ;;  %v6013_v10 = vmov 0.0  }
  0x1b   : > { %v5308_v50 = vld [vmem:[%s9253_s5 + $0x128] sm:$0xff]  ;;  %v5307_v51 = vld [vmem:[%s9253_s5 + $0x120] sm:$0xff]  ;;  %v5309_v53 = vld [vmem:[%s9253_s5 + $0x130] sm:$0xff]  ;;  %573 = vst.msk [vmem:[#allocation2 + $0x10] sm:$0xff] %vm570_vm0, %v6013_v10 }
  0x1c   : > { %v5883_v52 = vld [vmem:[%s6127_s20 + $0x20] sm:$0xff]  ;;  %v5310_v55 = vld [vmem:[%s9253_s5 + $0x138] sm:$0xff]  ;;  %v5312_v57 = vld [vmem:[%s9253_s5 + $0x148] sm:$0xff]  ;;  %574 = vst.msk [vmem:[#allocation2 + $0x18] sm:$0xff] %vm570_vm0, %v6013_v10 }
  0x1d   : > { %838 = vperm.xlu1 %5952, %v626_v11   ;;  %833 = vperm.xlu0 %5951, %v625_v12   ;;  %v5311_v56 = vld [vmem:[%s9253_s5 + $0x140] sm:$0xff]  ;;  %v5884_v59 = vld [vmem:[%s6127_s20 + $0x28] sm:$0xff]  ;;  %v5313_v60 = vld [vmem:[%s9253_s5 + $0x150] sm:$0xff]  ;;  %572 = vst.msk [vmem:[#allocation2 + $0x8] sm:$0xff] %vm570_vm0, %v6013_v10 }
  0x1e   : > { %453 = vmatpush.bf16.msra.mxu0 %v5898_v13  ;;  %v5314_v61 = vld [vmem:[%s9253_s5 + $0x158] sm:$0xff]  ;;  %v5316_v1 = vld [vmem:[%s9253_s5 + $0x168] sm:$0xff]  ;;  %v5885_v5 = vld [vmem:[%s6127_s20 + $0x30] sm:$0xff]  ;;  %575 = vst.msk [vmem:[#allocation2 + $0x120] sm:$0xff] %vm570_vm0, %v6013_v10 }
  0x1f   : > { %883 = vperm.xlu2 %5953, %v635_v14   ;;  %v5317_v6 = vld [vmem:[%s9253_s5 + $0x170] sm:$0xff]  ;;  %v5315_v11 = vld [vmem:[%s9253_s5 + $0x160] sm:$0xff]  ;;  %576 = vst.msk [vmem:[#allocation2 + $0x128] sm:$0xff] %vm570_vm0, %v6013_v10 }
  0x20   : > { %577 = vst.msk [vmem:[#allocation2 + $0x130] sm:$0xff] %vm570_vm0, %v6013_v10 }
  0x22   : > { %454 = vmatpush.bf16.msra.mxu0 %v5897_v15  ;;  %v5886_v15 = vld [vmem:[%s6127_s20 + $0x38] sm:$0xff] }
  0x25   : > { %888 = vperm.xlu0 %5951, %v636_v16   ;;  %783 = vperm.xlu1 %5952, %v615_v17   ;;  %v5319_v16 = vld [vmem:[%s9253_s5 + $0x180] sm:$0xff] }
  0x26   : > { %455 = vmatpush.bf16.msra.mxu0 %v5896_v18 }
  0x27   : > { %788 = vperm.xlu2 %5953, %v616_v19  }
  0x2a   : > { %456 = vmatpush.bf16.msra.mxu0 %v5895_v20  ;;  %v5320_v20 = vld [vmem:[%s9253_s5 + $0x188] sm:$0xff] }
  0x2d   : > { %843 = vperm.xlu0 %5951, %v627_v21   ;;  %848 = vperm.xlu1 %5952, %v628_v22  }
  0x2e   : > { %457 = vmatmul.bf16.vlgmr.msra.gmra.mxu0 %v5879_v23  ;;  %v6297_v23 = vld [vmem:[%s9250_s2] ss:$0 sm:$0xff] }
  0x2f   : > { %893 = vperm.xlu2 %5953, %v637_v24  }
  0x35   : > { %898 = vperm.xlu0 %5951, %v638_v25   ;;  %793 = vperm.xlu1 %5952, %v617_v26   ;;  %v5887_v25 = vld [vmem:[%s6127_s20 + $0x40] sm:$0xff] }
  0x37   : > { %798 = vperm.xlu2 %5953, %v618_v27   ;;  %v5906_v27 = vld [vmem:[%s9251_s3 + $0x78] sm:$0xff] }
  0x38   : > { %5935 = vmatpush.bf16.msra.mxu1 %v5906_v27  ;;  %5936 = vmatpush.bf16.msra.mxu2 %v5906_v27 }
  0x39   : > { %1040 = vmatpush.bf16.msrb.mxu0 %v5906_v27  ;;  %5937 = vmatpush.bf16.msra.mxu3 %v5906_v27 }
  0x3d   : > { %853 = vperm.xlu0 %5951, %v629_v28   ;;  %858 = vperm.xlu1 %5952, %v630_v29   ;;  %v5318_v29 = vld [vmem:[%s9253_s5 + $0x178] sm:$0xff] }
  0x3e   : > { %462 = vmatmul.bf16.gmra.mxu0 %v5880_v30 }
  0x3f   : > { %903 = vperm.xlu2 %5953, %v639_v31  }
  0x45   : > { %908 = vperm.xlu0 %5951, %v640_v32   ;;  %803 = vperm.xlu1 %5952, %v619_v33   ;;  %v5905_v33 = vld [vmem:[%s9251_s3 + $0x70] sm:$0xff] }
  0x46   : > { %5938 = vmatpush.bf16.msra.mxu1 %v5905_v33  ;;  %5939 = vmatpush.bf16.msra.mxu2 %v5905_v33 }
  0x47   : > { %808 = vperm.xlu2 %5953, %v620_v34   ;;  %1041 = vmatpush.bf16.msrb.mxu0 %v5905_v33 }
  0x48   : > { %5940 = vmatpush.bf16.msra.mxu3 %v5905_v33 }
  0x4d   : > { %863 = vperm.xlu0 %5951, %v631_v35   ;;  %868 = vperm.xlu1 %5952, %v632_v36  }
  0x4e   : > { %467 = vmatmul.bf16.gmra.mxu0 %v5881_v37 }
  0x4f   : > { %913 = vperm.xlu2 %5953, %v641_v38   ;;  %v5322_v38 = vld [vmem:[%s9253_s5 + $0x198] sm:$0xff] }
  0x55   : > { %918 = vperm.xlu0 %5951, %v642_v39   ;;  %813 = vperm.xlu1 %5952, %v621_v40  }
  0x57   : > { %818 = vperm.xlu2 %5953, %v622_v41   ;;  %v5888_v41 = vld [vmem:[%s6127_s20 + $0x48] sm:$0xff] }
  0x5d   : > { %768 = vperm.xlu1 %5952, %v612_v42   ;;  %763 = vperm.xlu0 %5951, %v611_v43  }
  0x5e   : > { %472 = vmatmul.bf16.gmra.mxu0 %v5882_v44 }
  0x5f   : > { %1960 = vperm.xlu2 %5953, %v5303_v45  }
  0x65   : > { %1970 = vperm.xlu1 %5952, %v5305_v46   ;;  %1965 = vperm.xlu0 %5951, %v5304_v47   ;;  %v5323_v46 = vld [vmem:[%s9253_s5 + $0x1a0] sm:$0xff]  ;;  %v5325_v47 = vld [vmem:[%s9253_s5 + $0x1b0] sm:$0xff] }
  0x67   : > { %1975 = vperm.xlu2 %5953, %v5306_v48  }
  0x69   : > { %v6205_v49 = vpop.permute.xlu2 %773 }
  0x6a   : > { %9431 = vst [vmem:[#allocation3_spill] sm:$0xff] %v6205_v49 }
  0x6d   : > { %1985 = vperm.xlu1 %5952, %v5308_v50   ;;  %1980 = vperm.xlu0 %5951, %v5307_v51  }
  0x6e   : > { %477 = vmatmul.bf16.gmra.mxu0 %v5883_v52 }
  0x6f   : > { %1990 = vperm.xlu2 %5953, %v5309_v53  }
  0x71   : > { %v6217_v54 = vpop.permute.xlu2 %778 }
  0x72   : > { %9432 = vst [vmem:[#allocation4_spill] sm:$0xff] %v6217_v54 }
  0x75   : > { %1995 = vperm.xlu0 %5951, %v5310_v55   ;;  %2000 = vperm.xlu1 %5952, %v5311_v56  }
  0x77   : > { %2005 = vperm.xlu2 %5953, %v5312_v57   ;;  %v5321_v57 = vld [vmem:[%s9253_s5 + $0x190] sm:$0xff] }
  0x79   : > { %v6228_v58 = vpop.permute.xlu2 %883 }
  0x7a   : > { %9433 = vst [vmem:[#allocation5_spill] sm:$0xff] %v6228_v58 }
  0x7d   : > { %2010 = vperm.xlu0 %5951, %v5313_v60   ;;  %2015 = vperm.xlu1 %5952, %v5314_v61   ;;  %v5328_v60 = vld [vmem:[%s9253_s5 + $0x1c8] sm:$0xff] }
  0x7e   : > { %482 = vmatmul.bf16.gmra.mxu0 %v5884_v59  ;;  %v5326_v59 = vld [vmem:[%s9253_s5 + $0x1b8] sm:$0xff] }
  0x7f   : > { %v6237_v62 = vpop.permute.xlu1 %873  ;;  %v6239_v63 = vpop.permute.xlu0 %823  ;;  %2020 = vperm.xlu2 %5953, %v5315_v11  }
  0x80   : > { %9434 = vst [vmem:[#allocation6_spill] sm:$0xff] %v6237_v62 }
  0x81   : > { %9435 = vst [vmem:[#allocation7_spill] sm:$0xff] %v6239_v63  ;;  %v6241_v0 = vpop.permute.xlu2 %788 }
  0x82   : > { %9436 = vst [vmem:[#allocation8_spill] sm:$0xff] %v6241_v0 }
  0x85   : > { %2025 = vperm.xlu0 %5951, %v5316_v1   ;;  %2030 = vperm.xlu1 %5952, %v5317_v6  }
  0x87   : > { %v6246_v2 = vpop.permute.xlu1 %878  ;;  %v6248_v3 = vpop.permute.xlu0 %828  ;;  %2035 = vperm.xlu2 %5953, %v5318_v29  }
  0x88   : > { %9437 = vst [vmem:[#allocation9_spill] sm:$0xff] %v6246_v2 }
  0x89   : > { %9438 = vst [vmem:[#allocation10_spill] sm:$0xff] %v6248_v3  ;;  %v6250_v4 = vpop.permute.xlu2 %893 }
  0x8a   : > { %9439 = vst [vmem:[#allocation11_spill] sm:$0xff] %v6250_v4 }
  0x8d   : > { %2040 = vperm.xlu0 %5951, %v5319_v16   ;;  %2045 = vperm.xlu1 %5952, %v5320_v20   ;;  %v5329_v16 = vld [vmem:[%s9253_s5 + $0x1d0] sm:$0xff]  ;;  %v5331_v20 = vld [vmem:[%s9253_s5 + $0x1e0] sm:$0xff] }
  0x8e   : > { %487 = vmatmul.bf16.gmra.mxu0 %v5885_v5  ;;  %v5889_v5 = vld [vmem:[%s6127_s20 + $0x50] sm:$0xff] }
  0x8f   : > { %v6256_v7 = vpop.permute.xlu1 %838  ;;  %v6258_v8 = vpop.permute.xlu0 %833  ;;  %2050 = vperm.xlu2 %5953, %v5321_v57  }
  0x90   : > { %9440 = vst [vmem:[#allocation12_spill] sm:$0xff] %v6256_v7 }
  0x91   : > { %9441 = vst [vmem:[#allocation13_spill] sm:$0xff] %v6258_v8  ;;  %v6260_v9 = vpop.permute.xlu2 %798 }
  0x92   : > { %9442 = vst [vmem:[#allocation14_spill] sm:$0xff] %v6260_v9 }
  0x95   : > { %2055 = vperm.xlu0 %5951, %v5322_v38   ;;  %2060 = vperm.xlu1 %5952, %v5323_v46  }
  0x97   : > { %v6270_v12 = vpop.permute.xlu0 %888  ;;  %v6272_v13 = vpop.permute.xlu1 %783 }
  0x98   : > { %9443 = vst [vmem:[#allocation15_spill] sm:$0xff] %v6270_v12 }
  0x99   : > { %9444 = vst [vmem:[#allocation16_spill] sm:$0xff] %v6272_v13  ;;  %v6275_v14 = vpop.permute.xlu2 %903 }
  0x9a   : > { %9445 = vst [vmem:[#allocation17_spill] sm:$0xff] %v6275_v14 }
  0x9d   : > { %2070 = vperm.xlu0 %5951, %v5325_v47   ;;  %2075 = vperm.xlu1 %5952, %v5326_v59   ;;  %v5324_v59 = vld [vmem:[%s9253_s5 + $0x1a8] sm:$0xff] }
  0x9e   : > { %492 = vmatmul.bf16.gmra.mxu0 %v5886_v15  ;;  %2065 = vperm.xlu2 %5953, %v5324_v59  }
  0x9f   : > { %v6281_v17 = vpop.permute.xlu0 %843  ;;  %v6283_v18 = vpop.permute.xlu1 %848 }
  0xa0   : > { %9446 = vst [vmem:[#allocation18_spill] sm:$0xff] %v6281_v17 }
  0xa1   : > { %9447 = vst [vmem:[#allocation19_spill] sm:$0xff] %v6283_v18  ;;  %v6285_v19 = vpop.permute.xlu2 %808 }
  0xa2   : > { %9448 = vst [vmem:[#allocation20_spill] sm:$0xff] %v6285_v19 }
  0xa5   : > { %2085 = vperm.xlu0 %5951, %v5328_v60   ;;  %2090 = vperm.xlu1 %5952, %v5329_v16   ;;  %v5332_v60 = vld [vmem:[%s9253_s5 + $0x1e8] sm:$0xff] }
  0xa7   : > { %v6290_v21 = vpop.permute.xlu0 %898  ;;  %v6292_v22 = vpop.permute.xlu1 %793 }
  0xa8   : > { %9449 = vst [vmem:[#allocation21_spill] sm:$0xff] %v6290_v21 }
  0xa9   : > { %9450 = vst [vmem:[#allocation22_spill] sm:$0xff] %v6292_v22  ;;  %v6299_v24 = vpop.permute.xlu2 %913 }
  0xaa   : > { %9451 = vst [vmem:[#allocation23_spill] sm:$0xff] %v6299_v24 }
  0xab   : > { %v458_v26 = vpop.f32.mrf.mxu0 }
  0xac   : > { %v459_v28 = vadd.f32 %v6297_v23, %v458_v26 }
  0xad   : > { %2100 = vperm.xlu0 %5951, %v5331_v20   ;;  %2105 = vperm.xlu1 %5952, %v5332_v60  }
  0xae   : > { %v538_v30 = vmax.f32 %v459_v28, 0.0  ;;  %497 = vmatmul.bf16.gmra.mxu0 %v5887_v25 }
  0xaf   : > { %v6309_v31 = vpop.permute.xlu0 %853  ;;  %v6311_v32 = vpop.permute.xlu1 %858 }
  0xb0   : > { %9452 = vst [vmem:[#allocation24_spill] sm:$0xff] %v6309_v31 }
  0xb1   : > { %9453 = vst [vmem:[#allocation25_spill] sm:$0xff] %v6311_v32  ;;  %v6317_v35 = vpop.permute.xlu2 %818 }
  0xb2   : > { %579 = vst.msk [vmem:[#allocation2 + $0x20] sm:$0xff] %vm570_vm0, %v538_v30 }
  0xb3   : > { %v460_v34 = vpop.f32.mrf.mxu0  ;;  %9454 = vst [vmem:[#allocation26_spill] sm:$0xff] %v6317_v35 }
  0xb4   : > { %v461_v36 = vadd.f32 %v6297_v23, %v460_v34 }
  0xb6   : > { %v539_v37 = vmax.f32 %v461_v36, 0.0 }
  0xb7   : > { %v6323_v39 = vpop.permute.xlu0 %908  ;;  %v6325_v40 = vpop.permute.xlu1 %803 }
  0xb8   : > { %9455 = vst [vmem:[#allocation27_spill] sm:$0xff] %v6323_v39 }
  0xb9   : > { %9456 = vst [vmem:[#allocation28_spill] sm:$0xff] %v6325_v40  ;;  %v6330_v44 = vpop.permute.xlu2 %1960  ;;  %v6381_v34 = vld [vmem:[#allocation2 + $0x1f] sm:$0xff] }
  0xba   : > { %580 = vst.msk [vmem:[#allocation2 + $0x28] sm:$0xff] %vm570_vm0, %v539_v37 }
  0xbb   : > { %v463_v42 = vpop.f32.mrf.mxu0 }
  0xbc   : > { %v464_v43 = vadd.f32 %v6297_v23, %v463_v42 }
  0xbe   : > { %v540_v45 = vmax.f32 %v464_v43, 0.0  ;;  %502 = vmatmul.bf16.gmra.mxu0 %v5888_v41 }
  0xbf   : > { %v6338_v50 = vpop.permute.xlu0 %863  ;;  %v6340_v51 = vpop.permute.xlu1 %868 }
  0xc0   : > { %9457 = vst [vmem:[#allocation29_spill] sm:$0xff] %v6338_v50 }
  0xc1   : > { %v1926_v48 = vld [vmem:[#allocation2 + $0x21] sm:$0xff]  ;;  %9458 = vst [vmem:[#allocation30_spill] sm:$0xff] %v6340_v51 }
  0xc2   : > { %581 = vst.msk [vmem:[#allocation2 + $0x30] sm:$0xff] %vm570_vm0, %v540_v45  ;;  %v6344_v52 = vmul.f32 %v6330_v44, %v1926_v48  ;;  %v6371_v26 = vld [vmem:[#allocation2 + $0x27] sm:$0xff] }
  0xc3   : > { %v465_v53 = vpop.f32.mrf.mxu0 }
  0xc4   : > { %v466_v55 = vadd.f32 %v6297_v23, %v465_v53 }
  0xc6   : > { %v541_v56 = vmax.f32 %v466_v55, 0.0 }
  0xc7   : > { %v6356_v61 = vpop.permute.xlu0 %918  ;;  %v6358_v1 = vpop.permute.xlu1 %813 }
  0xc8   : > { %9459 = vst [vmem:[#allocation31_spill] sm:$0xff] %v6356_v61 }
  0xc9   : > { %9460 = vst [vmem:[#allocation32_spill] sm:$0xff] %v6358_v1  ;;  %v3740_v15 = vld [vmem:[#allocation2 + $0x2f] sm:$0xff] }
  0xca   : > { %582 = vst.msk [vmem:[#allocation2 + $0x38] sm:$0xff] %vm570_vm0, %v541_v56  ;;  %v923_v38 = vmul.f32 %v3740_v15, %v6205_v49  ;;  %v6394_v43 = vmul.f32 %v3740_v15, %v6272_v13 }
  0xcb   : > { %v468_v6 = vpop.f32.mrf.mxu0 }
  0xcc   : > { %v469_v10 = vadd.f32 %v6297_v23, %v468_v6  ;;  %v2706_v6 = vld [vmem:[#allocation2 + $0x29] sm:$0xff] }
  0xce   : > { %v542_v11 = vmax.f32 %v469_v10, 0.0  ;;  %507 = vmatmul.bf16.gmra.mxu0 %v5889_v5  ;;  %v5334_v5 = vld [vmem:[%s9253_s5 + $0x1f8] sm:$0xff] }
  0xcf   : > { %v6369_v25 = vpop.permute.xlu1 %768  ;;  %v6373_v28 = vpop.permute.xlu0 %763  ;;  %2115 = vperm.xlu0 %5951, %v5334_v5  }
  0xd0   : > { %583 = vst.msk [vmem:[#allocation2 + $0x40] sm:$0xff] %vm570_vm0, %v542_v11  ;;  %v3156_v30 = vmul.f32 %v6369_v25, %v6371_v26  ;;  %v3155_v36 = vmul.f32 %v6373_v28, %v6381_v34  ;;  %v6386_v37 = vmul.f32 %v3740_v15, %v6373_v28 }
  0xd1   : > { %v3741_v27 = vld [vmem:[#allocation2 + $0x37] sm:$0xff] }
  0xd2   : > { %v1928_v29 = vld [vmem:[#allocation2 + $0x31] sm:$0xff]  ;;  %v6379_v33 = vmul.f32 %v3741_v27, %v6369_v25  ;;  %9462 = vst [vmem:[#allocation34_spill] sm:$0xff] %v6386_v37  ;;  %v924_v41 = vmul.f32 %v3741_v27, %v6217_v54  ;;  %v6397_v45 = vmul.f32 %v3741_v27, %v6241_v0  ;;  %v6399_v46 = vpack.c.bf16 %v3156_v30, %v3155_v36  ;;  %v6425_v30 = vpop.permute.xlu2 %1975 }
  0xd3   : > { %v6391_v42 = vmul.f32 %v6330_v44, %v1928_v29  ;;  %v470_v48 = vpop.f32.mrf.mxu0 }
  0xd4   : > { %9461 = vst [vmem:[#allocation33_spill] sm:$0xff] %v6379_v33  ;;  %v471_v53 = vadd.f32 %v6297_v23, %v470_v48  ;;  %v954_v55 = vpack.c.bf16 %v924_v41, %v923_v38  ;;  %v5890_v48 = vld [vmem:[%s6127_s20 + $0x58] sm:$0xff]  ;;  %v5909_v33 = vld [vmem:[%s9251_s3 + $0xf0] sm:$0xff] }
  0xd5   : > { %9463 = vst [vmem:[#allocation35_spill] sm:$0xff] %v6391_v42 }
  0xd6   : > { %9464 = vst [vmem:[#allocation36_spill] sm:$0xff] %v6399_v46  ;;  %v543_v57 = vmax.f32 %v471_v53, 0.0  ;;  %5352 = vmatmul.msk.bf16.vlgmr.msra.gmra.mxu1 %vm570_vm0, %v954_v55 }
  0xd7   : > { %v6416_v10 = vpop.permute.xlu1 %1970  ;;  %v6418_v11 = vpop.permute.xlu0 %1965  ;;  %v4778_v20 = vld [vmem:[#allocation2 + $0x39] sm:$0xff] }
  0xd8   : > { %584 = vst.msk [vmem:[#allocation2 + $0x48] sm:$0xff] %vm570_vm0, %v543_v57  ;;  %v6422_v15 = vmul.f32 %v6416_v10, %v1928_v29  ;;  %v2119_v16 = vmul.f32 %v2706_v6, %v6418_v11  ;;  %v1929_v27 = vld [vmem:[#allocation2 + $0x39] sm:$0xff]  ;;  %v6428_v36 = vmul.f32 %v4778_v20, %v6418_v11 }
  0xd9   : > { %v4163_v38 = vld [vmem:[#allocation2 + $0x39] sm:$0xff]  ;;  %v6435_v53 = vmul.f32 %v6425_v30, %v1929_v27 }
  0xda   : > { %9465 = vst [vmem:[#allocation37_spill] sm:$0xff] %v6422_v15  ;;  %v6431_v41 = vpack.c.bf16 %v2119_v16, %v6344_v52  ;;  %v6443_v60 = vmul.f32 %v4163_v38, %v6425_v30  ;;  %v733_v5 = vld [vmem:[#allocation2 + $0x3f] sm:$0xff] }
  0xdb   : > { %9466 = vst [vmem:[#allocation38_spill] sm:$0xff] %v6428_v36  ;;  %v473_v55 = vpop.f32.mrf.mxu0  ;;  %v5327_v52 = vld [vmem:[%s9253_s5 + $0x1c0] sm:$0xff]  ;;  %v925_v38 = vmul.f32 %v6272_v13, %v733_v5  ;;  %v6460_v16 = vmul.f32 %v6292_v22, %v733_v5 }
  0xdc   : > { %9467 = vst [vmem:[#allocation39_spill] sm:$0xff] %v6431_v41  ;;  %v474_v57 = vadd.f32 %v6297_v23, %v473_v55  ;;  %2080 = vperm.xlu2 %5953, %v5327_v52   ;;  %v3742_v29 = vld [vmem:[#allocation2 + $0x3f] sm:$0xff] }
  0xdd   : > { %9468 = vst [vmem:[#allocation40_spill] sm:$0xff] %v6435_v53  ;;  %v6466_v52 = vmul.f32 %v3742_v29, %v6272_v13  ;;  %v5330_v29 = vld [vmem:[%s9253_s5 + $0x1d8] sm:$0xff] }
  0xde   : > { %9469 = vst [vmem:[#allocation41_spill] sm:$0xff] %v6443_v60  ;;  %v544_v6 = vmax.f32 %v474_v57, 0.0  ;;  %512 = vmatmul.bf16.gmra.mxu0 %v5890_v48 }
  0xdf   : > { %v4779_v20 = vld [vmem:[#allocation2 + $0x41] sm:$0xff]  ;;  %v6450_v27 = vpop.permute.xlu0 %1980  ;;  %9472 = vst [vmem:[#allocation44_spill] sm:$0xff] %v6466_v52 }
  0xe0   : > { %9470 = vst [vmem:[#allocation42_spill] sm:$0xff] %v6450_v27  ;;  %v734_v55 = vld [vmem:[#allocation2 + $0x47] sm:$0xff]  ;;  %v6453_v47 = vmul.f32 %v4779_v20, %v6416_v10  ;;  %v4196_v57 = vmul.f32 %v4779_v20, %v6450_v27 }
  0xe1   : > { %585 = vst.msk [vmem:[#allocation2 + $0x50] sm:$0xff] %vm570_vm0, %v544_v6  ;;  %v3743_v48 = vld [vmem:[#allocation2 + $0x47] sm:$0xff]  ;;  %v926_v59 = vmul.f32 %v6241_v0, %v734_v55  ;;  %v6463_v56 = vmul.f32 %v6260_v9, %v734_v55  ;;  %v6480_v55 = vpop.permute.xlu1 %1985 }
  0xe2   : > { %9471 = vst [vmem:[#allocation43_spill] sm:$0xff] %v6453_v47  ;;  %v6469_v60 = vmul.f32 %v3743_v48, %v6241_v0  ;;  %v6511_v47 = vpop.permute.xlu2 %1990 }
  0xe3   : > { %v475_v6 = vpop.f32.mrf.mxu0  ;;  %v955_v42 = vpack.c.bf16 %v926_v59, %v925_v38  ;;  %9474 = vst [vmem:[#allocation46_spill] sm:$0xff] %v6480_v55 }
  0xe4   : > { %9473 = vst [vmem:[#allocation45_spill] sm:$0xff] %v6469_v60  ;;  %v476_v36 = vadd.f32 %v6297_v23, %v475_v6  ;;  %2095 = vperm.xlu2 %5953, %v5330_v29   ;;  %v5891_v6 = vld [vmem:[%s6127_s20 + $0x60] sm:$0xff] }
  0xe5   : > { %9479 = vst [vmem:[#allocation51_spill] sm:$0xff] %v6511_v47 }
  0xe6   : > { %v545_v37 = vmax.f32 %v476_v36, 0.0  ;;  %5353 = vmatmul.msk.bf16.gmra.mxu1 %vm570_vm0, %v955_v42 }
  0xe8   : > { %v1931_v48 = vld [vmem:[#allocation2 + $0x49] sm:$0xff]  ;;  %586 = vst.msk [vmem:[#allocation2 + $0x58] sm:$0xff] %vm570_vm0, %v545_v37 }
  0xe9   : > { %v2123_v59 = vmul.f32 %v6480_v55, %v1931_v48  ;;  %v4780_v38 = vld [vmem:[#allocation2 + $0x49] sm:$0xff] }
  0xea   : > { %v6488_v36 = vmul.f32 %v4780_v38, %v6425_v30  ;;  %v735_v60 = vld [vmem:[#allocation2 + $0x4f] sm:$0xff] }
  0xeb   : > { %v6485_v20 = vpack.c.bf16 %v2123_v59, %v4196_v57  ;;  %v478_v42 = vpop.f32.mrf.mxu0  ;;  %v5333_v37 = vld [vmem:[%s9253_s5 + $0x1f0] sm:$0xff]  ;;  %v927_v57 = vmul.f32 %v6292_v22, %v735_v60  ;;  %v6500_v38 = vmul.f32 %v6325_v40, %v735_v60 }
  0xec   : > { %9476 = vst [vmem:[#allocation48_spill] sm:$0xff] %v6488_v36  ;;  %v479_v5 = vadd.f32 %v6297_v23, %v478_v42  ;;  %v3744_v29 = vld [vmem:[#allocation2 + $0x4f] sm:$0xff]  ;;  %2110 = vperm.xlu2 %5953, %v5333_v37  }
  0xed   : > { %9475 = vst [vmem:[#allocation47_spill] sm:$0xff] %v6485_v20  ;;  %v5910_v20 = vld [vmem:[%s9251_s3 + $0xf8] sm:$0xff] }
  0xee   : > { %v546_v13 = vmax.f32 %v479_v5, 0.0  ;;  %517 = vmatmul.bf16.gmra.mxu0 %v5891_v6  ;;  %v6506_v6 = vmul.f32 %v3744_v29, %v6292_v22  ;;  %1657 = vmatpush.bf16.msrb.mxu1 %v5910_v20  ;;  %v6563_v20 = vpop.permute.xlu1 %2000 }
  0xef   : > { %v736_v48 = vld [vmem:[#allocation2 + $0x57] sm:$0xff]  ;;  %9487 = vst [vmem:[#allocation59_spill] sm:$0xff] %v6563_v20 }
  0xf0   : > { %587 = vst.msk [vmem:[#allocation2 + $0x60] sm:$0xff] %vm570_vm0, %v546_v13  ;;  %v928_v59 = vmul.f32 %v6260_v9, %v736_v48  ;;  %v6503_v42 = vmul.f32 %v6285_v19, %v736_v48  ;;  %v3745_v5 = vld [vmem:[#allocation2 + $0x57] sm:$0xff] }
  0xf1   : > { %9477 = vst [vmem:[#allocation49_spill] sm:$0xff] %v6506_v6  ;;  %v6509_v52 = vmul.f32 %v3745_v5, %v6260_v9  ;;  %v4781_v37 = vld [vmem:[#allocation2 + $0x51] sm:$0xff]  ;;  %v6522_v9 = vpop.permute.xlu0 %1995  ;;  %v5892_v6 = vld [vmem:[%s6127_s20 + $0x68] sm:$0xff] }
  0xf2   : > { %v956_v13 = vpack.c.bf16 %v928_v59, %v927_v57  ;;  %v6518_v0 = vmul.f32 %v4781_v37, %v6511_v47  ;;  %v1932_v5 = vld [vmem:[#allocation2 + $0x51] sm:$0xff]  ;;  %9481 = vst [vmem:[#allocation53_spill] sm:$0xff] %v6522_v9  ;;  %1658 = vmatpush.bf16.msrb.mxu1 %v5909_v33 }
  0xf3   : > { %9478 = vst [vmem:[#allocation50_spill] sm:$0xff] %v6509_v52  ;;  %v480_v60 = vpop.f32.mrf.mxu0  ;;  %v6526_v59 = vmul.f32 %v6511_v47, %v1932_v5  ;;  %v6533_v52 = vmul.f32 %v4781_v37, %v6450_v27 }
  0xf4   : > { %9480 = vst [vmem:[#allocation52_spill] sm:$0xff] %v6518_v0  ;;  %v481_v29 = vadd.f32 %v6297_v23, %v480_v60 }
  0xf5   : > { %9482 = vst [vmem:[#allocation54_spill] sm:$0xff] %v6526_v59 }
  0xf6   : > { %v547_v22 = vmax.f32 %v481_v29, 0.0  ;;  %5354 = vmatmul.msk.bf16.gmra.mxu1 %vm570_vm0, %v956_v13  ;;  %9484 = vst [vmem:[#allocation56_spill] sm:$0xff] %v6533_v52 }
  0xf7   : > { %v1933_v57 = vld [vmem:[#allocation2 + $0x59] sm:$0xff] }
  0xf8   : > { %588 = vst.msk [vmem:[#allocation2 + $0x68] sm:$0xff] %vm570_vm0, %v547_v22  ;;  %v6529_v36 = vmul.f32 %v6522_v9, %v1933_v57  ;;  %v4782_v48 = vld [vmem:[#allocation2 + $0x59] sm:$0xff] }
  0xf9   : > { %v6536_v60 = vmul.f32 %v4782_v48, %v6480_v55  ;;  %v6539_v13 = vmul.f32 %v4782_v48, %v6522_v9  ;;  %v737_v37 = vld [vmem:[#allocation2 + $0x5f] sm:$0xff] }
  0xfa   : > { %9483 = vst [vmem:[#allocation55_spill] sm:$0xff] %v6529_v36  ;;  %v3746_v53 = vld [vmem:[#allocation2 + $0x5f] sm:$0xff]  ;;  %v6558_v57 = vmul.f32 %v6358_v1, %v737_v37 }
  0xfb   : > { %9485 = vst [vmem:[#allocation57_spill] sm:$0xff] %v6536_v60  ;;  %v483_v29 = vpop.f32.mrf.mxu0  ;;  %v6568_v52 = vmul.f32 %v3746_v53, %v6325_v40  ;;  %v6580_v53 = vpop.permute.xlu2 %2005 }
  0xfc   : > { %9486 = vst [vmem:[#allocation58_spill] sm:$0xff] %v6539_v13  ;;  %v484_v5 = vadd.f32 %v6297_v23, %v483_v29  ;;  %v929_v29 = vmul.f32 %v6325_v40, %v737_v37 }
  0xfd   : > { %9488 = vst [vmem:[#allocation60_spill] sm:$0xff] %v6568_v52 }
  0xfe   : > { %v548_v15 = vmax.f32 %v484_v5, 0.0  ;;  %522 = vmatmul.bf16.gmra.mxu0 %v5892_v6  ;;  %9491 = vst [vmem:[#allocation63_spill] sm:$0xff] %v6580_v53 }
  0xff   : > { %v738_v48 = vld [vmem:[#allocation2 + $0x67] sm:$0xff] }
 0x100   : > { %589 = vst.msk [vmem:[#allocation2 + $0x70] sm:$0xff] %vm570_vm0, %v548_v15  ;;  %v930_v22 = vmul.f32 %v6285_v19, %v738_v48  ;;  %v6561_v0 = vmul.f32 %v6317_v35, %v738_v48  ;;  %v3747_v6 = vld [vmem:[#allocation2 + $0x67] sm:$0xff] }
 0x101   : > { %v4783_v5 = vld [vmem:[#allocation2 + $0x61] sm:$0xff]  ;;  %v6571_v60 = vmul.f32 %v3747_v6, %v6285_v19 }
 0x102   : > { %v957_v13 = vpack.c.bf16 %v930_v22, %v929_v29  ;;  %v6574_v48 = vmul.f32 %v4783_v5, %v6563_v20  ;;  %v1934_v15 = vld [vmem:[#allocation2 + $0x61] sm:$0xff]  ;;  %v6591_v36 = vmul.f32 %v4783_v5, %v6511_v47 }
 0x103   : > { %9489 = vst [vmem:[#allocation61_spill] sm:$0xff] %v6571_v60  ;;  %v485_v37 = vpop.f32.mrf.mxu0  ;;  %v6584_v40 = vmul.f32 %v6563_v20, %v1934_v15 }
 0x104   : > { %9490 = vst [vmem:[#allocation62_spill] sm:$0xff] %v6574_v48  ;;  %v486_v59 = vadd.f32 %v6297_v23, %v485_v37  ;;  %v5893_v37 = vld [vmem:[%s6127_s20 + $0x70] sm:$0xff]  ;;  %v6621_v48 = vpop.permute.xlu0 %2010 }
 0x105   : > { %9492 = vst [vmem:[#allocation64_spill] sm:$0xff] %v6584_v40 }
 0x106   : > { %v549_v29 = vmax.f32 %v486_v59, 0.0  ;;  %5355 = vmatmul.msk.bf16.gmra.mxu1 %vm570_vm0, %v957_v13  ;;  %9494 = vst [vmem:[#allocation66_spill] sm:$0xff] %v6591_v36 }
 0x107   : > { %v1935_v6 = vld [vmem:[#allocation2 + $0x69] sm:$0xff] }
 0x108   : > { %590 = vst.msk [vmem:[#allocation2 + $0x78] sm:$0xff] %vm570_vm0, %v549_v29  ;;  %v6587_v33 = vmul.f32 %v6580_v53, %v1935_v6  ;;  %v4784_v19 = vld [vmem:[#allocation2 + $0x69] sm:$0xff] }
 0x109   : > { %v6594_v59 = vmul.f32 %v4784_v19, %v6522_v9  ;;  %v6597_v13 = vmul.f32 %v4784_v19, %v6580_v53  ;;  %v739_v5 = vld [vmem:[#allocation2 + $0x6f] sm:$0xff] }
 0x10a   : > { %9493 = vst [vmem:[#allocation65_spill] sm:$0xff] %v6587_v33  ;;  %v3748_v41 = vld [vmem:[#allocation2 + $0x6f] sm:$0xff]  ;;  %v931_v19 = vmul.f32 %v6358_v1, %v739_v5  ;;  %v6610_v29 = vmul.f32 %v6239_v63, %v739_v5 }
 0x10b   : > { %9495 = vst [vmem:[#allocation67_spill] sm:$0xff] %v6594_v59  ;;  %v488_v22 = vpop.f32.mrf.mxu0  ;;  %v6616_v52 = vmul.f32 %v3748_v41, %v6358_v1  ;;  %v1507_v1 = vld [vmem:[#allocation2 + $0x17] sm:$0xff] }
 0x10c   : > { %9496 = vst [vmem:[#allocation68_spill] sm:$0xff] %v6597_v13  ;;  %v489_v15 = vadd.f32 %v6297_v23, %v488_v22 }
 0x10d   : > { %9497 = vst [vmem:[#allocation69_spill] sm:$0xff] %v6616_v52 }
 0x10e   : > { %v550_v60 = vmax.f32 %v489_v15, 0.0  ;;  %527 = vmatmul.bf16.gmra.mxu0 %v5893_v37 }
 0x10f   : > { %v740_v47 = vld [vmem:[#allocation2 + $0x77] sm:$0xff] }
 0x110   : > { %591 = vst.msk [vmem:[#allocation2 + $0x80] sm:$0xff] %vm570_vm0, %v550_v60  ;;  %v932_v9 = vmul.f32 %v6317_v35, %v740_v47  ;;  %v6613_v22 = vmul.f32 %v6248_v3, %v740_v47  ;;  %v3749_v6 = vld [vmem:[#allocation2 + $0x77] sm:$0xff] }
 0x111   : > { %v6619_v37 = vmul.f32 %v3749_v6, %v6317_v35  ;;  %v4785_v15 = vld [vmem:[#allocation2 + $0x71] sm:$0xff] }
 0x112   : > { %v958_v60 = vpack.c.bf16 %v932_v9, %v931_v19  ;;  %v6628_v36 = vmul.f32 %v4785_v15, %v6621_v48  ;;  %v1936_v6 = vld [vmem:[#allocation2 + $0x71] sm:$0xff]  ;;  %v5916_v9 = vld [vmem:[%s9251_s3 + $0xe8] sm:$0xff]  ;;  %v6635_v19 = vpop.permute.xlu1 %2015 }
 0x113   : > { %9498 = vst [vmem:[#allocation70_spill] sm:$0xff] %v6619_v37  ;;  %v490_v5 = vpop.f32.mrf.mxu0  ;;  %2588 = vmatpush.bf16.msra.mxu0 %v5916_v9  ;;  %v6639_v47 = vmul.f32 %v6621_v48, %v1936_v6  ;;  %v1506_v35 = vld [vmem:[#allocation2 + $0xf] sm:$0xff] }
 0x114   : > { %9499 = vst [vmem:[#allocation71_spill] sm:$0xff] %v6628_v36  ;;  %v491_v41 = vadd.f32 %v6297_v23, %v490_v5  ;;  %v1538_v27 = vmul.f32 %v1506_v35, %v6373_v28  ;;  %v6681_v28 = vpop.permute.xlu2 %2020 }
 0x115   : > { %9500 = vst [vmem:[#allocation72_spill] sm:$0xff] %v6639_v47 }
 0x116   : > { %v551_v59 = vmax.f32 %v491_v41, 0.0  ;;  %5356 = vmatmul.msk.bf16.gmra.mxu1 %vm570_vm0, %v958_v60  ;;  %v5894_v41 = vld [vmem:[%s6127_s20 + $0x78] sm:$0xff]  ;;  %v6646_v60 = vmul.f32 %v4785_v15, %v6563_v20 }
 0x117   : > { %v1937_v13 = vld [vmem:[#allocation2 + $0x79] sm:$0xff] }
 0x118   : > { %592 = vst.msk [vmem:[#allocation2 + $0x88] sm:$0xff] %vm570_vm0, %v551_v59  ;;  %v6642_v52 = vmul.f32 %v6635_v19, %v1937_v13  ;;  %v4786_v5 = vld [vmem:[#allocation2 + $0x79] sm:$0xff] }
 0x119   : > { %9502 = vst [vmem:[#allocation74_spill] sm:$0xff] %v6646_v60  ;;  %v6649_v37 = vmul.f32 %v4786_v5, %v6580_v53  ;;  %v5915_v59 = vld [vmem:[%s9251_s3 + $0xe0] sm:$0xff]  ;;  %v6657_v13 = vmul.f32 %v4786_v5, %v6635_v19  ;;  %v1539_v53 = vmul.f32 %v1507_v1, %v6369_v25 }
 0x11a   : > { %9501 = vst [vmem:[#allocation73_spill] sm:$0xff] %v6642_v52  ;;  %v741_v33 = vld [vmem:[#allocation2 + $0x7f] sm:$0xff]  ;;  %2589 = vmatpush.bf16.msra.mxu0 %v5915_v59 }
 0x11b   : > { %9503 = vst [vmem:[#allocation75_spill] sm:$0xff] %v6649_v37  ;;  %v493_v40 = vpop.f32.mrf.mxu0  ;;  %v3750_v6 = vld [vmem:[#allocation2 + $0x7f] sm:$0xff]  ;;  %v6670_v15 = vmul.f32 %v6258_v8, %v741_v33 }
 0x11c   : > { %9504 = vst [vmem:[#allocation76_spill] sm:$0xff] %v6657_v13  ;;  %v494_v9 = vadd.f32 %v6297_v23, %v493_v40  ;;  %v933_v40 = vmul.f32 %v6239_v63, %v741_v33  ;;  %v6676_v1 = vmul.f32 %v3750_v6, %v6239_v63  ;;  %v6751_v63 = vpop.permute.xlu2 %2035 }
 0x11e   : > { %v552_v55 = vmax.f32 %v494_v9, 0.0  ;;  %532 = vmatmul.bf16.gmra.mxu0 %v5894_v41  ;;  %9505 = vst [vmem:[#allocation77_spill] sm:$0xff] %v6676_v1  ;;  %v1570_v41 = vpack.c.bf16 %v1539_v53, %v1538_v27  ;;  %v1541_v1 = vmul.f32 %v6217_v54, %v6371_v26 }
 0x11f   : > { %v742_v47 = vld [vmem:[#allocation2 + $0x87] sm:$0xff] }
 0x120   : > { %593 = vst.msk [vmem:[#allocation2 + $0x90] sm:$0xff] %vm570_vm0, %v552_v55  ;;  %v934_v5 = vmul.f32 %v6248_v3, %v742_v47  ;;  %v6673_v59 = vmul.f32 %v6256_v7, %v742_v47  ;;  %v3751_v20 = vld [vmem:[#allocation2 + $0x87] sm:$0xff] }
 0x121   : > { %v6679_v35 = vmul.f32 %v3751_v20, %v6248_v3  ;;  %v4787_v25 = vld [vmem:[#allocation2 + $0x81] sm:$0xff] }
 0x122   : > { %v959_v55 = vpack.c.bf16 %v934_v5, %v933_v40  ;;  %v6688_v36 = vmul.f32 %v4787_v25, %v6681_v28  ;;  %v1938_v13 = vld [vmem:[#allocation2 + $0x81] sm:$0xff]  ;;  %v6693_v40 = vpop.permute.xlu0 %2025 }
 0x123   : > { %9506 = vst [vmem:[#allocation78_spill] sm:$0xff] %v6679_v35  ;;  %v495_v33 = vpop.f32.mrf.mxu0  ;;  %v6697_v53 = vmul.f32 %v6681_v28, %v1938_v13 }
 0x124   : > { %9507 = vst [vmem:[#allocation79_spill] sm:$0xff] %v6688_v36  ;;  %v496_v6 = vadd.f32 %v6297_v23, %v495_v33  ;;  %5357 = vmatmul.msk.bf16.vlgmr.msra.gmra.mxu2 %vm570_vm0, %v959_v55  ;;  %v6703_v33 = vmul.f32 %v4787_v25, %v6621_v48 }
 0x125   : > { %9508 = vst [vmem:[#allocation80_spill] sm:$0xff] %v6697_v53 }
 0x126   : > { %v553_v20 = vmax.f32 %v496_v6, 0.0  ;;  %5431 = vmatmul.msk.bf16.vlgmr.msrb.gmra.mxu1 %vm570_vm0, %v1570_v41  ;;  %9510 = vst [vmem:[#allocation82_spill] sm:$0xff] %v6703_v33  ;;  %v6737_v33 = vpop.permute.xlu1 %2030 }
 0x127   : > { %v1939_v27 = vld [vmem:[#allocation2 + $0x89] sm:$0xff] }
 0x128   : > { %594 = vst.msk [vmem:[#allocation2 + $0x98] sm:$0xff] %vm570_vm0, %v553_v20  ;;  %v6700_v5 = vmul.f32 %v6693_v40, %v1939_v27  ;;  %v4788_v47 = vld [vmem:[#allocation2 + $0x89] sm:$0xff] }
 0x129   : > { %v6706_v55 = vmul.f32 %v4788_v47, %v6635_v19  ;;  %v6709_v41 = vmul.f32 %v4788_v47, %v6693_v40  ;;  %v743_v25 = vld [vmem:[#allocation2 + $0x8f] sm:$0xff] }
 0x12a   : > { %9509 = vst [vmem:[#allocation81_spill] sm:$0xff] %v6700_v5  ;;  %v3752_v37 = vld [vmem:[#allocation2 + $0x8f] sm:$0xff]  ;;  %v6726_v27 = vmul.f32 %v6281_v17, %v743_v25 }
 0x12b   : > { %9511 = vst [vmem:[#allocation83_spill] sm:$0xff] %v6706_v55  ;;  %v498_v6 = vpop.f32.mrf.mxu0  ;;  %v6732_v36 = vmul.f32 %v3752_v37, %v6258_v8  ;;  %v1540_v55 = vmul.f32 %v6205_v49, %v6381_v34  ;;  %v2469_v34 = vld [vmem:[#allocation2 + $0x10] sm:$0xff]  ;;  %v5904_v49 = vld [vmem:[%s9251_s3 + $0x58] sm:$0xff] }
 0x12c   : > { %9512 = vst [vmem:[#allocation84_spill] sm:$0xff] %v6709_v41  ;;  %v499_v13 = vadd.f32 %v6297_v23, %v498_v6  ;;  %v935_v6 = vmul.f32 %v6258_v8, %v743_v25  ;;  %1189 = vmatpush.bf16.msrb.mxu2 %v5904_v49 }
 0x12d   : > { %9513 = vst [vmem:[#allocation85_spill] sm:$0xff] %v6732_v36  ;;  %v1571_v8 = vpack.c.bf16 %v1541_v1, %v1540_v55 }
 0x12e   : > { %v554_v60 = vmax.f32 %v499_v13, 0.0  ;;  %5351 = vmatmul.msk.bf16.vlgmr.msrb.gmra.mxu0 %vm570_vm0, %v6399_v46 }
 0x12f   : > { %v744_v47 = vld [vmem:[#allocation2 + $0x97] sm:$0xff] }
 0x130   : > { %595 = vst.msk [vmem:[#allocation2 + $0xa0] sm:$0xff] %vm570_vm0, %v554_v60  ;;  %v936_v20 = vmul.f32 %v6256_v7, %v744_v47  ;;  %v6729_v9 = vmul.f32 %v6283_v18, %v744_v47  ;;  %v3753_v13 = vld [vmem:[#allocation2 + $0x97] sm:$0xff] }
 0x131   : > { %v6735_v41 = vmul.f32 %v3753_v13, %v6256_v7  ;;  %v4789_v26 = vld [vmem:[#allocation2 + $0x91] sm:$0xff] }
 0x132   : > { %v960_v60 = vpack.c.bf16 %v936_v20, %v935_v6  ;;  %v6746_v37 = vmul.f32 %v4789_v26, %v6737_v33  ;;  %v1940_v20 = vld [vmem:[#allocation2 + $0x91] sm:$0xff]  ;;  %v6763_v1 = vmul.f32 %v4789_v26, %v6681_v28 }
 0x133   : > { %9514 = vst [vmem:[#allocation86_spill] sm:$0xff] %v6735_v41  ;;  %v500_v35 = vpop.f32.mrf.mxu0  ;;  %v2470_v6 = vld [vmem:[#allocation2 + $0x18] sm:$0xff]  ;;  %v6755_v47 = vmul.f32 %v6737_v33, %v1940_v20 }
 0x134   : > { %9515 = vst [vmem:[#allocation87_spill] sm:$0xff] %v6746_v37  ;;  %v501_v13 = vadd.f32 %v6297_v23, %v500_v35  ;;  %5358 = vmatmul.msk.bf16.gmra.mxu2 %vm570_vm0, %v960_v60  ;;  %v6760_v60 = vpack.c.bf16 %v2470_v6, %v2469_v34 }
 0x135   : > { %9516 = vst [vmem:[#allocation88_spill] sm:$0xff] %v6755_v47 }
 0x136   : > { %v555_v7 = vmax.f32 %v501_v13, 0.0  ;;  %5432 = vmatmul.msk.bf16.gmra.mxu1 %vm570_vm0, %v1571_v8  ;;  %9518 = vst [vmem:[#allocation90_spill] sm:$0xff] %v6763_v1  ;;  %v6795_v1 = vpop.permute.xlu0 %2040 }
 0x137   : > { %v1941_v25 = vld [vmem:[#allocation2 + $0x99] sm:$0xff]  ;;  %9523 = vst [vmem:[#allocation95_spill] sm:$0xff] %v6795_v1 }
 0x138   : > { %596 = vst.msk [vmem:[#allocation2 + $0xa8] sm:$0xff] %vm570_vm0, %v555_v7  ;;  %v6758_v36 = vmul.f32 %v6751_v63, %v1941_v25  ;;  %v4790_v35 = vld [vmem:[#allocation2 + $0x99] sm:$0xff] }
 0x139   : > { %v6766_v8 = vmul.f32 %v4790_v35, %v6693_v40  ;;  %v6769_v55 = vmul.f32 %v4790_v35, %v6751_v63  ;;  %v745_v26 = vld [vmem:[#allocation2 + $0x9f] sm:$0xff] }
 0x13a   : > { %9517 = vst [vmem:[#allocation89_spill] sm:$0xff] %v6758_v36  ;;  %v3754_v41 = vld [vmem:[#allocation2 + $0x9f] sm:$0xff]  ;;  %v937_v3 = vmul.f32 %v6281_v17, %v745_v26 }
 0x13b   : > { %9519 = vst [vmem:[#allocation91_spill] sm:$0xff] %v6766_v8  ;;  %v503_v7 = vpop.f32.mrf.mxu0 }
 0x13c   : > { %9520 = vst [vmem:[#allocation92_spill] sm:$0xff] %v6769_v55  ;;  %v504_v20 = vadd.f32 %v6297_v23, %v503_v7  ;;  %v6784_v7 = vmul.f32 %v6309_v31, %v745_v26  ;;  %v2472_v26 = vld [vmem:[#allocation2 + $0x28] sm:$0xff] }
 0x13e   : > { %v556_v6 = vmax.f32 %v504_v20, 0.0  ;;  %5515 = vmatmul.msk.bf16.vlgmr.msra.gmra.mxu0 %vm570_vm0, %v6760_v60  ;;  %v6790_v20 = vmul.f32 %v3754_v41, %v6281_v17  ;;  %v9525_v17 = vpack.c.bf16 %v6397_v45, %v6394_v43 }
 0x13f   : > { %v746_v35 = vld [vmem:[#allocation2 + $0xa7] sm:$0xff] }
 0x140   : > { %597 = vst.msk [vmem:[#allocation2 + $0xb0] sm:$0xff] %vm570_vm0, %v556_v6  ;;  %v938_v13 = vmul.f32 %v6283_v18, %v746_v35  ;;  %v6787_v25 = vmul.f32 %v6311_v32, %v746_v35  ;;  %v3755_v34 = vld [vmem:[#allocation2 + $0xa7] sm:$0xff] }
 0x141   : > { %9521 = vst [vmem:[#allocation93_spill] sm:$0xff] %v6790_v20  ;;  %v6793_v37 = vmul.f32 %v3755_v34, %v6283_v18  ;;  %v4791_v55 = vld [vmem:[#allocation2 + $0xa1] sm:$0xff] }
 0x142   : > { %v961_v6 = vpack.c.bf16 %v938_v13, %v937_v3  ;;  %v6802_v35 = vmul.f32 %v4791_v55, %v6795_v1  ;;  %v1942_v3 = vld [vmem:[#allocation2 + $0xa1] sm:$0xff]  ;;  %v6810_v13 = vpop.permute.xlu1 %2045 }
 0x143   : > { %9522 = vst [vmem:[#allocation94_spill] sm:$0xff] %v6793_v37  ;;  %v505_v46 = vpop.f32.mrf.mxu0  ;;  %v6814_v20 = vmul.f32 %v6795_v1, %v1942_v3  ;;  %v2471_v37 = vld [vmem:[#allocation2 + $0x20] sm:$0xff] }
 0x144   : > { %9524 = vst [vmem:[#allocation96_spill] sm:$0xff] %v6802_v35  ;;  %v506_v41 = vadd.f32 %v6297_v23, %v505_v46  ;;  %5359 = vmatmul.msk.bf16.gmra.mxu2 %vm570_vm0, %v961_v6  ;;  %v6831_v18 = vpack.c.bf16 %v2472_v26, %v2471_v37 }
 0x145   : > { %9526 = vst [vmem:[#allocation97_spill] sm:$0xff] %v6810_v13 }
 0x146   : > { %v557_v34 = vmax.f32 %v506_v41, 0.0  ;;  %5433 = vmatmul.msk.bf16.gmra.mxu1 %vm570_vm0, %v9525_v17  ;;  %9527 = vst [vmem:[#allocation98_spill] sm:$0xff] %v6814_v20  ;;  %v6822_v17 = vmul.f32 %v4791_v55, %v6737_v33 }
 0x147   : > { %v1943_v8 = vld [vmem:[#allocation2 + $0xa9] sm:$0xff] }
 0x148   : > { %598 = vst.msk [vmem:[#allocation2 + $0xb8] sm:$0xff] %vm570_vm0, %v557_v34  ;;  %v6817_v46 = vmul.f32 %v6810_v13, %v1943_v8  ;;  %v4792_v6 = vld [vmem:[#allocation2 + $0xa9] sm:$0xff] }
 0x149   : > { %9529 = vst [vmem:[#allocation100_spill] sm:$0xff] %v6822_v17  ;;  %v6825_v45 = vmul.f32 %v4792_v6, %v6751_v63  ;;  %v6828_v34 = vmul.f32 %v4792_v6, %v6810_v13  ;;  %v747_v8 = vld [vmem:[#allocation2 + $0xaf] sm:$0xff] }
 0x14a   : > { %9528 = vst [vmem:[#allocation99_spill] sm:$0xff] %v6817_v46  ;;  %v3756_v6 = vld [vmem:[#allocation2 + $0xaf] sm:$0xff]  ;;  %v939_v37 = vmul.f32 %v6309_v31, %v747_v8 }
 0x14b   : > { %v508_v41 = vpop.f32.mrf.mxu0  ;;  %9530 = vst [vmem:[#allocation101_spill] sm:$0xff] %v6825_v45  ;;  %v6855_v35 = vmul.f32 %v3756_v6, %v6309_v31 }
 0x14c   : > { %9531 = vst [vmem:[#allocation102_spill] sm:$0xff] %v6828_v34  ;;  %v509_v3 = vadd.f32 %v6297_v23, %v508_v41  ;;  %v6846_v41 = vmul.f32 %v6338_v50, %v747_v8  ;;  %v6860_v34 = vpop.permute.xlu2 %2050  ;;  %v6877_v8 = vpop.permute.xlu0 %2055 }
 0x14d   : > { %9532 = vst [vmem:[#allocation103_spill] sm:$0xff] %v6855_v35  ;;  %v2474_v35 = vld [vmem:[#allocation2 + $0x38] sm:$0xff] }
 0x14e   : > { %v558_v54 = vmax.f32 %v509_v3, 0.0  ;;  %5516 = vmatmul.msk.bf16.gmra.mxu0 %vm570_vm0, %v6831_v18  ;;  %v5903_v3 = vld [vmem:[%s9251_s3 + $0x50] sm:$0xff]  ;;  %9534 = vst [vmem:[#allocation105_spill] sm:$0xff] %v6860_v34 }
 0x14f   : > { %v748_v20 = vld [vmem:[#allocation2 + $0xb7] sm:$0xff]  ;;  %1190 = vmatpush.bf16.msrb.mxu2 %v5903_v3  ;;  %9537 = vst [vmem:[#allocation107_spill] sm:$0xff] %v6877_v8 }
 0x150   : > { %599 = vst.msk [vmem:[#allocation2 + $0xc0] sm:$0xff] %vm570_vm0, %v558_v54  ;;  %v940_v26 = vmul.f32 %v6311_v32, %v748_v20  ;;  %v6849_v43 = vmul.f32 %v6340_v51, %v748_v20  ;;  %v3757_v55 = vld [vmem:[#allocation2 + $0xb7] sm:$0xff] }
 0x151   : > { %v6858_v49 = vmul.f32 %v3757_v55, %v6311_v32  ;;  %v4793_v54 = vld [vmem:[#allocation2 + $0xb1] sm:$0xff] }
 0x152   : > { %v962_v17 = vpack.c.bf16 %v940_v26, %v939_v37  ;;  %v6869_v6 = vmul.f32 %v4793_v54, %v6860_v34  ;;  %v9536_v37 = vpack.c.bf16 %v6463_v56, %v6460_v16  ;;  %v1944_v26 = vld [vmem:[#allocation2 + $0xb1] sm:$0xff]  ;;  %v6890_v16 = vmul.f32 %v4793_v54, %v6795_v1 }
 0x153   : > { %9533 = vst [vmem:[#allocation104_spill] sm:$0xff] %v6858_v49  ;;  %v6864_v20 = vpop.f32.mrf.mxu1  ;;  %v510_v45 = vpop.f32.mrf.mxu0  ;;  %v5908_v3 = vld [vmem:[%s9251_s3 + $0xd8] sm:$0xff]  ;;  %v2473_v49 = vld [vmem:[#allocation2 + $0x30] sm:$0xff] }
 0x154   : > { %9535 = vst [vmem:[#allocation106_spill] sm:$0xff] %v6869_v6  ;;  %v511_v55 = vadd.f32 %v6297_v23, %v510_v45  ;;  %5360 = vmatmul.msk.bf16.gmra.mxu2 %vm570_vm0, %v962_v17  ;;  %v6884_v45 = vmul.f32 %v6860_v34, %v1944_v26  ;;  %1391 = vmatpush.bf16.msrb.mxu3 %v5908_v3 }
 0x155   : > { %9540 = vst [vmem:[#allocation110_spill] sm:$0xff] %v6890_v16  ;;  %v6903_v47 = vpack.c.bf16 %v2474_v35, %v2473_v49  ;;  %v2476_v16 = vld [vmem:[#allocation2 + $0x48] sm:$0xff] }
 0x156   : > { %v559_v31 = vmax.f32 %v511_v55, 0.0  ;;  %5434 = vmatmul.msk.bf16.gmra.mxu1 %vm570_vm0, %v9536_v37  ;;  %9538 = vst [vmem:[#allocation108_spill] sm:$0xff] %v6884_v45 }
 0x157   : > { %v1945_v46 = vld [vmem:[#allocation2 + $0xb9] sm:$0xff] }
 0x158   : > { %600 = vst.msk [vmem:[#allocation2 + $0xc8] sm:$0xff] %vm570_vm0, %v559_v31  ;;  %v6887_v17 = vmul.f32 %v6877_v8, %v1945_v46  ;;  %v4794_v56 = vld [vmem:[#allocation2 + $0xb9] sm:$0xff] }
 0x159   : > { %v6893_v55 = vmul.f32 %v4794_v56, %v6810_v13  ;;  %v6900_v26 = vmul.f32 %v4794_v56, %v6877_v8  ;;  %v749_v3 = vld [vmem:[#allocation2 + $0xbf] sm:$0xff] }
 0x15a   : > { %9539 = vst [vmem:[#allocation109_spill] sm:$0xff] %v6887_v17  ;;  %v3758_v5 = vld [vmem:[#allocation2 + $0xbf] sm:$0xff]  ;;  %v941_v56 = vmul.f32 %v6338_v50, %v749_v3  ;;  %v6915_v49 = vmul.f32 %v6237_v62, %v749_v3 }
 0x15b   : > { %9541 = vst [vmem:[#allocation111_spill] sm:$0xff] %v6893_v55  ;;  %v6895_v31 = vpop.f32.mrf.mxu1  ;;  %v513_v37 = vpop.f32.mrf.mxu0 }
 0x15c   : > { %9542 = vst [vmem:[#allocation112_spill] sm:$0xff] %v6900_v26  ;;  %v514_v46 = vadd.f32 %v6297_v23, %v513_v37  ;;  %v6926_v26 = vpop.permute.xlu1 %2060 }
 0x15d   : > { %9545 = vst [vmem:[#allocation115_spill] sm:$0xff] %v6926_v26 }
 0x15e   : > { %v560_v53 = vmax.f32 %v514_v46, 0.0  ;;  %5517 = vmatmul.msk.bf16.gmra.mxu0 %vm570_vm0, %v6903_v47  ;;  %v6921_v46 = vmul.f32 %v3758_v5, %v6338_v50 }
 0x15f   : > { %v750_v32 = vld [vmem:[#allocation2 + $0xc7] sm:$0xff] }
 0x160   : > { %601 = vst.msk [vmem:[#allocation2 + $0xd0] sm:$0xff] %vm570_vm0, %v560_v53  ;;  %v942_v35 = vmul.f32 %v6340_v51, %v750_v32  ;;  %v6918_v37 = vmul.f32 %v6246_v2, %v750_v32  ;;  %v3759_v54 = vld [vmem:[#allocation2 + $0xc7] sm:$0xff] }
 0x161   : > { %9543 = vst [vmem:[#allocation113_spill] sm:$0xff] %v6921_v46  ;;  %v6924_v36 = vmul.f32 %v3759_v54, %v6340_v51  ;;  %v4795_v6 = vld [vmem:[#allocation2 + $0xc1] sm:$0xff] }
 0x162   : > { %v963_v53 = vpack.c.bf16 %v942_v35, %v941_v56  ;;  %v6935_v45 = vmul.f32 %v4795_v6, %v6926_v26  ;;  %v9547_v56 = vpack.c.bf16 %v6503_v42, %v6500_v38  ;;  %v6944_v35 = vpop.permute.xlu2 %2065  ;;  %v6947_v32 = vmul.f32 %v4795_v6, %v6860_v34  ;;  %v2475_v42 = vld [vmem:[#allocation2 + $0x40] sm:$0xff] }
 0x163   : > { %9544 = vst [vmem:[#allocation114_spill] sm:$0xff] %v6924_v36  ;;  %v6930_v55 = vpop.f32.mrf.mxu1  ;;  %v515_v3 = vpop.f32.mrf.mxu0 }
 0x164   : > { %9546 = vst [vmem:[#allocation116_spill] sm:$0xff] %v6935_v45  ;;  %v516_v5 = vadd.f32 %v6297_v23, %v515_v3  ;;  %5361 = vmatmul.msk.bf16.gmra.mxu2 %vm570_vm0, %v963_v53 }
 0x165   : > { %9548 = vst [vmem:[#allocation117_spill] sm:$0xff] %v6944_v35 }
 0x166   : > { %v561_v54 = vmax.f32 %v516_v5, 0.0  ;;  %5435 = vmatmul.msk.bf16.gmra.mxu1 %vm570_vm0, %v9547_v56  ;;  %9549 = vst [vmem:[#allocation118_spill] sm:$0xff] %v6947_v32  ;;  %v2478_v32 = vld [vmem:[#allocation2 + $0x58] sm:$0xff] }
 0x167   : > { %v4796_v50 = vld [vmem:[#allocation2 + $0xc9] sm:$0xff] }
 0x168   : > { %602 = vst.msk [vmem:[#allocation2 + $0xd8] sm:$0xff] %vm570_vm0, %v561_v54  ;;  %v6950_v46 = vmul.f32 %v4796_v50, %v6877_v8  ;;  %v6953_v53 = vmul.f32 %v4796_v50, %v6944_v35  ;;  %v6958_v54 = vpack.c.bf16 %v2476_v16, %v2475_v42  ;;  %v751_v36 = vld [vmem:[#allocation2 + $0xcf] sm:$0xff] }
 0x169   : > { %v3760_v50 = vld [vmem:[#allocation2 + $0xcf] sm:$0xff]  ;;  %v943_v52 = vmul.f32 %v6237_v62, %v751_v36  ;;  %v6970_v16 = vmul.f32 %v6228_v58, %v751_v36  ;;  %v7001_v36 = vpop.permute.xlu0 %2070 }
 0x16a   : > { %9550 = vst [vmem:[#allocation119_spill] sm:$0xff] %v6950_v46 }
 0x16b   : > { %9551 = vst [vmem:[#allocation120_spill] sm:$0xff] %v6953_v53  ;;  %v6955_v3 = vpop.f32.mrf.mxu1  ;;  %v518_v38 = vpop.f32.mrf.mxu0 }
 0x16c   : > { %v519_v5 = vadd.f32 %v6297_v23, %v518_v38  ;;  %9555 = vst [vmem:[#allocation123_spill] sm:$0xff] %v7001_v36 }
 0x16e   : > { %v562_v51 = vmax.f32 %v519_v5, 0.0  ;;  %5518 = vmatmul.msk.bf16.gmra.mxu0 %vm570_vm0, %v6958_v54  ;;  %v6976_v5 = vmul.f32 %v3760_v50, %v6237_v62 }
 0x16f   : > { %v752_v17 = vld [vmem:[#allocation2 + $0xd7] sm:$0xff] }
 0x170   : > { %603 = vst.msk [vmem:[#allocation2 + $0xe0] sm:$0xff] %vm570_vm0, %v562_v51  ;;  %v944_v23 = vmul.f32 %v6246_v2, %v752_v17  ;;  %v6973_v38 = vmul.f32 %v6270_v12, %v752_v17  ;;  %v3761_v42 = vld [vmem:[#allocation2 + $0xd7] sm:$0xff]  ;;  %v6990_v17 = vld [vmem:[%s9250_s2] ss:$0 sm:$0xff]  ;;  %v7003_v51 = vpop.permute.xlu1 %2075 }
 0x171   : > { %9552 = vst [vmem:[#allocation121_spill] sm:$0xff] %v6976_v5  ;;  %v6979_v6 = vmul.f32 %v3761_v42, %v6246_v2  ;;  %v4797_v42 = vld [vmem:[#allocation2 + $0xd1] sm:$0xff] }
 0x172   : > { %v964_v56 = vpack.c.bf16 %v944_v23, %v943_v52  ;;  %v9554_v23 = vpack.c.bf16 %v6561_v0, %v6558_v57  ;;  %9556 = vst [vmem:[#allocation124_spill] sm:$0xff] %v7003_v51  ;;  %v2477_v57 = vld [vmem:[#allocation2 + $0x50] sm:$0xff] }
 0x173   : > { %9553 = vst [vmem:[#allocation122_spill] sm:$0xff] %v6979_v6  ;;  %v6983_v45 = vpop.f32.mrf.mxu1  ;;  %v520_v53 = vpop.f32.mrf.mxu0  ;;  %v7014_v5 = vpack.c.bf16 %v2478_v32, %v2477_v57  ;;  %v5907_v32 = vld [vmem:[%s9251_s3 + $0xd0] sm:$0xff] }
 0x174   : > { %v521_v50 = vadd.f32 %v6990_v17, %v520_v53  ;;  %5362 = vmatmul.msk.bf16.vlgmr.msra.gmra.mxu3 %vm570_vm0, %v964_v56  ;;  %5375 = vmatmul.msk.bf16.vlgmr.msrb.gmra.mxu2 %vm570_vm0, %v6831_v18  ;;  %v7006_v56 = vmul.f32 %v4797_v42, %v7001_v36 }
 0x175   : > { %1392 = vmatpush.bf16.msrb.mxu3 %v5907_v32  ;;  %v7053_v32 = vpop.permute.xlu2 %2080 }
 0x176   : > { %v563_v52 = vmax.f32 %v521_v50, 0.0  ;;  %5436 = vmatmul.msk.bf16.gmra.mxu1 %vm570_vm0, %v9554_v23  ;;  %9557 = vst [vmem:[#allocation125_spill] sm:$0xff] %v7006_v56 }
 0x177   : > { %v4798_v53 = vld [vmem:[#allocation2 + $0xd9] sm:$0xff]  ;;  %9562 = vst [vmem:[#allocation129_spill] sm:$0xff] %v7053_v32 }
 0x178   : > { %604 = vst.msk [vmem:[#allocation2 + $0xe8] sm:$0xff] %vm570_vm0, %v563_v52  ;;  %v7009_v46 = vmul.f32 %v4798_v53, %v7003_v51  ;;  %v753_v6 = vld [vmem:[#allocation2 + $0xdf] sm:$0xff] }
 0x179   : > { %v3762_v42 = vld [vmem:[#allocation2 + $0xdf] sm:$0xff]  ;;  %v945_v53 = vmul.f32 %v6228_v58, %v753_v6 }
 0x17a   : > { %9558 = vst [vmem:[#allocation126_spill] sm:$0xff] %v7009_v46  ;;  %v7033_v52 = vmul.f32 %v3762_v42, %v6228_v58 }
 0x17b   : > { %v7011_v50 = vpop.f32.mrf.mxu1  ;;  %v523_v0 = vpop.f32.mrf.mxu0 }
 0x17c   : > { %v524_v23 = vadd.f32 %v6990_v17, %v523_v0  ;;  %v7027_v0 = vmul.f32 %v6250_v4, %v753_v6  ;;  %9559 = vst [vmem:[#allocation127_spill] sm:$0xff] %v7033_v52  ;;  %v2480_v6 = vld [vmem:[#allocation2 + $0x68] sm:$0xff] }
 0x17e   : > { %v564_v62 = vmax.f32 %v524_v23, 0.0  ;;  %5519 = vmatmul.msk.bf16.gmra.mxu0 %vm570_vm0, %v7014_v5 }
 0x17f   : > { %v754_v2 = vld [vmem:[#allocation2 + $0xe7] sm:$0xff] }
 0x180   : > { %605 = vst.msk [vmem:[#allocation2 + $0xf0] sm:$0xff] %vm570_vm0, %v564_v62  ;;  %v946_v36 = vmul.f32 %v6270_v12, %v754_v2  ;;  %v7030_v57 = vmul.f32 %v6290_v21, %v754_v2  ;;  %v3763_v23 = vld [vmem:[#allocation2 + $0xe7] sm:$0xff] }
 0x181   : > { %v7036_v62 = vmul.f32 %v3763_v23, %v6270_v12  ;;  %v7055_v23 = vpop.permute.xlu0 %2085 }
 0x182   : > { %v965_v56 = vpack.c.bf16 %v946_v36, %v945_v53  ;;  %v9561_v36 = vpack.c.bf16 %v6613_v22, %v6610_v29  ;;  %v4799_v53 = vld [vmem:[#allocation2 + $0xe1] sm:$0xff]  ;;  %9563 = vst [vmem:[#allocation130_spill] sm:$0xff] %v7055_v23 }
 0x183   : > { %9560 = vst [vmem:[#allocation128_spill] sm:$0xff] %v7036_v62  ;;  %v7040_v51 = vpop.f32.mrf.mxu1  ;;  %v525_v26 = vpop.f32.mrf.mxu0  ;;  %v2479_v22 = vld [vmem:[#allocation2 + $0x60] sm:$0xff] }
 0x184   : > { %v526_v2 = vadd.f32 %v6990_v17, %v525_v26  ;;  %5363 = vmatmul.msk.bf16.gmra.mxu3 %vm570_vm0, %v965_v56  ;;  %5376 = vmatmul.msk.bf16.gmra.mxu2 %vm570_vm0, %v6903_v47  ;;  %v7058_v56 = vmul.f32 %v4799_v53, %v7053_v32  ;;  %v7066_v52 = vpack.c.bf16 %v2480_v6, %v2479_v22 }
 0x186   : > { %v565_v42 = vmax.f32 %v526_v2, 0.0  ;;  %5437 = vmatmul.msk.bf16.gmra.mxu1 %vm570_vm0, %v9561_v36  ;;  %9564 = vst [vmem:[#allocation131_spill] sm:$0xff] %v7058_v56 }
 0x187   : > { %v4800_v26 = vld [vmem:[#allocation2 + $0xe9] sm:$0xff] }
 0x188   : > { %606 = vst.msk [vmem:[#allocation2 + $0xf8] sm:$0xff] %vm570_vm0, %v565_v42  ;;  %v7061_v46 = vmul.f32 %v4800_v26, %v7055_v23  ;;  %v755_v62 = vld [vmem:[#allocation2 + $0xef] sm:$0xff] }
 0x189   : > { %v3764_v53 = vld [vmem:[#allocation2 + $0xef] sm:$0xff]  ;;  %v947_v26 = vmul.f32 %v6250_v4, %v755_v62 }
 0x18a   : > { %9565 = vst [vmem:[#allocation132_spill] sm:$0xff] %v7061_v46 }
 0x18b   : > { %v7063_v2 = vpop.f32.mrf.mxu1  ;;  %v528_v29 = vpop.f32.mrf.mxu0 }
 0x18c   : > { %v529_v36 = vadd.f32 %v6990_v17, %v528_v29  ;;  %v7076_v29 = vmul.f32 %v6275_v14, %v755_v62  ;;  %v2482_v62 = vld [vmem:[#allocation2 + $0x78] sm:$0xff] }
 0x18e   : > { %v566_v58 = vmax.f32 %v529_v36, 0.0  ;;  %5520 = vmatmul.msk.bf16.gmra.mxu0 %vm570_vm0, %v7066_v52  ;;  %v7082_v36 = vmul.f32 %v3764_v53, %v6250_v4 }
 0x18f   : > { %v756_v12 = vld [vmem:[#allocation2 + $0xf7] sm:$0xff] }
 0x190   : > { %607 = vst.msk [vmem:[#allocation2 + $0x100] sm:$0xff] %vm570_vm0, %v566_v58  ;;  %v948_v32 = vmul.f32 %v6290_v21, %v756_v12  ;;  %v7079_v6 = vmul.f32 %v6323_v39, %v756_v12  ;;  %v3765_v22 = vld [vmem:[#allocation2 + $0xf7] sm:$0xff]  ;;  %v7104_v58 = vpop.permute.xlu1 %2090 }
 0x191   : > { %9566 = vst [vmem:[#allocation133_spill] sm:$0xff] %v7082_v36  ;;  %v7085_v42 = vmul.f32 %v3765_v22, %v6290_v21  ;;  %v7102_v22 = vpop.permute.xlu2 %2095 }
 0x192   : > { %v966_v56 = vpack.c.bf16 %v948_v32, %v947_v26  ;;  %v9568_v32 = vpack.c.bf16 %v6673_v59, %v6670_v15  ;;  %v4801_v26 = vld [vmem:[#allocation2 + $0xf1] sm:$0xff]  ;;  %9569 = vst [vmem:[#allocation135_spill] sm:$0xff] %v7102_v22 }
 0x193   : > { %9567 = vst [vmem:[#allocation134_spill] sm:$0xff] %v7085_v42  ;;  %v7089_v46 = vpop.f32.mrf.mxu1  ;;  %v530_v23 = vpop.f32.mrf.mxu0  ;;  %v2481_v59 = vld [vmem:[#allocation2 + $0x70] sm:$0xff] }
 0x194   : > { %v531_v12 = vadd.f32 %v6990_v17, %v530_v23  ;;  %5364 = vmatmul.msk.bf16.gmra.mxu3 %vm570_vm0, %v966_v56  ;;  %5377 = vmatmul.msk.bf16.gmra.mxu2 %vm570_vm0, %v6958_v54  ;;  %9570 = vst [vmem:[#allocation136_spill] sm:$0xff] %v7104_v58  ;;  %v7107_v56 = vmul.f32 %v4801_v26, %v7104_v58 }
 0x195   : > { %v7115_v42 = vpack.c.bf16 %v2482_v62, %v2481_v59 }
 0x196   : > { %v567_v53 = vmax.f32 %v531_v12, 0.0  ;;  %5438 = vmatmul.msk.bf16.gmra.mxu1 %vm570_vm0, %v9568_v32  ;;  %9571 = vst [vmem:[#allocation137_spill] sm:$0xff] %v7107_v56 }
 0x197   : > { %v4802_v23 = vld [vmem:[#allocation2 + $0xf9] sm:$0xff] }
 0x198   : > { %608 = vst.msk [vmem:[#allocation2 + $0x108] sm:$0xff] %vm570_vm0, %v567_v53  ;;  %v7110_v36 = vmul.f32 %v4802_v23, %v7102_v22  ;;  %v757_v4 = vld [vmem:[#allocation2 + $0xff] sm:$0xff] }
 0x199   : > { %v3766_v58 = vld [vmem:[#allocation2 + $0xff] sm:$0xff]  ;;  %v949_v23 = vmul.f32 %v6275_v14, %v757_v4 }
 0x19a   : > { %9572 = vst [vmem:[#allocation138_spill] sm:$0xff] %v7110_v36  ;;  %v7133_v56 = vmul.f32 %v3766_v58, %v6275_v14  ;;  %v9575_v58 = vpack.c.bf16 %v6729_v9, %v6726_v27  ;;  %v7161_v9 = vpop.permute.xlu1 %2105  ;;  %v2484_v27 = vld [vmem:[#allocation2 + $0x88] sm:$0xff] }
 0x19b   : > { %v7112_v12 = vpop.f32.mrf.mxu1  ;;  %v533_v15 = vpop.f32.mrf.mxu0  ;;  %9578 = vst [vmem:[#allocation143_spill] sm:$0xff] %v7161_v9 }
 0x19c   : > { %v534_v32 = vadd.f32 %v6990_v17, %v533_v15  ;;  %v7125_v15 = vmul.f32 %v6299_v24, %v757_v4  ;;  %9573 = vst [vmem:[#allocation139_spill] sm:$0xff] %v7133_v56 }
 0x19e   : > { %v568_v21 = vmax.f32 %v534_v32, 0.0  ;;  %5521 = vmatmul.msk.bf16.gmra.mxu0 %vm570_vm0, %v7115_v42 }
 0x19f   : > { %v758_v26 = vld [vmem:[#allocation2 + $0x107] sm:$0xff] }
 0x1a0   : > { %609 = vst.msk [vmem:[#allocation2 + $0x110] sm:$0xff] %vm570_vm0, %v568_v21  ;;  %v950_v22 = vmul.f32 %v6323_v39, %v758_v26  ;;  %v7128_v62 = vmul.f32 %v6356_v61, %v758_v26  ;;  %v3767_v59 = vld [vmem:[#allocation2 + $0x107] sm:$0xff] }
 0x1a1   : > { %v7136_v21 = vmul.f32 %v3767_v59, %v6323_v39  ;;  %v7158_v59 = vpop.permute.xlu0 %2100 }
 0x1a2   : > { %v967_v53 = vpack.c.bf16 %v950_v22, %v949_v23  ;;  %v5914_v23 = vld [vmem:[%s9251_s3 + $0x48] sm:$0xff]  ;;  %9577 = vst [vmem:[#allocation142_spill] sm:$0xff] %v7158_v59 }
 0x1a3   : > { %9574 = vst [vmem:[#allocation140_spill] sm:$0xff] %v7136_v21  ;;  %v7138_v36 = vpop.f32.mrf.mxu1  ;;  %v535_v35 = vpop.f32.mrf.mxu0  ;;  %2237 = vmatpush.bf16.msra.mxu2 %v5914_v23  ;;  %v2483_v21 = vld [vmem:[#allocation2 + $0x80] sm:$0xff] }
 0x1a4   : > { %v536_v4 = vadd.f32 %v6990_v17, %v535_v35  ;;  %5365 = vmatmul.msk.bf16.gmra.mxu3 %vm570_vm0, %v967_v53  ;;  %5378 = vmatmul.msk.bf16.gmra.mxu2 %vm570_vm0, %v7014_v5  ;;  %v5912_v35 = vld [vmem:[%s9251_s3 + $0x68] sm:$0xff]  ;;  %v7173_v14 = vpack.c.bf16 %v2484_v27, %v2483_v21 }
 0x1a5   : > { %v4803_v53 = vld [vmem:[#allocation2 + $0x101] sm:$0xff]  ;;  %2386 = vmatpush.bf16.msra.mxu3 %v5912_v35 }
 0x1a6   : > { %v569_v26 = vmax.f32 %v536_v4, 0.0  ;;  %5439 = vmatmul.msk.bf16.gmra.mxu1 %vm570_vm0, %v9575_v58  ;;  %v7164_v58 = vmul.f32 %v4803_v53, %v7158_v59  ;;  %v5918_v35 = vld [vmem:[%s9251_s3 + $0xc8] sm:$0xff] }
 0x1a7   : > { %v7156_v17 = vpop.f32.mrf.mxu2  ;;  %v4804_v4 = vld [vmem:[#allocation2 + $0x109] sm:$0xff]  ;;  %2854 = vmatpush.bf16.msra.mxu1 %v5918_v35 }
 0x1a8   : > { %9576 = vst [vmem:[#allocation141_spill] sm:$0xff] %v7156_v17  ;;  %v7167_v22 = vmul.f32 %v4804_v4, %v7161_v9  ;;  %v759_v23 = vld [vmem:[#allocation2 + $0x10f] sm:$0xff]  ;;  %v7192_v9 = vpop.permute.xlu2 %2110 }
 0x1a9   : > { %610 = vst.msk [vmem:[#allocation2 + $0x118] sm:$0xff] %vm570_vm0, %v569_v26  ;;  %v3768_v53 = vld [vmem:[#allocation2 + $0x10f] sm:$0xff]  ;;  %v951_v59 = vmul.f32 %v6299_v24, %v759_v23  ;;  %v7194_v34 = vpop.permute.xlu0 %2115 }
 0x1aa   : > { %9579 = vst [vmem:[#allocation144_spill] sm:$0xff] %v7164_v58  ;;  %v7187_v26 = vmul.f32 %v3768_v53, %v6299_v24 }
 0x1ab   : > { %9580 = vst [vmem:[#allocation145_spill] sm:$0xff] %v7167_v22  ;;  %v7169_v32 = vpop.f32.mrf.mxu1  ;;  %v7171_v56 = vpop.f32.mrf.mxu0 }
 0x1ac   : > { %9582 = vst [vmem:[#allocation147_spill] sm:$0xff] %v7187_v26 }
 0x1ad   : > { %9584 = vst [vmem:[#allocation149_spill] sm:$0xff] %v7192_v9 }
 0x1ae   : > { %5522 = vmatmul.msk.bf16.gmra.mxu0 %vm570_vm0, %v7173_v14  ;;  %9585 = vst [vmem:[#allocation150_spill] sm:$0xff] %v7194_v34 }
 0x1af   : > { %v7182_v4 = vpop.f32.mrf.mxu2 }
 0x1b0   : > { %9581 = vst [vmem:[#allocation146_spill] sm:$0xff] %v7182_v4  ;;  %v760_v39 = vld [vmem:[#allocation2 + $0x117] sm:$0xff] }
 0x1b1   : > { %v952_v21 = vmul.f32 %v6356_v61, %v760_v39  ;;  %v3769_v27 = vld [vmem:[#allocation2 + $0x117] sm:$0xff] }
 0x1b2   : > { %v7190_v58 = vmul.f32 %v3769_v27, %v6356_v61  ;;  %v4805_v22 = vld [vmem:[#allocation2 + $0x111] sm:$0xff]  ;;  %v4806_v4 = vld [vmem:[#allocation2 + $0x119] sm:$0xff] }
 0x1b3   : > { %v968_v8 = vpack.c.bf16 %v952_v21, %v951_v59  ;;  %v7196_v17 = vpop.f32.mrf.mxu1  ;;  %v7198_v23 = vpop.f32.mrf.mxu0  ;;  %v7206_v35 = vmul.f32 %v4805_v22, %v7192_v9  ;;  %v7209_v53 = vmul.f32 %v4806_v4, %v7194_v34  ;;  %v9588_v59 = vpack.c.bf16 %v6787_v25, %v6784_v7  ;;  %v2485_v22 = vld [vmem:[#allocation2 + $0x90] sm:$0xff]  ;;  %v2491_v9 = vld [vmem:[#allocation2 + $0xc0] sm:$0xff] }
 0x1b4   : > { %9583 = vst [vmem:[#allocation148_spill] sm:$0xff] %v7190_v58  ;;  %5379 = vmatmul.msk.bf16.gmra.mxu2 %vm570_vm0, %v7066_v52 }
 0x1b5   : > { %5366 = vmatmul.msk.bf16.gmra.mxu3 %vm570_vm0, %v968_v8  ;;  %9586 = vst [vmem:[#allocation151_spill] sm:$0xff] %v7206_v35  ;;  %v2486_v8 = vld [vmem:[#allocation2 + $0x98] sm:$0xff] }
 0x1b6   : > { %9587 = vst [vmem:[#allocation152_spill] sm:$0xff] %v7209_v53  ;;  %5440 = vmatmul.msk.bf16.gmra.mxu1 %vm570_vm0, %v9588_v59  ;;  %v7223_v58 = vpack.c.bf16 %v2486_v8, %v2485_v22  ;;  %v9593_v59 = vpack.c.bf16 %v6849_v43, %v6846_v41  ;;  %v2488_v22 = vld [vmem:[#allocation2 + $0xa8] sm:$0xff]  ;;  %v2487_v53 = vld [vmem:[#allocation2 + $0xa0] sm:$0xff]  ;;  %v9598_v41 = vpack.c.bf16 %v6918_v37, %v6915_v49 }
 0x1b7   : > { %v7217_v27 = vpop.f32.mrf.mxu2  ;;  %v7247_v61 = vpack.c.bf16 %v2488_v22, %v2487_v53  ;;  %v9603_v37 = vpack.c.bf16 %v6973_v38, %v6970_v16  ;;  %v9608_v38 = vpack.c.bf16 %v7030_v57, %v7027_v0  ;;  %v5917_v57 = vld [vmem:[%s9251_s3 + $0xc0] sm:$0xff] }
 0x1b8   : > { %9589 = vst [vmem:[#allocation153_spill] sm:$0xff] %v7217_v27  ;;  %2855 = vmatpush.bf16.msra.mxu1 %v5917_v57  ;;  %v2495_v57 = vld [vmem:[#allocation2 + $0xe0] sm:$0xff]  ;;  %v2497_v27 = vld [vmem:[#allocation2 + $0xf0] sm:$0xff] }
 0x1bb   : > { %v7219_v39 = vpop.f32.mrf.mxu1  ;;  %v7221_v26 = vpop.f32.mrf.mxu0 }
 0x1bc   : > { %9590 = vst [vmem:[#allocation154_spill] sm:$0xff] %v7221_v26 }
 0x1be   : > { %5523 = vmatmul.msk.bf16.gmra.mxu0 %vm570_vm0, %v7223_v58 }
 0x1bf   : > { %v7227_v4 = vpop.f32.mrf.mxu2 }
 0x1c0   : > { %9591 = vst [vmem:[#allocation155_spill] sm:$0xff] %v7227_v4 }
 0x1c3   : > { %v7229_v25 = vpop.f32.mrf.mxu1  ;;  %v7231_v7 = vpop.f32.mrf.mxu0 }
 0x1c4   : > { %9592 = vst [vmem:[#allocation156_spill] sm:$0xff] %v7231_v7  ;;  %5380 = vmatmul.msk.bf16.gmra.mxu2 %vm570_vm0, %v7115_v42  ;;  %v2489_v7 = vld [vmem:[#allocation2 + $0xb0] sm:$0xff] }
 0x1c5   : > { %5403 = vmatmul.msk.bf16.vlgmr.msrb.gmra.mxu3 %vm570_vm0, %v6760_v60 }
 0x1c6   : > { %5441 = vmatmul.msk.bf16.gmra.mxu1 %vm570_vm0, %v9593_v59  ;;  %v2490_v59 = vld [vmem:[#allocation2 + $0xb8] sm:$0xff] }
 0x1c7   : > { %v7241_v8 = vpop.f32.mrf.mxu2 }
 0x1c8   : > { %9594 = vst [vmem:[#allocation157_spill] sm:$0xff] %v7241_v8 }
 0x1cb   : > { %v7243_v21 = vpop.f32.mrf.mxu1  ;;  %v7245_v35 = vpop.f32.mrf.mxu0 }
 0x1cc   : > { %9595 = vst [vmem:[#allocation158_spill] sm:$0xff] %v7245_v35 }
 0x1ce   : > { %5524 = vmatmul.msk.bf16.gmra.mxu0 %vm570_vm0, %v7247_v61 }
 0x1cf   : > { %v7251_v24 = vpop.f32.mrf.mxu2 }
 0x1d0   : > { %9596 = vst [vmem:[#allocation159_spill] sm:$0xff] %v7251_v24 }
 0x1d3   : > { %v7253_v60 = vpop.f32.mrf.mxu1  ;;  %v7255_v43 = vpop.f32.mrf.mxu0 }
 0x1d4   : > { %9597 = vst [vmem:[#allocation160_spill] sm:$0xff] %v7255_v43  ;;  %5381 = vmatmul.msk.bf16.gmra.mxu2 %vm570_vm0, %v7173_v14  ;;  %v7271_v43 = vpack.c.bf16 %v2490_v59, %v2489_v7 }
 0x1d5   : > { %5404 = vmatmul.msk.bf16.gmra.mxu3 %vm570_vm0, %v6831_v18 }
 0x1d6   : > { %5442 = vmatmul.msk.bf16.gmra.mxu1 %vm570_vm0, %v9598_v41  ;;  %v2492_v41 = vld [vmem:[#allocation2 + $0xc8] sm:$0xff] }
 0x1d7   : > { %v7265_v53 = vpop.f32.mrf.mxu2 }
 0x1d8   : > { %9599 = vst [vmem:[#allocation161_spill] sm:$0xff] %v7265_v53 }
 0x1db   : > { %v7267_v22 = vpop.f32.mrf.mxu1  ;;  %v7269_v35 = vpop.f32.mrf.mxu0 }
 0x1dc   : > { %9600 = vst [vmem:[#allocation162_spill] sm:$0xff] %v7269_v35 }
 0x1de   : > { %5525 = vmatmul.msk.bf16.gmra.mxu0 %vm570_vm0, %v7271_v43 }
 0x1df   : > { %v7275_v26 = vpop.f32.mrf.mxu2 }
 0x1e0   : > { %9601 = vst [vmem:[#allocation163_spill] sm:$0xff] %v7275_v26 }
 0x1e3   : > { %v7277_v18 = vpop.f32.mrf.mxu1  ;;  %v7279_v49 = vpop.f32.mrf.mxu0 }
 0x1e4   : > { %9602 = vst [vmem:[#allocation164_spill] sm:$0xff] %v7279_v49  ;;  %5382 = vmatmul.msk.bf16.gmra.mxu2 %vm570_vm0, %v7223_v58  ;;  %v7295_v49 = vpack.c.bf16 %v2492_v41, %v2491_v9  ;;  %v2494_v41 = vld [vmem:[#allocation2 + $0xd8] sm:$0xff] }
 0x1e5   : > { %5405 = vmatmul.msk.bf16.gmra.mxu3 %vm570_vm0, %v6903_v47 }
 0x1e6   : > { %5443 = vmatmul.msk.bf16.gmra.mxu1 %vm570_vm0, %v9603_v37 }
 0x1e7   : > { %v7289_v7 = vpop.f32.mrf.mxu2 }
 0x1e8   : > { %9604 = vst [vmem:[#allocation165_spill] sm:$0xff] %v7289_v7 }
 0x1eb   : > { %v7291_v59 = vpop.f32.mrf.mxu1  ;;  %v7293_v35 = vpop.f32.mrf.mxu0 }
 0x1ec   : > { %9605 = vst [vmem:[#allocation166_spill] sm:$0xff] %v7293_v35 }
 0x1ee   : > { %5526 = vmatmul.msk.bf16.gmra.mxu0 %vm570_vm0, %v7295_v49 }
 0x1ef   : > { %v7299_v34 = vpop.f32.mrf.mxu2 }
 0x1f0   : > { %9606 = vst [vmem:[#allocation167_spill] sm:$0xff] %v7299_v34 }
 0x1f3   : > { %v7301_v26 = vpop.f32.mrf.mxu1  ;;  %v7303_v16 = vpop.f32.mrf.mxu0 }
 0x1f4   : > { %9607 = vst [vmem:[#allocation168_spill] sm:$0xff] %v7303_v16  ;;  %5383 = vmatmul.msk.bf16.gmra.mxu2 %vm570_vm0, %v7247_v61  ;;  %v2493_v16 = vld [vmem:[#allocation2 + $0xd0] sm:$0xff] }
 0x1f5   : > { %5406 = vmatmul.msk.bf16.gmra.mxu3 %vm570_vm0, %v6958_v54  ;;  %v7321_v7 = vpack.c.bf16 %v2494_v41, %v2493_v16  ;;  %v9615_v16 = vpack.c.bf16 %v7079_v6, %v7076_v29 }
 0x1f6   : > { %5444 = vmatmul.msk.bf16.gmra.mxu1 %vm570_vm0, %v9608_v38 }
 0x1f7   : > { %v7313_v9 = vpop.f32.mrf.mxu3  ;;  %v7315_v37 = vpop.f32.mrf.mxu2 }
 0x1f8   : > { %9609 = vst [vmem:[#allocation169_spill] sm:$0xff] %v7313_v9 }
 0x1fb   : > { %v7317_v35 = vpop.f32.mrf.mxu1  ;;  %v7319_v34 = vpop.f32.mrf.mxu0 }
 0x1fc   : > { %9610 = vst [vmem:[#allocation170_spill] sm:$0xff] %v7317_v35 }
 0x1fd   : > { %9611 = vst [vmem:[#allocation171_spill] sm:$0xff] %v7319_v34 }
 0x1fe   : > { %5527 = vmatmul.msk.bf16.gmra.mxu0 %vm570_vm0, %v7321_v7 }
 0x1ff   : > { %v7325_v53 = vpop.f32.mrf.mxu3  ;;  %v7327_v0 = vpop.f32.mrf.mxu2 }
 0x200   : > { %9612 = vst [vmem:[#allocation172_spill] sm:$0xff] %v7325_v53  ;;  %v2496_v53 = vld [vmem:[#allocation2 + $0xe8] sm:$0xff] }
 0x201   : > { %v7352_v8 = vpack.c.bf16 %v2496_v53, %v2495_v57  ;;  %v9622_v53 = vpack.c.bf16 %v7128_v62, %v7125_v15  ;;  %v5923_v15 = vld [vmem:[%s9251_s3 + $0x10] sm:$0xff] }
 0x203   : > { %v7332_v38 = vpop.f32.mrf.mxu1  ;;  %v7334_v9 = vpop.f32.mrf.mxu0 }
 0x204   : > { %9613 = vst [vmem:[#allocation173_spill] sm:$0xff] %v7332_v38  ;;  %5384 = vmatmul.msk.bf16.gmra.mxu2 %vm570_vm0, %v7271_v43 }
 0x205   : > { %9614 = vst [vmem:[#allocation174_spill] sm:$0xff] %v7334_v9  ;;  %5407 = vmatmul.msk.bf16.gmra.mxu3 %vm570_vm0, %v7014_v5 }
 0x206   : > { %5445 = vmatmul.msk.bf16.gmra.mxu1 %vm570_vm0, %v9615_v16 }
 0x207   : > { %v7344_v41 = vpop.f32.mrf.mxu3  ;;  %v7346_v34 = vpop.f32.mrf.mxu2 }
 0x208   : > { %9616 = vst [vmem:[#allocation175_spill] sm:$0xff] %v7344_v41 }
 0x20b   : > { %v7348_v24 = vpop.f32.mrf.mxu1  ;;  %v7350_v9 = vpop.f32.mrf.mxu0 }
 0x20c   : > { %9617 = vst [vmem:[#allocation176_spill] sm:$0xff] %v7348_v24 }
 0x20d   : > { %9618 = vst [vmem:[#allocation177_spill] sm:$0xff] %v7350_v9 }
 0x20e   : > { %5528 = vmatmul.msk.bf16.gmra.mxu0 %vm570_vm0, %v7352_v8 }
 0x20f   : > { %v7356_v4 = vpop.f32.mrf.mxu3  ;;  %v7358_v29 = vpop.f32.mrf.mxu2 }
 0x210   : > { %9619 = vst [vmem:[#allocation178_spill] sm:$0xff] %v7356_v4  ;;  %v5924_v4 = vld [vmem:[%s9251_s3 + $0x18] sm:$0xff] }
 0x211   : > { %3625 = vmatpush.bf16.msrb.mxu0 %v5924_v4 }
 0x213   : > { %v7360_v6 = vpop.f32.mrf.mxu1  ;;  %v7362_v16 = vpop.f32.mrf.mxu0 }
 0x214   : > { %9620 = vst [vmem:[#allocation179_spill] sm:$0xff] %v7360_v6  ;;  %5385 = vmatmul.msk.bf16.gmra.mxu2 %vm570_vm0, %v7295_v49 }
 0x215   : > { %9621 = vst [vmem:[#allocation180_spill] sm:$0xff] %v7362_v16  ;;  %5408 = vmatmul.msk.bf16.gmra.mxu3 %vm570_vm0, %v7066_v52  ;;  %v2498_v16 = vld [vmem:[#allocation2 + $0xf8] sm:$0xff]  ;;  %3626 = vmatpush.bf16.msrb.mxu0 %v5923_v15 }
 0x216   : > { %5446 = vmatmul.msk.bf16.gmra.mxu1 %vm570_vm0, %v9622_v53  ;;  %v7386_v62 = vpack.c.bf16 %v2498_v16, %v2497_v27  ;;  %v2703_v53 = vld [vmem:[#allocation2 + $0x11] sm:$0xff]  ;;  %v5913_v16 = vld [vmem:[%s9251_s3 + $0x40] sm:$0xff] }
 0x217   : > { %v7372_v57 = vpop.f32.mrf.mxu3  ;;  %v7374_v9 = vpop.f32.mrf.mxu2  ;;  %2238 = vmatpush.bf16.msra.mxu2 %v5913_v16  ;;  %v5960_v16 = vld [vmem:[#allocation2 + $0x21] sm:$0xff] }
 0x218   : > { %9623 = vst [vmem:[#allocation181_spill] sm:$0xff] %v7372_v57  ;;  %v2704_v57 = vld [vmem:[#allocation2 + $0x19] sm:$0xff] }
 0x21b   : > { %v7379_v41 = vpop.f32.mrf.mxu1  ;;  %v7381_v6 = vpop.f32.mrf.mxu0 }
 0x21c   : > { %9624 = vst [vmem:[#allocation182_spill] sm:$0xff] %v7379_v41  ;;  %v2735_v41 = vmul.f32 %v2703_v53, %v6330_v44  ;;  %v5911_v44 = vld [vmem:[%s9251_s3 + $0x60] sm:$0xff] }
 0x21d   : > { %9625 = vst [vmem:[#allocation183_spill] sm:$0xff] %v7381_v6  ;;  %v2736_v6 = vmul.f32 %v2704_v57, %v6418_v11  ;;  %2387 = vmatpush.bf16.msra.mxu3 %v5911_v44  ;;  %v2499_v53 = vld [vmem:[#allocation2 + $0x100] sm:$0xff] }
 0x21e   : > { %5529 = vmatmul.msk.bf16.gmra.mxu0 %vm570_vm0, %v7386_v62 }
 0x21f   : > { %v7390_v24 = vpop.f32.mrf.mxu3  ;;  %v7392_v4 = vpop.f32.mrf.mxu2  ;;  %v2767_v27 = vpack.c.bf16 %v2736_v6, %v2735_v41  ;;  %v2500_v6 = vld [vmem:[#allocation2 + $0x108] sm:$0xff] }
 0x220   : > { %9626 = vst [vmem:[#allocation184_spill] sm:$0xff] %v7390_v24 }
 0x223   : > { %v7396_v38 = vpop.f32.mrf.mxu1  ;;  %v7398_v35 = vpop.f32.mrf.mxu0 }
 0x224   : > { %9627 = vst [vmem:[#allocation185_spill] sm:$0xff] %v7396_v38  ;;  %5386 = vmatmul.msk.bf16.gmra.mxu2 %vm570_vm0, %v7321_v7  ;;  %v5961_v38 = vld [vmem:[#allocation2 + $0x29] sm:$0xff] }
 0x225   : > { %9628 = vst [vmem:[#allocation186_spill] sm:$0xff] %v7398_v35  ;;  %5409 = vmatmul.msk.bf16.gmra.mxu3 %vm570_vm0, %v7115_v42  ;;  %v7419_v35 = vpack.c.bf16 %v2500_v6, %v2499_v53  ;;  %v2738_v44 = vmul.f32 %v5961_v38, %v6425_v30 }
 0x226   : > { %5543 = vmatmul.msk.bf16.vlgmr.msra.gmra.mxu1 %vm570_vm0, %v2767_v27 }
 0x227   : > { %v7411_v11 = vpop.f32.mrf.mxu3  ;;  %v7413_v41 = vpop.f32.mrf.mxu2 }
 0x228   : > { %9629 = vst [vmem:[#allocation187_spill] sm:$0xff] %v7411_v11  ;;  %v2737_v11 = vmul.f32 %v5960_v16, %v6416_v10 }
 0x22a   : > { %v2768_v6 = vpack.c.bf16 %v2738_v44, %v2737_v11  ;;  %v9639_v11 = vld [vmem:[#allocation46_spill] sm:$0xff] }
 0x22b   : > { %v7415_v57 = vpop.f32.mrf.mxu1  ;;  %v7417_v15 = vpop.f32.mrf.mxu0 }
 0x22c   : > { %9630 = vst [vmem:[#allocation188_spill] sm:$0xff] %v7415_v57 }
 0x22d   : > { %9631 = vst [vmem:[#allocation189_spill] sm:$0xff] %v7417_v15 }
 0x22e   : > { %5530 = vmatmul.msk.bf16.gmra.mxu0 %vm570_vm0, %v7419_v35 }
 0x22f   : > { %v7423_v24 = vpop.f32.mrf.mxu3  ;;  %v7425_v27 = vpop.f32.mrf.mxu2 }
 0x230   : > { %9632 = vst [vmem:[#allocation190_spill] sm:$0xff] %v7423_v24  ;;  %v9640_v24 = vld [vmem:[#allocation42_spill] sm:$0xff] }
 0x233   : > { %v7429_v1 = vpop.f32.mrf.mxu1  ;;  %v7431_v57 = vpop.f32.mrf.mxu0 }
 0x234   : > { %9633 = vst [vmem:[#allocation191_spill] sm:$0xff] %v7429_v1  ;;  %5387 = vmatmul.msk.bf16.gmra.mxu2 %vm570_vm0, %v7352_v8 }
 0x235   : > { %9634 = vst [vmem:[#allocation192_spill] sm:$0xff] %v7431_v57  ;;  %5410 = vmatmul.msk.bf16.gmra.mxu3 %vm570_vm0, %v7173_v14  ;;  %v5962_v57 = vld [vmem:[#allocation2 + $0x39] sm:$0xff] }
 0x236   : > { %5544 = vmatmul.msk.bf16.gmra.mxu1 %vm570_vm0, %v2768_v6  ;;  %v2740_v44 = vmul.f32 %v5962_v57, %v9639_v11  ;;  %v5963_v6 = vld [vmem:[#allocation2 + $0x31] sm:$0xff] }
 0x237   : > { %v7440_v15 = vpop.f32.mrf.mxu2 }
 0x238   : > { %v7438_v53 = vpop.f32.mrf.mxu3 }
 0x239   : > { %9635 = vst [vmem:[#allocation193_spill] sm:$0xff] %v7438_v53  ;;  %v2739_v53 = vmul.f32 %v5963_v6, %v9640_v24  ;;  %v7470_v6 = vld [vmem:[%s9252_s4] ss:$0 sm:$0xff] }
 0x23b   : > { %v7442_v10 = vpop.f32.mrf.mxu1  ;;  %v7444_v30 = vpop.f32.mrf.mxu0 }
 0x23c   : > { %9636 = vst [vmem:[#allocation194_spill] sm:$0xff] %v7442_v10 }
 0x23d   : > { %9637 = vst [vmem:[#allocation195_spill] sm:$0xff] %v7444_v30  ;;  %v1193_v30 = vadd.f32 %v7315_v37, %v7171_v56  ;;  %v1195_v37 = vadd.f32 %v7327_v0, %v7198_v23 }
 0x23e   : > { %5659 = vmatmul.msk.bf16.vlgmr.msrb.gmra.mxu0 %vm570_vm0, %v6903_v47  ;;  %v2769_v47 = vpack.c.bf16 %v2740_v44, %v2739_v53 }
 0x23f   : > { %v7450_v16 = vpop.f32.mrf.mxu2 }
 0x240   : > { %v7448_v38 = vpop.f32.mrf.mxu3 }
 0x241   : > { %9638 = vst [vmem:[#allocation196_spill] sm:$0xff] %v7448_v38 }
 0x243   : > { %v7454_v1 = vpop.f32.mrf.mxu1  ;;  %v7456_v13 = vpop.f32.mrf.mxu0 }
 0x244   : > { %9641 = vst [vmem:[#allocation46_spill] sm:$0xff] %v7454_v1  ;;  %5388 = vmatmul.msk.bf16.gmra.mxu2 %vm570_vm0, %v7386_v62 }
 0x245   : > { %9642 = vst [vmem:[#allocation42_spill] sm:$0xff] %v7456_v13  ;;  %5411 = vmatmul.msk.bf16.gmra.mxu3 %vm570_vm0, %v7223_v58 }
 0x246   : > { %5545 = vmatmul.msk.bf16.gmra.mxu1 %vm570_vm0, %v2769_v47  ;;  %v5964_v47 = vld [vmem:[#allocation2 + $0x49] sm:$0xff] }
 0x247   : > { %v7465_v57 = vpop.f32.mrf.mxu2 }
 0x248   : > { %v1394_v11 = vpop.f32.mrf.mxu3 }
 0x249   : > { %v1474_v24 = vadd.f32 %v1394_v11, %v1193_v30  ;;  %v9645_v11 = vld [vmem:[#allocation53_spill] sm:$0xff] }
 0x24b   : > { %v1740_v13 = vadd.f32 %v7138_v36, %v1474_v24  ;;  %v7474_v38 = vpop.f32.mrf.mxu1  ;;  %v7476_v53 = vpop.f32.mrf.mxu0 }
 0x24c   : > { %9643 = vst [vmem:[#allocation197_spill] sm:$0xff] %v7474_v38  ;;  %v9646_v38 = vld [vmem:[#allocation51_spill] sm:$0xff] }
 0x24d   : > { %9644 = vst [vmem:[#allocation198_spill] sm:$0xff] %v7476_v53  ;;  %v1776_v56 = vadd.f32 %v7470_v6, %v1740_v13  ;;  %v2742_v13 = vmul.f32 %v5964_v47, %v9645_v11  ;;  %v5965_v53 = vld [vmem:[#allocation2 + $0x41] sm:$0xff]  ;;  %v2712_v11 = vld [vmem:[#allocation2 + $0x59] sm:$0xff] }
 0x24e   : > { %5660 = vmatmul.msk.bf16.gmra.mxu0 %vm570_vm0, %v6958_v54  ;;  %v2741_v1 = vmul.f32 %v5965_v53, %v9646_v38 }
 0x24f   : > { %v1808_v30 = vmax.f32 %v1776_v56, 0.0  ;;  %v7488_v36 = vpop.f32.mrf.mxu2 }
 0x250   : > { %v1396_v44 = vpop.f32.mrf.mxu3  ;;  %v2770_v56 = vpack.c.bf16 %v2742_v13, %v2741_v1  ;;  %v2711_v13 = vld [vmem:[#allocation2 + $0x51] sm:$0xff] }
 0x251   : > { %1841 = vst.msk [vmem:[%s7482_s23] sm:$0xff] %vm1840_vm1, %v1808_v30  ;;  %v1475_v24 = vadd.f32 %v1396_v44, %v1195_v37  ;;  %v1198_v37 = vadd.f32 %v7346_v34, %v6864_v20  ;;  %v1200_v34 = vadd.f32 %v7358_v29, %v6895_v31 }
 0x253   : > { %v1741_v10 = vadd.f32 %v7169_v32, %v1475_v24  ;;  %v7495_v23 = vpop.f32.mrf.mxu1  ;;  %v7497_v0 = vpop.f32.mrf.mxu0 }
 0x254   : > { %9647 = vst [vmem:[#allocation53_spill] sm:$0xff] %v7497_v0  ;;  %5389 = vmatmul.msk.bf16.gmra.mxu2 %vm570_vm0, %v7419_v35 }
 0x255   : > { %v1777_v54 = vadd.f32 %v7470_v6, %v1741_v10  ;;  %5412 = vmatmul.msk.bf16.gmra.mxu3 %vm570_vm0, %v7247_v61 }
 0x256   : > { %5546 = vmatmul.msk.bf16.gmra.mxu1 %vm570_vm0, %v2770_v56  ;;  %v707_v56 = vld [vmem:[#allocation2 + $0x118] sm:$0xff] }
 0x257   : > { %v1809_v30 = vmax.f32 %v1777_v54, 0.0  ;;  %v7507_v32 = vpop.f32.mrf.mxu2 }
 0x258   : > { %v1399_v38 = vpop.f32.mrf.mxu3 }
 0x259   : > { %1842 = vst.msk [vmem:[%s7482_s23 + $0x8] sm:$0xff] %vm1840_vm1, %v1809_v30  ;;  %v1476_v10 = vadd.f32 %v1399_v38, %v1198_v37  ;;  %v706_v38 = vld [vmem:[#allocation2 + $0x110] sm:$0xff] }
 0x25a   : > { %v7528_v29 = vpack.c.bf16 %v707_v56, %v706_v38  ;;  %v2714_v38 = vld [vmem:[#allocation2 + $0x69] sm:$0xff] }
 0x25b   : > { %v1742_v53 = vadd.f32 %v7196_v17, %v1476_v10  ;;  %v7512_v44 = vpop.f32.mrf.mxu1  ;;  %v7514_v47 = vpop.f32.mrf.mxu0  ;;  %v9649_v17 = vld [vmem:[#allocation63_spill] sm:$0xff] }
 0x25c   : > { %9648 = vst [vmem:[#allocation51_spill] sm:$0xff] %v7514_v47  ;;  %v2744_v37 = vmul.f32 %v2712_v11, %v9649_v17  ;;  %v9650_v10 = vld [vmem:[#allocation59_spill] sm:$0xff] }
 0x25d   : > { %v1778_v1 = vadd.f32 %v7470_v6, %v1742_v53  ;;  %v2743_v53 = vmul.f32 %v2711_v13, %v9650_v10 }
 0x25e   : > { %5661 = vmatmul.msk.bf16.gmra.mxu0 %vm570_vm0, %v7014_v5 }
 0x25f   : > { %v1810_v20 = vmax.f32 %v1778_v1, 0.0  ;;  %v7521_v24 = vpop.f32.mrf.mxu2  ;;  %v2771_v11 = vpack.c.bf16 %v2744_v37, %v2743_v53 }
 0x260   : > { %v1401_v54 = vpop.f32.mrf.mxu3 }
 0x261   : > { %1843 = vst.msk [vmem:[%s7482_s23 + $0x10] sm:$0xff] %vm1840_vm1, %v1810_v20  ;;  %v1477_v30 = vadd.f32 %v1401_v54, %v1200_v34  ;;  %v1203_v34 = vadd.f32 %v7374_v9, %v6930_v55  ;;  %v1205_v55 = vadd.f32 %v7392_v4, %v6955_v3  ;;  %v9654_v4 = vld [vmem:[#allocation39_spill] sm:$0xff] }
 0x263   : > { %v1743_v31 = vadd.f32 %v7219_v39, %v1477_v30  ;;  %v7530_v1 = vpop.f32.mrf.mxu1  ;;  %v7532_v5 = vpop.f32.mrf.mxu0 }
 0x264   : > { %9651 = vst [vmem:[#allocation63_spill] sm:$0xff] %v7532_v5  ;;  %5390 = vmatmul.msk.bf16.gmra.mxu2 %vm570_vm0, %v7528_v29 }
 0x265   : > { %v1779_v47 = vadd.f32 %v7470_v6, %v1743_v31  ;;  %5413 = vmatmul.msk.bf16.gmra.mxu3 %vm570_vm0, %v7271_v43 }
 0x266   : > { %5547 = vmatmul.msk.bf16.gmra.mxu1 %vm570_vm0, %v2771_v11 }
 0x267   : > { %v1811_v20 = vmax.f32 %v1779_v47, 0.0  ;;  %v7542_v39 = vpop.f32.mrf.mxu2  ;;  %v2713_v47 = vld [vmem:[#allocation2 + $0x61] sm:$0xff] }
 0x268   : > { %v1404_v13 = vpop.f32.mrf.mxu3  ;;  %v2745_v11 = vmul.f32 %v2713_v47, %v6621_v48  ;;  %v2716_v47 = vld [vmem:[#allocation2 + $0x79] sm:$0xff] }
 0x269   : > { %1844 = vst.msk [vmem:[%s7482_s23 + $0x18] sm:$0xff] %vm1840_vm1, %v1811_v20  ;;  %v1478_v54 = vadd.f32 %v1404_v13, %v1203_v34  ;;  %v1208_v13 = vadd.f32 %v7413_v41, %v6983_v45  ;;  %v1210_v45 = vadd.f32 %v7425_v27, %v7011_v50  ;;  %v9657_v27 = vld [vmem:[#allocation40_spill] sm:$0xff] }
 0x26b   : > { %v1744_v56 = vadd.f32 %v7229_v25, %v1478_v54  ;;  %v7547_v17 = vpop.f32.mrf.mxu1  ;;  %v7549_v30 = vpop.f32.mrf.mxu0  ;;  %v2746_v25 = vmul.f32 %v2714_v38, %v6635_v19 }
 0x26c   : > { %9652 = vst [vmem:[#allocation59_spill] sm:$0xff] %v7549_v30 }
 0x26d   : > { %v1780_v37 = vadd.f32 %v7470_v6, %v1744_v56  ;;  %v2772_v19 = vpack.c.bf16 %v2746_v25, %v2745_v11 }
 0x26e   : > { %5662 = vmatmul.msk.bf16.gmra.mxu0 %vm570_vm0, %v7066_v52 }
 0x26f   : > { %v1812_v9 = vmax.f32 %v1780_v37, 0.0  ;;  %v7556_v10 = vpop.f32.mrf.mxu2 }
 0x270   : > { %v1406_v53 = vpop.f32.mrf.mxu3 }
 0x271   : > { %1845 = vst.msk [vmem:[%s7482_s23 + $0x20] sm:$0xff] %vm1840_vm1, %v1812_v9  ;;  %v1479_v31 = vadd.f32 %v1406_v53, %v1205_v55  ;;  %v2715_v53 = vld [vmem:[#allocation2 + $0x71] sm:$0xff] }
 0x273   : > { %v1745_v34 = vadd.f32 %v7243_v21, %v1479_v31  ;;  %v7563_v20 = vpop.f32.mrf.mxu1  ;;  %v7565_v3 = vpop.f32.mrf.mxu0 }
 0x274   : > { %9653 = vst [vmem:[#allocation199_spill] sm:$0xff] %v7565_v3  ;;  %5463 = vmatmul.msk.bf16.vlgmr.msra.gmra.mxu2 %vm570_vm0, %v9654_v4 }
 0x275   : > { %v1781_v52 = vadd.f32 %v7470_v6, %v1745_v34  ;;  %5414 = vmatmul.msk.bf16.gmra.mxu3 %vm570_vm0, %v7295_v49  ;;  %v2747_v34 = vmul.f32 %v2715_v53, %v6681_v28  ;;  %v1213_v28 = vadd.f32 %v7440_v15, %v7040_v51  ;;  %v2718_v53 = vld [vmem:[#allocation2 + $0x89] sm:$0xff]  ;;  %v1215_v51 = vadd.f32 %v7450_v16, %v7063_v2  ;;  %v9662_v16 = vld [vmem:[#allocation47_spill] sm:$0xff] }
 0x276   : > { %5548 = vmatmul.msk.bf16.gmra.mxu1 %vm570_vm0, %v2772_v19 }
 0x277   : > { %v1813_v54 = vmax.f32 %v1781_v52, 0.0  ;;  %v7575_v48 = vpop.f32.mrf.mxu2 }
 0x278   : > { %v1409_v21 = vpop.f32.mrf.mxu3 }
 0x279   : > { %1846 = vst.msk [vmem:[%s7482_s23 + $0x28] sm:$0xff] %vm1840_vm1, %v1813_v54  ;;  %v1480_v56 = vadd.f32 %v1409_v21, %v1208_v13  ;;  %v9658_v13 = vld [vmem:[#allocation37_spill] sm:$0xff] }
 0x27b   : > { %v1746_v37 = vadd.f32 %v7253_v60, %v1480_v56  ;;  %v7580_v38 = vpop.f32.mrf.mxu1  ;;  %v7582_v55 = vpop.f32.mrf.mxu0  ;;  %v2748_v60 = vmul.f32 %v2716_v47, %v6693_v40  ;;  %v9659_v40 = vpack.c.bf16 %v9657_v27, %v9658_v13  ;;  %v9691_v13 = vld [vmem:[#allocation72_spill] sm:$0xff] }
 0x27c   : > { %9655 = vst [vmem:[#allocation200_spill] sm:$0xff] %v7582_v55  ;;  %v9723_v55 = vld [vmem:[#allocation197_spill] sm:$0xff] }
 0x27d   : > { %v1782_v9 = vadd.f32 %v7470_v6, %v1746_v37  ;;  %v2773_v54 = vpack.c.bf16 %v2748_v60, %v2747_v34 }
 0x27e   : > { %5663 = vmatmul.msk.bf16.gmra.mxu0 %vm570_vm0, %v7115_v42 }
 0x27f   : > { %v1814_v41 = vmax.f32 %v1782_v9, 0.0  ;;  %v7589_v25 = vpop.f32.mrf.mxu2 }
 0x280   : > { %v1411_v31 = vpop.f32.mrf.mxu3 }
 0x281   : > { %1847 = vst.msk [vmem:[%s7482_s23 + $0x30] sm:$0xff] %vm1840_vm1, %v1814_v41  ;;  %v1481_v11 = vadd.f32 %v1411_v31, %v1210_v45  ;;  %v2717_v31 = vld [vmem:[#allocation2 + $0x81] sm:$0xff] }
 0x283   : > { %v1747_v52 = vadd.f32 %v7267_v22, %v1481_v11  ;;  %v7596_v19 = vpop.f32.mrf.mxu1  ;;  %v7598_v50 = vpop.f32.mrf.mxu0 }
 0x284   : > { %9656 = vst [vmem:[#allocation201_spill] sm:$0xff] %v7598_v50  ;;  %5464 = vmatmul.msk.bf16.gmra.mxu2 %vm570_vm0, %v9659_v40  ;;  %v1218_v40 = vadd.f32 %v7465_v57, %v7089_v46  ;;  %v1220_v46 = vadd.f32 %v7488_v36, %v7112_v12  ;;  %v9668_v36 = vld [vmem:[#allocation55_spill] sm:$0xff] }
 0x285   : > { %v1783_v42 = vadd.f32 %v7470_v6, %v1747_v52  ;;  %5415 = vmatmul.msk.bf16.gmra.mxu3 %vm570_vm0, %v7321_v7  ;;  %v2749_v52 = vmul.f32 %v2717_v31, %v6737_v33  ;;  %v9664_v31 = vld [vmem:[#allocation97_spill] sm:$0xff] }
 0x286   : > { %5549 = vmatmul.msk.bf16.gmra.mxu1 %vm570_vm0, %v2773_v54 }
 0x287   : > { %v1815_v21 = vmax.f32 %v1783_v42, 0.0  ;;  %v7610_v22 = vpop.f32.mrf.mxu2 }
 0x288   : > { %v1414_v56 = vpop.f32.mrf.mxu3 }
 0x289   : > { %1848 = vst.msk [vmem:[%s7482_s23 + $0x38] sm:$0xff] %vm1840_vm1, %v1815_v21  ;;  %v1482_v37 = vadd.f32 %v1414_v56, %v1213_v28 }
 0x28b   : > { %v1748_v9 = vadd.f32 %v7277_v18, %v1482_v37  ;;  %v7615_v47 = vpop.f32.mrf.mxu1  ;;  %v7617_v45 = vpop.f32.mrf.mxu0  ;;  %v2750_v18 = vmul.f32 %v2718_v53, %v6751_v63  ;;  %v2719_v53 = vld [vmem:[#allocation2 + $0x91] sm:$0xff] }
 0x28c   : > { %9660 = vst [vmem:[#allocation40_spill] sm:$0xff] %v7617_v45 }
 0x28d   : > { %v1784_v41 = vadd.f32 %v7470_v6, %v1748_v9  ;;  %v2774_v63 = vpack.c.bf16 %v2750_v18, %v2749_v52  ;;  %v9665_v18 = vld [vmem:[#allocation95_spill] sm:$0xff]  ;;  %v9666_v52 = vld [vmem:[#allocation170_spill] sm:$0xff] }
 0x28e   : > { %5664 = vmatmul.msk.bf16.gmra.mxu0 %vm570_vm0, %v7173_v14 }
 0x28f   : > { %v1816_v15 = vmax.f32 %v1784_v41, 0.0  ;;  %v7624_v60 = vpop.f32.mrf.mxu2  ;;  %v2720_v41 = vld [vmem:[#allocation2 + $0x99] sm:$0xff] }
 0x290   : > { %v1416_v11 = vpop.f32.mrf.mxu3 }
 0x291   : > { %1849 = vst.msk [vmem:[%s7482_s23 + $0x40] sm:$0xff] %vm1840_vm1, %v1816_v15  ;;  %v1483_v34 = vadd.f32 %v1416_v11, %v1215_v51 }
 0x293   : > { %v1749_v42 = vadd.f32 %v7291_v59, %v1483_v34  ;;  %v7631_v27 = vpop.f32.mrf.mxu1  ;;  %v7633_v2 = vpop.f32.mrf.mxu0  ;;  %v2751_v34 = vmul.f32 %v2719_v53, %v9665_v18  ;;  %v5920_v53 = vld [vmem:[%s9251_s3 + $0x98] sm:$0xff]  ;;  %v2722_v18 = vld [vmem:[#allocation2 + $0xa9] sm:$0xff] }
 0x294   : > { %9661 = vst [vmem:[#allocation202_spill] sm:$0xff] %v7633_v2  ;;  %5465 = vmatmul.msk.bf16.gmra.mxu2 %vm570_vm0, %v9662_v16  ;;  %3423 = vmatpush.bf16.msrb.mxu3 %v5920_v53  ;;  %v9690_v16 = vld [vmem:[#allocation73_spill] sm:$0xff] }
 0x295   : > { %v1785_v14 = vadd.f32 %v7470_v6, %v1749_v42  ;;  %5416 = vmatmul.msk.bf16.gmra.mxu3 %vm570_vm0, %v7352_v8  ;;  %v9692_v4 = vpack.c.bf16 %v9690_v16, %v9691_v13 }
 0x296   : > { %5550 = vmatmul.msk.bf16.gmra.mxu1 %vm570_vm0, %v2774_v63  ;;  %v9669_v63 = vld [vmem:[#allocation54_spill] sm:$0xff] }
 0x297   : > { %v1817_v54 = vmax.f32 %v1785_v14, 0.0  ;;  %v7643_v33 = vpop.f32.mrf.mxu2 }
 0x298   : > { %v1419_v59 = vpop.f32.mrf.mxu3 }
 0x299   : > { %1850 = vst.msk [vmem:[%s7482_s23 + $0x48] sm:$0xff] %vm1840_vm1, %v1817_v54  ;;  %v1484_v28 = vadd.f32 %v1419_v59, %v1218_v40  ;;  %v9670_v40 = vpack.c.bf16 %v9668_v36, %v9669_v63  ;;  %v9671_v59 = vld [vmem:[#allocation141_spill] sm:$0xff] }
 0x29b   : > { %v1750_v21 = vadd.f32 %v7301_v26, %v1484_v28  ;;  %v7648_v56 = vpop.f32.mrf.mxu1  ;;  %v7650_v37 = vpop.f32.mrf.mxu0  ;;  %v2752_v26 = vmul.f32 %v2720_v41, %v9664_v31  ;;  %v1223_v28 = vadd.f32 %v7507_v32, %v9671_v59 }
 0x29c   : > { %9663 = vst [vmem:[#allocation203_spill] sm:$0xff] %v7650_v37 }
 0x29d   : > { %v1786_v9 = vadd.f32 %v7470_v6, %v1750_v21  ;;  %v2775_v54 = vpack.c.bf16 %v2752_v26, %v2751_v34  ;;  %v9674_v34 = vld [vmem:[#allocation146_spill] sm:$0xff] }
 0x29e   : > { %5665 = vmatmul.msk.bf16.gmra.mxu0 %vm570_vm0, %v7223_v58 }
 0x29f   : > { %v1818_v57 = vmax.f32 %v1786_v9, 0.0  ;;  %v7657_v51 = vpop.f32.mrf.mxu2 }
 0x2a0   : > { %v1421_v15 = vpop.f32.mrf.mxu3 }
 0x2a1   : > { %1851 = vst.msk [vmem:[%s7482_s23 + $0x50] sm:$0xff] %vm1840_vm1, %v1818_v57  ;;  %v1485_v11 = vadd.f32 %v1421_v15, %v1220_v46  ;;  %v5922_v57 = vld [vmem:[%s9251_s3 + $0xb8] sm:$0xff]  ;;  %v9672_v15 = vld [vmem:[#allocation173_spill] sm:$0xff] }
 0x2a2   : > { %3274 = vmatpush.bf16.msrb.mxu2 %v5922_v57 }
 0x2a3   : > { %v1751_v42 = vadd.f32 %v9666_v52, %v1485_v11  ;;  %v7664_v14 = vpop.f32.mrf.mxu1  ;;  %v7666_v12 = vpop.f32.mrf.mxu0  ;;  %v1225_v52 = vadd.f32 %v7521_v24, %v9674_v34  ;;  %v9682_v34 = vld [vmem:[#allocation153_spill] sm:$0xff] }
 0x2a4   : > { %9667 = vst [vmem:[#allocation97_spill] sm:$0xff] %v7666_v12  ;;  %5466 = vmatmul.msk.bf16.gmra.mxu2 %vm570_vm0, %v9670_v40  ;;  %v9675_v40 = vld [vmem:[#allocation107_spill] sm:$0xff] }
 0x2a5   : > { %v1787_v58 = vadd.f32 %v7470_v6, %v1751_v42  ;;  %5417 = vmatmul.msk.bf16.gmra.mxu3 %vm570_vm0, %v7386_v62 }
 0x2a6   : > { %5551 = vmatmul.msk.bf16.gmra.mxu1 %vm570_vm0, %v2775_v54  ;;  %v2754_v54 = vmul.f32 %v2722_v18, %v9675_v40 }
 0x2a7   : > { %v1819_v21 = vmax.f32 %v1787_v58, 0.0  ;;  %v7678_v9 = vpop.f32.mrf.mxu2  ;;  %v2721_v58 = vld [vmem:[#allocation2 + $0xa1] sm:$0xff] }
 0x2a8   : > { %v1424_v41 = vpop.f32.mrf.mxu3 }
 0x2a9   : > { %1852 = vst.msk [vmem:[%s7482_s23 + $0x58] sm:$0xff] %vm1840_vm1, %v1819_v21  ;;  %v1486_v46 = vadd.f32 %v1424_v41, %v1223_v28  ;;  %v5926_v28 = vld [vmem:[%s9251_s3 + $0x38] sm:$0xff]  ;;  %v9676_v21 = vld [vmem:[#allocation105_spill] sm:$0xff]  ;;  %v9677_v41 = vld [vmem:[#allocation176_spill] sm:$0xff] }
 0x2aa   : > { %v2753_v24 = vmul.f32 %v2721_v58, %v9676_v21  ;;  %3891 = vmatpush.bf16.msrb.mxu1 %v5926_v28 }
 0x2ab   : > { %v1752_v32 = vadd.f32 %v9672_v15, %v1486_v46  ;;  %v7689_v31 = vpop.f32.mrf.mxu1  ;;  %v7691_v26 = vpop.f32.mrf.mxu0  ;;  %v9679_v15 = vld [vmem:[#allocation65_spill] sm:$0xff] }
 0x2ac   : > { %9673 = vst [vmem:[#allocation95_spill] sm:$0xff] %v7691_v26  ;;  %v2776_v18 = vpack.c.bf16 %v2754_v54, %v2753_v24  ;;  %v2724_v24 = vld [vmem:[#allocation2 + $0xb9] sm:$0xff] }
 0x2ad   : > { %v1788_v11 = vadd.f32 %v7470_v6, %v1752_v32  ;;  %v9680_v32 = vld [vmem:[#allocation64_spill] sm:$0xff]  ;;  %v9710_v26 = vld [vmem:[#allocation194_spill] sm:$0xff] }
 0x2ae   : > { %5666 = vmatmul.msk.bf16.gmra.mxu0 %vm570_vm0, %v7247_v61 }
 0x2af   : > { %v1820_v42 = vmax.f32 %v1788_v11, 0.0  ;;  %v7698_v36 = vpop.f32.mrf.mxu2  ;;  %v9681_v11 = vpack.c.bf16 %v9679_v15, %v9680_v32 }
 0x2b0   : > { %v1426_v63 = vpop.f32.mrf.mxu3 }
 0x2b1   : > { %1853 = vst.msk [vmem:[%s7482_s23 + $0x60] sm:$0xff] %vm1840_vm1, %v1820_v42  ;;  %v1487_v59 = vadd.f32 %v1426_v63, %v1225_v52  ;;  %v1228_v52 = vadd.f32 %v7542_v39, %v9682_v34  ;;  %v9685_v39 = vld [vmem:[#allocation155_spill] sm:$0xff] }
 0x2b3   : > { %v1753_v46 = vadd.f32 %v9677_v41, %v1487_v59  ;;  %v7708_v61 = vpop.f32.mrf.mxu1  ;;  %v7710_v57 = vpop.f32.mrf.mxu0  ;;  %v1230_v41 = vadd.f32 %v7556_v10, %v9685_v39 }
 0x2b4   : > { %9678 = vst [vmem:[#allocation170_spill] sm:$0xff] %v7710_v57  ;;  %5467 = vmatmul.msk.bf16.gmra.mxu2 %vm570_vm0, %v9681_v11  ;;  %v1874_v11 = vld [vmem:[#allocation2 + $0x28] sm:$0xff] }
 0x2b5   : > { %v1789_v53 = vadd.f32 %v7470_v6, %v1753_v46  ;;  %5418 = vmatmul.msk.bf16.gmra.mxu3 %vm570_vm0, %v7419_v35  ;;  %v9683_v35 = vld [vmem:[#allocation179_spill] sm:$0xff] }
 0x2b6   : > { %5552 = vmatmul.msk.bf16.gmra.mxu1 %vm570_vm0, %v2776_v18  ;;  %v9686_v18 = vld [vmem:[#allocation117_spill] sm:$0xff] }
 0x2b7   : > { %v1821_v42 = vmax.f32 %v1789_v53, 0.0  ;;  %v7722_v58 = vpop.f32.mrf.mxu2  ;;  %v2723_v53 = vld [vmem:[#allocation2 + $0xb1] sm:$0xff]  ;;  %v2756_v34 = vmul.f32 %v2724_v24, %v9686_v18 }
 0x2b8   : > { %v1429_v63 = vpop.f32.mrf.mxu3 }
 0x2b9   : > { %1854 = vst.msk [vmem:[%s7482_s23 + $0x68] sm:$0xff] %vm1840_vm1, %v1821_v42  ;;  %v1488_v40 = vadd.f32 %v1429_v63, %v1228_v52  ;;  %v1873_v42 = vld [vmem:[#allocation2 + $0x20] sm:$0xff] }
 0x2ba   : > { %v9687_v63 = vld [vmem:[#allocation115_spill] sm:$0xff] }
 0x2bb   : > { %v1754_v59 = vadd.f32 %v9683_v35, %v1488_v40  ;;  %v7727_v28 = vpop.f32.mrf.mxu1  ;;  %v7729_v21 = vpop.f32.mrf.mxu0  ;;  %v2755_v40 = vmul.f32 %v2723_v53, %v9687_v63  ;;  %v9688_v35 = vld [vmem:[#allocation182_spill] sm:$0xff] }
 0x2bc   : > { %9684 = vst [vmem:[#allocation55_spill] sm:$0xff] %v7729_v21 }
 0x2bd   : > { %v1790_v54 = vadd.f32 %v7470_v6, %v1754_v59  ;;  %v1905_v59 = vpack.c.bf16 %v1874_v11, %v1873_v42  ;;  %v2777_v24 = vpack.c.bf16 %v2756_v34, %v2755_v40  ;;  %v9694_v42 = vld [vmem:[#allocation185_spill] sm:$0xff] }
 0x2be   : > { %5667 = vmatmul.msk.bf16.gmra.mxu0 %vm570_vm0, %v7271_v43  ;;  %v7766_v40 = vld [vmem:[#allocation2 + $0xc9] sm:$0xff] }
 0x2bf   : > { %v1822_v46 = vmax.f32 %v1790_v54, 0.0  ;;  %v7736_v15 = vpop.f32.mrf.mxu2 }
 0x2c0   : > { %v1431_v32 = vpop.f32.mrf.mxu3 }
 0x2c1   : > { %1855 = vst.msk [vmem:[%s7482_s23 + $0x70] sm:$0xff] %vm1840_vm1, %v1822_v46  ;;  %v1489_v52 = vadd.f32 %v1431_v32, %v1230_v41  ;;  %v9693_v41 = vld [vmem:[#allocation157_spill] sm:$0xff] }
 0x2c2   : > { %v1233_v46 = vadd.f32 %v7575_v48, %v9693_v41  ;;  %v9696_v48 = vld [vmem:[#allocation159_spill] sm:$0xff] }
 0x2c3   : > { %v1755_v10 = vadd.f32 %v9688_v35, %v1489_v52  ;;  %v7743_v54 = vpop.f32.mrf.mxu1  ;;  %v7745_v43 = vpop.f32.mrf.mxu0  ;;  %v1235_v35 = vadd.f32 %v7589_v25, %v9696_v48  ;;  %v7774_v41 = vld [vmem:[#allocation2 + $0xc1] sm:$0xff] }
 0x2c4   : > { %9689 = vst [vmem:[#allocation54_spill] sm:$0xff] %v7745_v43  ;;  %5468 = vmatmul.msk.bf16.gmra.mxu2 %vm570_vm0, %v9692_v4 }
 0x2c5   : > { %v1791_v39 = vadd.f32 %v7470_v6, %v1755_v10  ;;  %5487 = vmatmul.msk.bf16.vlgmr.msra.gmra.mxu3 %vm570_vm0, %v1905_v59 }
 0x2c6   : > { %5553 = vmatmul.msk.bf16.gmra.mxu1 %vm570_vm0, %v2777_v24  ;;  %v1876_v24 = vld [vmem:[#allocation2 + $0x38] sm:$0xff] }
 0x2c7   : > { %v1823_v53 = vmax.f32 %v1791_v39, 0.0  ;;  %v7756_v32 = vpop.f32.mrf.mxu2 }
 0x2c8   : > { %v1434_v11 = vpop.f32.mrf.mxu3 }
 0x2c9   : > { %1856 = vst.msk [vmem:[%s7482_s23 + $0x78] sm:$0xff] %vm1840_vm1, %v1823_v53  ;;  %v1490_v52 = vadd.f32 %v1434_v11, %v1233_v46  ;;  %v9697_v53 = vld [vmem:[#allocation124_spill] sm:$0xff] }
 0x2ca   : > { %v2758_v11 = vmul.f32 %v7766_v40, %v9697_v53 }
 0x2cb   : > { %v1756_v13 = vadd.f32 %v9694_v42, %v1490_v52  ;;  %v7761_v16 = vpop.f32.mrf.mxu1  ;;  %v7763_v4 = vpop.f32.mrf.mxu0  ;;  %v1875_v52 = vld [vmem:[#allocation2 + $0x30] sm:$0xff]  ;;  %v9698_v42 = vld [vmem:[#allocation188_spill] sm:$0xff] }
 0x2cc   : > { %9695 = vst [vmem:[#allocation141_spill] sm:$0xff] %v7763_v4 }
 0x2cd   : > { %v1792_v34 = vadd.f32 %v7470_v6, %v1756_v13  ;;  %v7781_v13 = vpack.c.bf16 %v1876_v24, %v1875_v52  ;;  %v9704_v24 = vld [vmem:[#allocation161_spill] sm:$0xff] }
 0x2ce   : > { %5668 = vmatmul.msk.bf16.gmra.mxu0 %vm570_vm0, %v7295_v49  ;;  %v1238_v52 = vadd.f32 %v7610_v22, %v9704_v24  ;;  %v9708_v22 = vld [vmem:[#allocation163_spill] sm:$0xff] }
 0x2cf   : > { %v1824_v10 = vmax.f32 %v1792_v34, 0.0  ;;  %v7772_v59 = vpop.f32.mrf.mxu2  ;;  %v9699_v34 = vld [vmem:[#allocation123_spill] sm:$0xff] }
 0x2d0   : > { %v1436_v39 = vpop.f32.mrf.mxu3  ;;  %v2757_v49 = vmul.f32 %v7774_v41, %v9699_v34 }
 0x2d1   : > { %1857 = vst.msk [vmem:[%s7482_s23 + $0x80] sm:$0xff] %vm1840_vm1, %v1824_v10  ;;  %v1491_v46 = vadd.f32 %v1436_v39, %v1235_v35  ;;  %v9701_v10 = vld [vmem:[#allocation81_spill] sm:$0xff]  ;;  %v9702_v35 = vld [vmem:[#allocation80_spill] sm:$0xff] }
 0x2d2   : > { %v9703_v39 = vpack.c.bf16 %v9701_v10, %v9702_v35  ;;  %v9705_v10 = vld [vmem:[#allocation191_spill] sm:$0xff] }
 0x2d3   : > { %v1757_v25 = vadd.f32 %v9698_v42, %v1491_v46  ;;  %v7785_v48 = vpop.f32.mrf.mxu1  ;;  %v7787_v4 = vpop.f32.mrf.mxu0  ;;  %v2778_v46 = vpack.c.bf16 %v2758_v11, %v2757_v49  ;;  %v7809_v49 = vld [vmem:[#allocation2 + $0xd9] sm:$0xff] }
 0x2d4   : > { %9700 = vst [vmem:[#allocation173_spill] sm:$0xff] %v7787_v4  ;;  %5469 = vmatmul.msk.bf16.gmra.mxu2 %vm570_vm0, %v9703_v39 }
 0x2d5   : > { %v1793_v43 = vadd.f32 %v7470_v6, %v1757_v25  ;;  %5488 = vmatmul.msk.bf16.gmra.mxu3 %vm570_vm0, %v7781_v13 }
 0x2d6   : > { %5554 = vmatmul.msk.bf16.gmra.mxu1 %vm570_vm0, %v2778_v46 }
 0x2d7   : > { %v1825_v42 = vmax.f32 %v1793_v43, 0.0  ;;  %v7799_v21 = vpop.f32.mrf.mxu2  ;;  %v1240_v43 = vadd.f32 %v7624_v60, %v9708_v22  ;;  %v9711_v22 = vld [vmem:[#allocation129_spill] sm:$0xff] }
 0x2d8   : > { %v1439_v4 = vpop.f32.mrf.mxu3 }
 0x2d9   : > { %1858 = vst.msk [vmem:[%s7482_s23 + $0x88] sm:$0xff] %vm1840_vm1, %v1825_v42  ;;  %v1492_v25 = vadd.f32 %v1439_v4, %v1238_v52  ;;  %v1878_v52 = vld [vmem:[#allocation2 + $0x48] sm:$0xff]  ;;  %v7817_v42 = vld [vmem:[#allocation2 + $0xd1] sm:$0xff] }
 0x2db   : > { %v1758_v35 = vadd.f32 %v9705_v10, %v1492_v25  ;;  %v7804_v39 = vpop.f32.mrf.mxu1  ;;  %v7806_v57 = vpop.f32.mrf.mxu0  ;;  %v9709_v10 = vld [vmem:[#allocation130_spill] sm:$0xff] }
 0x2dc   : > { %9706 = vst [vmem:[#allocation146_spill] sm:$0xff] %v7804_v39 }
 0x2dd   : > { %9707 = vst [vmem:[#allocation107_spill] sm:$0xff] %v7806_v57  ;;  %v1794_v11 = vadd.f32 %v7470_v6, %v1758_v35  ;;  %v2760_v35 = vmul.f32 %v7809_v49, %v9709_v10  ;;  %v1877_v57 = vld [vmem:[#allocation2 + $0x40] sm:$0xff] }
 0x2de   : > { %5669 = vmatmul.msk.bf16.gmra.mxu0 %vm570_vm0, %v7321_v7  ;;  %v2759_v7 = vmul.f32 %v7817_v42, %v9711_v22 }
 0x2df   : > { %v1826_v46 = vmax.f32 %v1794_v11, 0.0  ;;  %v7815_v24 = vpop.f32.mrf.mxu2  ;;  %v7824_v11 = vpack.c.bf16 %v1878_v52, %v1877_v57  ;;  %v9717_v57 = vld [vmem:[#allocation165_spill] sm:$0xff] }
 0x2e0   : > { %v1441_v4 = vpop.f32.mrf.mxu3  ;;  %v1243_v52 = vadd.f32 %v7643_v33, %v9717_v57 }
 0x2e1   : > { %1859 = vst.msk [vmem:[%s7482_s23 + $0x90] sm:$0xff] %vm1840_vm1, %v1826_v46  ;;  %v1493_v25 = vadd.f32 %v1441_v4, %v1240_v43  ;;  %v9714_v46 = vld [vmem:[#allocation89_spill] sm:$0xff]  ;;  %v9715_v43 = vld [vmem:[#allocation88_spill] sm:$0xff] }
 0x2e2   : > { %v9716_v4 = vpack.c.bf16 %v9714_v46, %v9715_v43  ;;  %v9718_v46 = vld [vmem:[#allocation46_spill] sm:$0xff] }
 0x2e3   : > { %v1759_v60 = vadd.f32 %v9710_v26, %v1493_v25  ;;  %v7828_v12 = vpop.f32.mrf.mxu1  ;;  %v7830_v37 = vpop.f32.mrf.mxu0  ;;  %v2779_v26 = vpack.c.bf16 %v2760_v35, %v2759_v7  ;;  %v7852_v7 = vld [vmem:[#allocation2 + $0xe9] sm:$0xff] }
 0x2e4   : > { %9712 = vst [vmem:[#allocation105_spill] sm:$0xff] %v7828_v12  ;;  %5470 = vmatmul.msk.bf16.gmra.mxu2 %vm570_vm0, %v9716_v4 }
 0x2e5   : > { %9713 = vst [vmem:[#allocation176_spill] sm:$0xff] %v7830_v37  ;;  %v1795_v2 = vadd.f32 %v7470_v6, %v1759_v60  ;;  %5489 = vmatmul.msk.bf16.gmra.mxu3 %vm570_vm0, %v7824_v11 }
 0x2e6   : > { %5555 = vmatmul.msk.bf16.gmra.mxu1 %vm570_vm0, %v2779_v26 }
 0x2e7   : > { %v1827_v25 = vmax.f32 %v1795_v2, 0.0  ;;  %v7842_v45 = vpop.f32.mrf.mxu2  ;;  %v9721_v2 = vld [vmem:[#allocation167_spill] sm:$0xff] }
 0x2e8   : > { %v1444_v37 = vpop.f32.mrf.mxu3  ;;  %v1245_v33 = vadd.f32 %v7657_v51, %v9721_v2  ;;  %v9724_v2 = vld [vmem:[#allocation136_spill] sm:$0xff] }
 0x2e9   : > { %1860 = vst.msk [vmem:[%s7482_s23 + $0x98] sm:$0xff] %vm1840_vm1, %v1827_v25  ;;  %v1494_v60 = vadd.f32 %v1444_v37, %v1243_v52  ;;  %v1880_v52 = vld [vmem:[#allocation2 + $0x58] sm:$0xff]  ;;  %v7860_v25 = vld [vmem:[#allocation2 + $0xe1] sm:$0xff] }
 0x2eb   : > { %v1760_v43 = vadd.f32 %v9718_v46, %v1494_v60  ;;  %v7847_v4 = vpop.f32.mrf.mxu1  ;;  %v7849_v50 = vpop.f32.mrf.mxu0  ;;  %v9722_v46 = vld [vmem:[#allocation135_spill] sm:$0xff] }
 0x2ec   : > { %9719 = vst [vmem:[#allocation65_spill] sm:$0xff] %v7847_v4 }
 0x2ed   : > { %9720 = vst [vmem:[#allocation64_spill] sm:$0xff] %v7849_v50  ;;  %v1796_v35 = vadd.f32 %v7470_v6, %v1760_v43  ;;  %v2762_v43 = vmul.f32 %v7852_v7, %v9722_v46  ;;  %v1879_v50 = vld [vmem:[#allocation2 + $0x50] sm:$0xff] }
 0x2ee   : > { %5670 = vmatmul.msk.bf16.gmra.mxu0 %vm570_vm0, %v7352_v8  ;;  %v2761_v8 = vmul.f32 %v7860_v25, %v9724_v2 }
 0x2ef   : > { %v1828_v26 = vmax.f32 %v1796_v35, 0.0  ;;  %v7858_v57 = vpop.f32.mrf.mxu2  ;;  %v7867_v35 = vpack.c.bf16 %v1880_v52, %v1879_v50  ;;  %v9730_v50 = vld [vmem:[#allocation169_spill] sm:$0xff] }
 0x2f0   : > { %v1446_v37 = vpop.f32.mrf.mxu3  ;;  %v1248_v52 = vadd.f32 %v7678_v9, %v9730_v50 }
 0x2f1   : > { %1861 = vst.msk [vmem:[%s7482_s23 + $0xa0] sm:$0xff] %vm1840_vm1, %v1828_v26  ;;  %v1495_v60 = vadd.f32 %v1446_v37, %v1245_v33  ;;  %v9727_v26 = vld [vmem:[#allocation99_spill] sm:$0xff]  ;;  %v9728_v33 = vld [vmem:[#allocation98_spill] sm:$0xff] }
 0x2f2   : > { %v9729_v37 = vpack.c.bf16 %v9727_v26, %v9728_v33 }
 0x2f3   : > { %v1761_v51 = vadd.f32 %v9723_v55, %v1495_v60  ;;  %v7871_v3 = vpop.f32.mrf.mxu1  ;;  %v7873_v30 = vpop.f32.mrf.mxu0  ;;  %v2780_v55 = vpack.c.bf16 %v2762_v43, %v2761_v8  ;;  %v7895_v8 = vld [vmem:[#allocation2 + $0xf9] sm:$0xff] }
 0x2f4   : > { %9725 = vst [vmem:[#allocation153_spill] sm:$0xff] %v7871_v3  ;;  %5471 = vmatmul.msk.bf16.gmra.mxu2 %vm570_vm0, %v9729_v37 }
 0x2f5   : > { %9726 = vst [vmem:[#allocation179_spill] sm:$0xff] %v7873_v30  ;;  %v1797_v5 = vadd.f32 %v7470_v6, %v1761_v51  ;;  %5490 = vmatmul.msk.bf16.gmra.mxu3 %vm570_vm0, %v7867_v35 }
 0x2f6   : > { %5556 = vmatmul.msk.bf16.gmra.mxu1 %vm570_vm0, %v2780_v55 }
 0x2f7   : > { %v1829_v60 = vmax.f32 %v1797_v5, 0.0  ;;  %v7885_v30 = vpop.f32.mrf.mxu2  ;;  %v9733_v5 = vld [vmem:[#allocation172_spill] sm:$0xff] }
 0x2f8   : > { %v1449_v0 = vpop.f32.mrf.mxu3  ;;  %v1250_v9 = vadd.f32 %v7698_v36, %v9733_v5  ;;  %v5925_v5 = vld [vmem:[%s9251_s3 + $0x30] sm:$0xff] }
 0x2f9   : > { %1862 = vst.msk [vmem:[%s7482_s23 + $0xa8] sm:$0xff] %vm1840_vm1, %v1829_v60  ;;  %v1496_v51 = vadd.f32 %v1449_v0, %v1248_v52  ;;  %v1882_v0 = vld [vmem:[#allocation2 + $0x68] sm:$0xff]  ;;  %3892 = vmatpush.bf16.msrb.mxu1 %v5925_v5 }
 0x2fb   : > { %v1762_v26 = vadd.f32 %v7495_v23, %v1496_v51  ;;  %v7890_v33 = vpop.f32.mrf.mxu1  ;;  %v7893_v43 = vpop.f32.mrf.mxu0  ;;  %v7903_v23 = vld [vmem:[#allocation2 + $0xf1] sm:$0xff]  ;;  %v9734_v51 = vld [vmem:[#allocation143_spill] sm:$0xff] }
 0x2fc   : > { %9731 = vst [vmem:[#allocation155_spill] sm:$0xff] %v7890_v33 }
 0x2fd   : > { %v1798_v37 = vadd.f32 %v7470_v6, %v1762_v26  ;;  %9732 = vst [vmem:[#allocation182_spill] sm:$0xff] %v7893_v43  ;;  %v2764_v26 = vmul.f32 %v7895_v8, %v9734_v51  ;;  %v1881_v43 = vld [vmem:[#allocation2 + $0x60] sm:$0xff] }
 0x2fe   : > { %5671 = vmatmul.msk.bf16.gmra.mxu0 %vm570_vm0, %v7386_v62  ;;  %v7910_v36 = vpack.c.bf16 %v1882_v0, %v1881_v43  ;;  %v9740_v43 = vld [vmem:[#allocation175_spill] sm:$0xff] }
 0x2ff   : > { %v1830_v55 = vmax.f32 %v1798_v37, 0.0  ;;  %v7901_v60 = vpop.f32.mrf.mxu2  ;;  %v9735_v37 = vld [vmem:[#allocation142_spill] sm:$0xff]  ;;  %v1253_v0 = vadd.f32 %v7722_v58, %v9740_v43 }
 0x300   : > { %v1451_v50 = vpop.f32.mrf.mxu3  ;;  %v2763_v62 = vmul.f32 %v7903_v23, %v9735_v37 }
 0x301   : > { %1863 = vst.msk [vmem:[%s7482_s23 + $0xb0] sm:$0xff] %vm1840_vm1, %v1830_v55  ;;  %v1497_v52 = vadd.f32 %v1451_v50, %v1250_v9  ;;  %v9737_v55 = vld [vmem:[#allocation109_spill] sm:$0xff]  ;;  %v9738_v50 = vld [vmem:[#allocation108_spill] sm:$0xff] }
 0x302   : > { %v9739_v4 = vpack.c.bf16 %v9737_v55, %v9738_v50 }
 0x303   : > { %v1763_v33 = vadd.f32 %v7512_v44, %v1497_v52  ;;  %v7917_v3 = vpop.f32.mrf.mxu1  ;;  %v2781_v44 = vpack.c.bf16 %v2764_v26, %v2763_v62  ;;  %v7928_v12 = vpop.f32.mrf.mxu0  ;;  %v3532_v62 = vld [vmem:[#allocation2 + $0x100] sm:$0xff] }
 0x304   : > { %9736 = vst [vmem:[#allocation73_spill] sm:$0xff] %v7917_v3  ;;  %5472 = vmatmul.msk.bf16.gmra.mxu2 %vm570_vm0, %v9739_v4  ;;  %v3533_v4 = vld [vmem:[#allocation2 + $0x108] sm:$0xff] }
 0x305   : > { %v1799_v9 = vadd.f32 %v7470_v6, %v1763_v33  ;;  %5491 = vmatmul.msk.bf16.gmra.mxu3 %vm570_vm0, %v7910_v36  ;;  %9741 = vst [vmem:[#allocation72_spill] sm:$0xff] %v7928_v12  ;;  %v7939_v5 = vpack.c.bf16 %v3533_v4, %v3532_v62  ;;  %v9745_v62 = vld [vmem:[#allocation150_spill] sm:$0xff] }
 0x306   : > { %5557 = vmatmul.msk.bf16.gmra.mxu1 %vm570_vm0, %v2781_v44  ;;  %v9744_v44 = vld [vmem:[#allocation178_spill] sm:$0xff] }
 0x307   : > { %v1831_v52 = vmax.f32 %v1799_v9, 0.0  ;;  %v7931_v33 = vpop.f32.mrf.mxu2  ;;  %9743 = vst [vmem:[#allocation185_spill] sm:$0xff] %v7939_v5  ;;  %v7941_v9 = vld [vmem:[#allocation2 + $0x109] sm:$0xff]  ;;  %v1255_v43 = vadd.f32 %v7736_v15, %v9744_v44  ;;  %v2138_v15 = vmul.f32 %v7774_v41, %v9687_v63 }
 0x308   : > { %v1454_v3 = vpop.f32.mrf.mxu3  ;;  %v1883_v44 = vld [vmem:[#allocation2 + $0x70] sm:$0xff] }
 0x309   : > { %1864 = vst.msk [vmem:[%s7482_s23 + $0xb8] sm:$0xff] %vm1840_vm1, %v1831_v52  ;;  %v1498_v55 = vadd.f32 %v1454_v3, %v1253_v0  ;;  %v2139_v3 = vmul.f32 %v7766_v40, %v9686_v18  ;;  %v1884_v52 = vld [vmem:[#allocation2 + $0x78] sm:$0xff] }
 0x30b   : > { %v1764_v50 = vadd.f32 %v7530_v1, %v1498_v55  ;;  %v7936_v26 = vpop.f32.mrf.mxu1  ;;  %v7951_v55 = vld [vmem:[#allocation2 + $0x101] sm:$0xff]  ;;  %v7955_v4 = vpop.f32.mrf.mxu0  ;;  %v2160_v18 = vpack.c.bf16 %v2139_v3, %v2138_v15 }
 0x30c   : > { %9742 = vst [vmem:[#allocation157_spill] sm:$0xff] %v7936_v26  ;;  %v7962_v26 = vpack.c.bf16 %v1884_v52, %v1883_v44  ;;  %v5931_v44 = vld [vmem:[%s9251_s3 + $0x20] sm:$0xff] }
 0x30d   : > { %v1800_v58 = vadd.f32 %v7470_v6, %v1764_v50 }
 0x30e   : > { %5672 = vmatmul.msk.bf16.gmra.mxu0 %vm570_vm0, %v7939_v5  ;;  %v9746_v5 = vld [vmem:[#allocation149_spill] sm:$0xff] }
 0x30f   : > { %v1832_v12 = vmax.f32 %v1800_v58, 0.0  ;;  %v7949_v0 = vpop.f32.mrf.mxu2  ;;  %v2766_v58 = vmul.f32 %v7941_v9, %v9745_v62  ;;  %v2765_v39 = vmul.f32 %v7951_v55, %v9746_v5 }
 0x310   : > { %v1456_v1 = vpop.f32.mrf.mxu3 }
 0x311   : > { %1865 = vst.msk [vmem:[%s7482_s23 + $0xc0] sm:$0xff] %vm1840_vm1, %v1832_v12  ;;  %v1499_v50 = vadd.f32 %v1456_v1, %v1255_v43  ;;  %v2782_v41 = vpack.c.bf16 %v2766_v58, %v2765_v39  ;;  %v9747_v1 = vld [vmem:[#allocation181_spill] sm:$0xff] }
 0x312   : > { %v1258_v63 = vadd.f32 %v7756_v32, %v9747_v1 }
 0x313   : > { %v1765_v40 = vadd.f32 %v7547_v17, %v1499_v50  ;;  %v7966_v12 = vpop.f32.mrf.mxu1  ;;  %v7982_v15 = vpop.f32.mrf.mxu0 }
 0x314   : > { %5473 = vmatmul.msk.bf16.gmra.mxu2 %vm570_vm0, %v2160_v18  ;;  %v5932_v18 = vld [vmem:[%s9251_s3 + $0x28] sm:$0xff] }
 0x315   : > { %v1801_v43 = vadd.f32 %v7470_v6, %v1765_v40  ;;  %5492 = vmatmul.msk.bf16.gmra.mxu3 %vm570_vm0, %v7962_v26  ;;  %4662 = vmatpush.bf16.msra.mxu0 %v5932_v18  ;;  %v9748_v40 = vld [vmem:[#allocation184_spill] sm:$0xff]  ;;  %v1885_v18 = vld [vmem:[#allocation2 + $0x80] sm:$0xff] }
 0x316   : > { %5558 = vmatmul.msk.bf16.gmra.mxu1 %vm570_vm0, %v2782_v41  ;;  %v2141_v41 = vmul.f32 %v7809_v49, %v9697_v53 }
 0x317   : > { %v1833_v17 = vmax.f32 %v1801_v43, 0.0  ;;  %v7975_v52 = vpop.f32.mrf.mxu2 }
 0x318   : > { %v1459_v3 = vpop.f32.mrf.mxu3 }
 0x319   : > { %1866 = vst.msk [vmem:[%s7482_s23 + $0xc8] sm:$0xff] %vm1840_vm1, %v1833_v17  ;;  %v1500_v50 = vadd.f32 %v1459_v3, %v1258_v63  ;;  %v1260_v63 = vadd.f32 %v7772_v59, %v9748_v40  ;;  %v1886_v17 = vld [vmem:[#allocation2 + $0x88] sm:$0xff]  ;;  %4663 = vmatpush.bf16.msra.mxu0 %v5931_v44  ;;  %v9749_v44 = vld [vmem:[#allocation187_spill] sm:$0xff] }
 0x31b   : > { %v1766_v39 = vadd.f32 %v7563_v20, %v1500_v50  ;;  %v7985_v32 = vpop.f32.mrf.mxu1  ;;  %v2140_v50 = vmul.f32 %v7817_v42, %v9699_v34  ;;  %v8008_v49 = vpop.f32.mrf.mxu0  ;;  %v1263_v42 = vadd.f32 %v7799_v21, %v9749_v44  ;;  %v5919_v21 = vld [vmem:[%s9251_s3 + $0x90] sm:$0xff] }
 0x31c   : > { %3424 = vmatpush.bf16.msrb.mxu3 %v5919_v21 }
 0x31d   : > { %v1802_v58 = vadd.f32 %v7470_v6, %v1766_v39  ;;  %v2161_v39 = vpack.c.bf16 %v2141_v41, %v2140_v50  ;;  %v3537_v50 = vld [vmem:[#allocation2 + $0x128] sm:$0xff] }
 0x31e   : > { %5673 = vmatmul.msk.bf16.gmra.mxu0 %vm570_vm0, %v7528_v29  ;;  %v8004_v29 = vpack.c.bf16 %v1886_v17, %v1885_v18 }
 0x31f   : > { %v1834_v43 = vmax.f32 %v1802_v58, 0.0  ;;  %v7997_v1 = vpop.f32.mrf.mxu2 }
 0x320   : > { %v1461_v20 = vpop.f32.mrf.mxu3 }
 0x321   : > { %1867 = vst.msk [vmem:[%s7482_s23 + $0xd0] sm:$0xff] %vm1840_vm1, %v1834_v43  ;;  %v1501_v3 = vadd.f32 %v1461_v20, %v1260_v63  ;;  %v9750_v43 = vld [vmem:[#allocation33_spill] sm:$0xff] }
 0x323   : > { %v1767_v59 = vadd.f32 %v7580_v38, %v1501_v3  ;;  %v8006_v58 = vpop.f32.mrf.mxu1  ;;  %v9751_v38 = vld [vmem:[#allocation34_spill] sm:$0xff]  ;;  %v3536_v3 = vld [vmem:[#allocation2 + $0x120] sm:$0xff] }
 0x324   : > { %5474 = vmatmul.msk.bf16.gmra.mxu2 %vm570_vm0, %v2161_v39  ;;  %v9752_v41 = vpack.c.bf16 %v9750_v43, %v9751_v38  ;;  %v8036_v38 = vpop.f32.mrf.mxu0 }
 0x325   : > { %v1803_v40 = vadd.f32 %v7470_v6, %v1767_v59  ;;  %5493 = vmatmul.msk.bf16.gmra.mxu3 %vm570_vm0, %v8004_v29  ;;  %v5921_v59 = vld [vmem:[%s9251_s3 + $0xb0] sm:$0xff]  ;;  %9754 = vst [vmem:[#allocation159_spill] sm:$0xff] %v8036_v38 }
 0x326   : > { %5687 = vmatmul.msk.bf16.vlgmr.msrb.gmra.mxu1 %vm570_vm0, %v9752_v41  ;;  %3275 = vmatpush.bf16.msrb.mxu2 %v5921_v59  ;;  %v5966_v59 = vld [vmem:[#allocation2 + $0x47] sm:$0xff] }
 0x327   : > { %v1835_v63 = vmax.f32 %v1803_v40, 0.0  ;;  %v8020_v17 = vpop.f32.mrf.mxu2  ;;  %v3553_v40 = vpack.c.bf16 %v3537_v50, %v3536_v3  ;;  %v1888_v3 = vld [vmem:[#allocation2 + $0x98] sm:$0xff] }
 0x328   : > { %v1464_v20 = vpop.f32.mrf.mxu3 }
 0x329   : > { %1868 = vst.msk [vmem:[%s7482_s23 + $0xd8] sm:$0xff] %vm1840_vm1, %v1835_v63  ;;  %v1502_v18 = vadd.f32 %v1464_v20, %v1263_v42  ;;  %v9753_v63 = vld [vmem:[#allocation190_spill] sm:$0xff]  ;;  %v2143_v20 = vmul.f32 %v7852_v7, %v9709_v10  ;;  %v9756_v10 = vld [vmem:[#allocation3_spill] sm:$0xff] }
 0x32a   : > { %v1265_v42 = vadd.f32 %v7815_v24, %v9753_v63  ;;  %v9755_v24 = vld [vmem:[#allocation4_spill] sm:$0xff]  ;;  %v5967_v7 = vld [vmem:[#allocation2 + $0x3f] sm:$0xff] }
 0x32b   : > { %v1768_v39 = vadd.f32 %v7596_v19, %v1502_v18  ;;  %v8031_v44 = vpop.f32.mrf.mxu1  ;;  %v2142_v18 = vmul.f32 %v7860_v25, %v9711_v22  ;;  %v3775_v21 = vmul.f32 %v5966_v59, %v9755_v24  ;;  %v3774_v53 = vmul.f32 %v5967_v7, %v9756_v10 }
 0x32d   : > { %v1804_v43 = vadd.f32 %v7470_v6, %v1768_v39  ;;  %v1887_v39 = vld [vmem:[#allocation2 + $0x90] sm:$0xff]  ;;  %v3805_v25 = vpack.c.bf16 %v3775_v21, %v3774_v53  ;;  %v9758_v21 = vld [vmem:[#allocation196_spill] sm:$0xff] }
 0x32e   : > { %5674 = vmatmul.msk.bf16.gmra.mxu0 %vm570_vm0, %v3553_v40  ;;  %v2162_v40 = vpack.c.bf16 %v2143_v20, %v2142_v18  ;;  %v8049_v63 = vpack.c.bf16 %v1888_v3, %v1887_v39 }
 0x32f   : > { %v1836_v41 = vmax.f32 %v1804_v43, 0.0  ;;  %v8041_v19 = vpop.f32.mrf.mxu2 }
 0x330   : > { %v1466_v34 = vpop.f32.mrf.mxu3 }
 0x331   : > { %1869 = vst.msk [vmem:[%s7482_s23 + $0xe0] sm:$0xff] %vm1840_vm1, %v1836_v41  ;;  %v1503_v50 = vadd.f32 %v1466_v34, %v1265_v42  ;;  %v9757_v42 = vld [vmem:[#allocation193_spill] sm:$0xff] }
 0x333   : > { %v1769_v43 = vadd.f32 %v7615_v47, %v1503_v50  ;;  %v8052_v38 = vpop.f32.mrf.mxu1  ;;  %v1268_v47 = vadd.f32 %v7842_v45, %v9757_v42  ;;  %v8063_v50 = vpop.f32.mrf.mxu0  ;;  %v1270_v45 = vadd.f32 %v7858_v57, %v9758_v21  ;;  %v2144_v42 = vmul.f32 %v7903_v23, %v9724_v2  ;;  %v9760_v21 = vld [vmem:[#allocation16_spill] sm:$0xff] }
 0x334   : > { %5475 = vmatmul.msk.bf16.gmra.mxu2 %vm570_vm0, %v2162_v40  ;;  %v2145_v40 = vmul.f32 %v7895_v8, %v9722_v46 }
 0x335   : > { %v1805_v34 = vadd.f32 %v7470_v6, %v1769_v43  ;;  %5494 = vmatmul.msk.bf16.gmra.mxu3 %vm570_vm0, %v8049_v63 }
 0x336   : > { %5688 = vmatmul.msk.bf16.gmra.mxu1 %vm570_vm0, %v3805_v25  ;;  %v1890_v25 = vld [vmem:[#allocation2 + $0xa8] sm:$0xff]  ;;  %v2163_v8 = vpack.c.bf16 %v2145_v40, %v2144_v42 }
 0x337   : > { %v1837_v41 = vmax.f32 %v1805_v34, 0.0  ;;  %v8061_v3 = vpop.f32.mrf.mxu2 }
 0x338   : > { %v1469_v20 = vpop.f32.mrf.mxu3 }
 0x339   : > { %1870 = vst.msk [vmem:[%s7482_s23 + $0xe8] sm:$0xff] %vm1840_vm1, %v1837_v41  ;;  %v1504_v18 = vadd.f32 %v1469_v20, %v1268_v47  ;;  %v5968_v47 = vld [vmem:[#allocation2 + $0x57] sm:$0xff]  ;;  %v9759_v41 = vld [vmem:[#allocation8_spill] sm:$0xff]  ;;  %v1889_v20 = vld [vmem:[#allocation2 + $0xa0] sm:$0xff] }
 0x33a   : > { %v3777_v57 = vmul.f32 %v5968_v47, %v9759_v41 }
 0x33b   : > { %v1770_v59 = vadd.f32 %v7631_v27, %v1504_v18  ;;  %v8068_v39 = vpop.f32.mrf.mxu1  ;;  %v8084_v18 = vpop.f32.mrf.mxu0 }
 0x33d   : > { %v1806_v53 = vadd.f32 %v7470_v6, %v1770_v59  ;;  %v8087_v59 = vpack.c.bf16 %v1890_v25, %v1889_v20 }
 0x33e   : > { %5803 = vmatmul.msk.bf16.vlgmr.msra.gmra.mxu0 %vm570_vm0, %v7781_v13 }
 0x33f   : > { %v1838_v43 = vmax.f32 %v1806_v53, 0.0  ;;  %v8077_v34 = vpop.f32.mrf.mxu2  ;;  %v5969_v53 = vld [vmem:[#allocation2 + $0x4f] sm:$0xff] }
 0x340   : > { %v1471_v7 = vpop.f32.mrf.mxu3  ;;  %v3776_v46 = vmul.f32 %v5969_v53, %v9760_v21 }
 0x341   : > { %1871 = vst.msk [vmem:[%s7482_s23 + $0xf0] sm:$0xff] %vm1840_vm1, %v1838_v43  ;;  %v1505_v27 = vadd.f32 %v1471_v7, %v1270_v45 }
 0x342   : > { %v3806_v23 = vpack.c.bf16 %v3777_v57, %v3776_v46 }
 0x343   : > { %v1771_v13 = vadd.f32 %v7648_v56, %v1505_v27  ;;  %v8090_v43 = vpop.f32.mrf.mxu1  ;;  %v9761_v27 = vld [vmem:[#allocation154_spill] sm:$0xff]  ;;  %v8110_v46 = vpop.f32.mrf.mxu0 }
 0x344   : > { %5476 = vmatmul.msk.bf16.gmra.mxu2 %vm570_vm0, %v2163_v8  ;;  %v1892_v8 = vld [vmem:[#allocation2 + $0xb8] sm:$0xff] }
 0x345   : > { %v1807_v45 = vadd.f32 %v7470_v6, %v1771_v13  ;;  %5495 = vmatmul.msk.bf16.gmra.mxu3 %vm570_vm0, %v8087_v59  ;;  %v8106_v6 = vld [vmem:[%s9252_s4] ss:$0 sm:$0xff] }
 0x346   : > { %5689 = vmatmul.msk.bf16.gmra.mxu1 %vm570_vm0, %v3806_v23  ;;  %v5970_v23 = vld [vmem:[#allocation2 + $0x67] sm:$0xff] }
 0x347   : > { %v1839_v7 = vmax.f32 %v1807_v45, 0.0  ;;  %v8097_v56 = vpop.f32.mrf.mxu2  ;;  %v2146_v45 = vmul.f32 %v7951_v55, %v9735_v37  ;;  %v9780_v37 = vld [vmem:[#allocation7_spill] sm:$0xff] }
 0x348   : > { %v2389_v40 = vpop.f32.mrf.mxu3 }
 0x349   : > { %1872 = vst.msk [vmem:[%s7482_s23 + $0xf8] sm:$0xff] %vm1840_vm1, %v1839_v7  ;;  %v2390_v25 = vadd.f32 %v2389_v40, %v7885_v30  ;;  %v2147_v30 = vmul.f32 %v7941_v9, %v9734_v51  ;;  %v1891_v40 = vld [vmem:[#allocation2 + $0xb0] sm:$0xff] }
 0x34a   : > { %v8127_v9 = vpack.c.bf16 %v1892_v8, %v1891_v40  ;;  %v1956_v40 = vld [vmem:[#allocation2 + $0x111] sm:$0xff] }
 0x34b   : > { %v2671_v42 = vadd.f32 %v9761_v27, %v2390_v25  ;;  %v8108_v47 = vpop.f32.mrf.mxu1  ;;  %v2164_v27 = vpack.c.bf16 %v2147_v30, %v2146_v45 }
 0x34d   : > { %v2937_v41 = vadd.f32 %v7664_v14, %v2671_v42  ;;  %v9762_v14 = vld [vmem:[#allocation14_spill] sm:$0xff] }
 0x34e   : > { %5804 = vmatmul.msk.bf16.gmra.mxu0 %vm570_vm0, %v7824_v11  ;;  %v3779_v7 = vmul.f32 %v5970_v23, %v9762_v14  ;;  %v9763_v11 = vld [vmem:[#allocation156_spill] sm:$0xff]  ;;  %v5971_v42 = vld [vmem:[#allocation2 + $0x5f] sm:$0xff] }
 0x34f   : > { %v2973_v57 = vadd.f32 %v8106_v6, %v2937_v41  ;;  %v8118_v20 = vpop.f32.mrf.mxu2  ;;  %v9764_v41 = vld [vmem:[#allocation22_spill] sm:$0xff] }
 0x350   : > { %v2391_v13 = vpop.f32.mrf.mxu3 }
 0x351   : > { %v3005_v53 = vmax.f32 %v2973_v57, 0.0  ;;  %v2392_v21 = vadd.f32 %v2391_v13, %v7901_v60  ;;  %v3778_v57 = vmul.f32 %v5971_v42, %v9764_v41  ;;  %v8136_v13 = vpop.f32.mrf.mxu0 }
 0x353   : > { %5559 = vst.msk [vmem:[%s7482_s23 + $0x100] sm:$0xff] %vm1840_vm1, %v3005_v53  ;;  %v2672_v25 = vadd.f32 %v9763_v11, %v2392_v21  ;;  %v8130_v51 = vpop.f32.mrf.mxu1  ;;  %v3807_v55 = vpack.c.bf16 %v3779_v7, %v3778_v57  ;;  %v1957_v7 = vld [vmem:[#allocation2 + $0x119] sm:$0xff]  ;;  %v1894_v57 = vld [vmem:[#allocation2 + $0xc8] sm:$0xff] }
 0x354   : > { %5477 = vmatmul.msk.bf16.gmra.mxu2 %vm570_vm0, %v2164_v27  ;;  %v2148_v27 = vmul.f32 %v9746_v5, %v1956_v40 }
 0x355   : > { %v2938_v60 = vadd.f32 %v7689_v31, %v2672_v25  ;;  %5496 = vmatmul.msk.bf16.gmra.mxu3 %vm570_vm0, %v8127_v9  ;;  %v9765_v31 = vld [vmem:[#allocation158_spill] sm:$0xff] }
 0x356   : > { %5690 = vmatmul.msk.bf16.gmra.mxu1 %vm570_vm0, %v3807_v55 }
 0x357   : > { %v2974_v30 = vadd.f32 %v8106_v6, %v2938_v60  ;;  %v8140_v8 = vpop.f32.mrf.mxu2 }
 0x358   : > { %v2394_v53 = vpop.f32.mrf.mxu3 }
 0x359   : > { %v3006_v21 = vmax.f32 %v2974_v30, 0.0  ;;  %v2395_v45 = vadd.f32 %v2394_v53, %v7931_v33  ;;  %v2149_v33 = vmul.f32 %v9745_v62, %v1957_v7  ;;  %v8156_v60 = vpop.f32.mrf.mxu0  ;;  %v5972_v53 = vld [vmem:[#allocation2 + $0x77] sm:$0xff]  ;;  %v5973_v7 = vld [vmem:[#allocation2 + $0x6f] sm:$0xff] }
 0x35b   : > { %5560 = vst.msk [vmem:[%s7482_s23 + $0x108] sm:$0xff] %vm1840_vm1, %v3006_v21  ;;  %v2673_v23 = vadd.f32 %v9765_v31, %v2395_v45  ;;  %v8146_v14 = vpop.f32.mrf.mxu1  ;;  %v1893_v45 = vld [vmem:[#allocation2 + $0xc0] sm:$0xff] }
 0x35c   : > { %v8163_v40 = vpack.c.bf16 %v1894_v57, %v1893_v45 }
 0x35d   : > { %v2939_v11 = vadd.f32 %v7708_v61, %v2673_v23  ;;  %v9766_v61 = vld [vmem:[#allocation20_spill] sm:$0xff]  ;;  %v2165_v23 = vpack.c.bf16 %v2149_v33, %v2148_v27 }
 0x35e   : > { %5805 = vmatmul.msk.bf16.gmra.mxu0 %vm570_vm0, %v7867_v35  ;;  %v3781_v21 = vmul.f32 %v5972_v53, %v9766_v61  ;;  %v9767_v35 = vld [vmem:[#allocation160_spill] sm:$0xff] }
 0x35f   : > { %v2975_v25 = vadd.f32 %v8106_v6, %v2939_v11  ;;  %v8154_v42 = vpop.f32.mrf.mxu2  ;;  %v9768_v11 = vld [vmem:[#allocation28_spill] sm:$0xff] }
 0x360   : > { %v2396_v41 = vpop.f32.mrf.mxu3  ;;  %v3780_v62 = vmul.f32 %v5973_v7, %v9768_v11  ;;  %v5974_v7 = vld [vmem:[#allocation2 + $0x87] sm:$0xff]  ;;  %v9771_v11 = vld [vmem:[#allocation26_spill] sm:$0xff] }
 0x361   : > { %v3007_v55 = vmax.f32 %v2975_v25, 0.0  ;;  %v2397_v30 = vadd.f32 %v2396_v41, %v7949_v0 }
 0x362   : > { %v3808_v0 = vpack.c.bf16 %v3781_v21, %v3780_v62 }
 0x363   : > { %5561 = vst.msk [vmem:[%s7482_s23 + $0x110] sm:$0xff] %vm1840_vm1, %v3007_v55  ;;  %v2674_v31 = vadd.f32 %v9767_v35, %v2397_v30  ;;  %v8166_v5 = vpop.f32.mrf.mxu1  ;;  %v8177_v30 = vpop.f32.mrf.mxu0 }
 0x364   : > { %5478 = vmatmul.msk.bf16.gmra.mxu2 %vm570_vm0, %v2165_v23  ;;  %9769 = vst [vmem:[#allocation188_spill] sm:$0xff] %v8177_v30 }
 0x365   : > { %v2940_v25 = vadd.f32 %v7727_v28, %v2674_v31  ;;  %5497 = vmatmul.msk.bf16.gmra.mxu3 %vm570_vm0, %v8163_v40  ;;  %v9770_v28 = vld [vmem:[#allocation162_spill] sm:$0xff] }
 0x366   : > { %5691 = vmatmul.msk.bf16.gmra.mxu1 %vm570_vm0, %v3808_v0  ;;  %v1895_v0 = vld [vmem:[#allocation2 + $0xd0] sm:$0xff] }
 0x367   : > { %v2976_v41 = vadd.f32 %v8106_v6, %v2940_v25  ;;  %v8174_v27 = vpop.f32.mrf.mxu2  ;;  %v3783_v25 = vmul.f32 %v5974_v7, %v9771_v11 }
 0x368   : > { %v2399_v33 = vpop.f32.mrf.mxu3 }
 0x369   : > { %v3008_v57 = vmax.f32 %v2976_v41, 0.0  ;;  %v2400_v55 = vadd.f32 %v2399_v33, %v7975_v52  ;;  %v1896_v52 = vld [vmem:[#allocation2 + $0xd8] sm:$0xff]  ;;  %v9772_v41 = vld [vmem:[#allocation164_spill] sm:$0xff] }
 0x36a   : > { %v8195_v33 = vpack.c.bf16 %v1896_v52, %v1895_v0 }
 0x36b   : > { %5562 = vst.msk [vmem:[%s7482_s23 + $0x118] sm:$0xff] %vm1840_vm1, %v3008_v57  ;;  %v2675_v53 = vadd.f32 %v9770_v28, %v2400_v55  ;;  %v8182_v61 = vpop.f32.mrf.mxu1  ;;  %v5975_v57 = vld [vmem:[#allocation2 + $0x7f] sm:$0xff] }
 0x36d   : > { %v2941_v62 = vadd.f32 %v7743_v54, %v2675_v53  ;;  %v8200_v53 = vpop.f32.mrf.mxu0 }
 0x36e   : > { %5806 = vmatmul.msk.bf16.gmra.mxu0 %vm570_vm0, %v7910_v36  ;;  %v9773_v36 = vld [vmem:[#allocation32_spill] sm:$0xff]  ;;  %9774 = vst [vmem:[#allocation81_spill] sm:$0xff] %v8200_v53 }
 0x36f   : > { %v2977_v21 = vadd.f32 %v8106_v6, %v2941_v62  ;;  %v8188_v45 = vpop.f32.mrf.mxu2  ;;  %v3782_v55 = vmul.f32 %v5975_v57, %v9773_v36  ;;  %v9775_v62 = vld [vmem:[#allocation36_spill] sm:$0xff] }
 0x370   : > { %v2401_v35 = vpop.f32.mrf.mxu3 }
 0x371   : > { %v3009_v31 = vmax.f32 %v2977_v21, 0.0  ;;  %v2402_v23 = vadd.f32 %v2401_v35, %v7997_v1  ;;  %v3809_v21 = vpack.c.bf16 %v3783_v25, %v3782_v55 }
 0x373   : > { %5563 = vst.msk [vmem:[%s7482_s23 + $0x120] sm:$0xff] %vm1840_vm1, %v3009_v31  ;;  %v2676_v54 = vadd.f32 %v9772_v41, %v2402_v23  ;;  %v8198_v28 = vpop.f32.mrf.mxu1  ;;  %v3126_v41 = vld [vmem:[#allocation2 + $0x37] sm:$0xff] }
 0x374   : > { %5607 = vmatmul.msk.bf16.vlgmr.msrb.gmra.mxu2 %vm570_vm0, %v9775_v62  ;;  %v1898_v62 = vld [vmem:[#allocation2 + $0xe8] sm:$0xff] }
 0x375   : > { %v2942_v1 = vadd.f32 %v7761_v16, %v2676_v54  ;;  %5498 = vmatmul.msk.bf16.gmra.mxu3 %vm570_vm0, %v8195_v33  ;;  %v9776_v16 = vld [vmem:[#allocation166_spill] sm:$0xff]  ;;  %v3125_v54 = vld [vmem:[#allocation2 + $0x2f] sm:$0xff]  ;;  %v8218_v57 = vpop.f32.mrf.mxu0 }
 0x376   : > { %5692 = vmatmul.msk.bf16.gmra.mxu1 %vm570_vm0, %v3809_v21  ;;  %9777 = vst [vmem:[#allocation80_spill] sm:$0xff] %v8218_v57 }
 0x377   : > { %v2978_v35 = vadd.f32 %v8106_v6, %v2942_v1  ;;  %v8209_v52 = vpop.f32.mrf.mxu2 }
 0x378   : > { %v2404_v31 = vpop.f32.mrf.mxu3 }
 0x379   : > { %v3010_v23 = vmax.f32 %v2978_v35, 0.0  ;;  %v2405_v7 = vadd.f32 %v2404_v31, %v8020_v17  ;;  %v3158_v17 = vmul.f32 %v3126_v41, %v9755_v24  ;;  %v3157_v31 = vmul.f32 %v3125_v54, %v9756_v10  ;;  %v5977_v41 = vld [vmem:[#allocation2 + $0x8f] sm:$0xff] }
 0x37a   : > { %v3784_v2 = vmul.f32 %v5977_v41, %v9780_v37 }
 0x37b   : > { %5564 = vst.msk [vmem:[%s7482_s23 + $0x128] sm:$0xff] %vm1840_vm1, %v3010_v23  ;;  %v2677_v11 = vadd.f32 %v9776_v16, %v2405_v7  ;;  %v8215_v0 = vpop.f32.mrf.mxu1  ;;  %v9778_v23 = vld [vmem:[#allocation10_spill] sm:$0xff]  ;;  %v1897_v16 = vld [vmem:[#allocation2 + $0xe0] sm:$0xff]  ;;  %v3188_v24 = vpack.c.bf16 %v3158_v17, %v3157_v31 }
 0x37c   : > { %v9783_v31 = vld [vmem:[#allocation171_spill] sm:$0xff] }
 0x37d   : > { %v2943_v25 = vadd.f32 %v7785_v48, %v2677_v11  ;;  %v5976_v48 = vld [vmem:[#allocation2 + $0x97] sm:$0xff]  ;;  %v9779_v11 = vld [vmem:[#allocation168_spill] sm:$0xff] }
 0x37e   : > { %5807 = vmatmul.msk.bf16.gmra.mxu0 %vm570_vm0, %v7962_v26  ;;  %v3785_v7 = vmul.f32 %v5976_v48, %v9778_v23  ;;  %v8232_v26 = vpack.c.bf16 %v1898_v62, %v1897_v16 }
 0x37f   : > { %v2979_v36 = vadd.f32 %v8106_v6, %v2943_v25  ;;  %v8224_v55 = vpop.f32.mrf.mxu2 }
 0x380   : > { %v2406_v1 = vpop.f32.mrf.mxu3  ;;  %v3810_v10 = vpack.c.bf16 %v3785_v7, %v3784_v2  ;;  %v9784_v2 = vld [vmem:[#allocation105_spill] sm:$0xff] }
 0x381   : > { %v3011_v21 = vmax.f32 %v2979_v36, 0.0  ;;  %v2407_v35 = vadd.f32 %v2406_v1, %v8041_v19  ;;  %v9781_v19 = vld [vmem:[#allocation146_spill] sm:$0xff] }
 0x383   : > { %5565 = vst.msk [vmem:[%s7482_s23 + $0x130] sm:$0xff] %vm1840_vm1, %v3011_v21  ;;  %v2678_v25 = vadd.f32 %v9779_v11, %v2407_v35  ;;  %v8235_v36 = vpop.f32.mrf.mxu1  ;;  %v8245_v21 = vpop.f32.mrf.mxu0 }
 0x384   : > { %5608 = vmatmul.msk.bf16.gmra.mxu2 %vm570_vm0, %v3188_v24  ;;  %9782 = vst [vmem:[#allocation161_spill] sm:$0xff] %v8245_v21  ;;  %v1900_v24 = vld [vmem:[#allocation2 + $0xf8] sm:$0xff]  ;;  %v9800_v21 = vld [vmem:[#allocation185_spill] sm:$0xff] }
 0x385   : > { %v2944_v1 = vadd.f32 %v9781_v19, %v2678_v25  ;;  %5499 = vmatmul.msk.bf16.gmra.mxu3 %vm570_vm0, %v8232_v26  ;;  %v5978_v19 = vld [vmem:[#allocation2 + $0xa7] sm:$0xff] }
 0x386   : > { %5693 = vmatmul.msk.bf16.gmra.mxu1 %vm570_vm0, %v3810_v10 }
 0x387   : > { %v2980_v54 = vadd.f32 %v8106_v6, %v2944_v1  ;;  %v8243_v62 = vpop.f32.mrf.mxu2  ;;  %v9785_v1 = vld [vmem:[#allocation12_spill] sm:$0xff] }
 0x388   : > { %v2409_v17 = vpop.f32.mrf.mxu3  ;;  %v3787_v10 = vmul.f32 %v5978_v19, %v9785_v1  ;;  %v9791_v19 = vld [vmem:[#allocation44_spill] sm:$0xff] }
 0x389   : > { %v3012_v37 = vmax.f32 %v2980_v54, 0.0  ;;  %v2410_v35 = vadd.f32 %v2409_v17, %v8061_v3  ;;  %v1899_v54 = vld [vmem:[#allocation2 + $0xf0] sm:$0xff] }
 0x38b   : > { %5566 = vst.msk [vmem:[%s7482_s23 + $0x138] sm:$0xff] %vm1840_vm1, %v3012_v37  ;;  %v2679_v48 = vadd.f32 %v9783_v31, %v2410_v35  ;;  %v8251_v23 = vpop.f32.mrf.mxu1  ;;  %v8261_v17 = vpop.f32.mrf.mxu0  ;;  %v9787_v37 = vld [vmem:[#allocation174_spill] sm:$0xff]  ;;  %v8266_v31 = vpack.c.bf16 %v1900_v24, %v1899_v54 }
 0x38c   : > { %9786 = vst [vmem:[#allocation191_spill] sm:$0xff] %v8261_v17 }
 0x38d   : > { %v2945_v7 = vadd.f32 %v9784_v2, %v2679_v48  ;;  %v9788_v48 = vld [vmem:[#allocation13_spill] sm:$0xff] }
 0x38e   : > { %5808 = vmatmul.msk.bf16.gmra.mxu0 %vm570_vm0, %v8004_v29  ;;  %v5979_v29 = vld [vmem:[#allocation2 + $0x9f] sm:$0xff] }
 0x38f   : > { %v2981_v16 = vadd.f32 %v8106_v6, %v2945_v7  ;;  %v8257_v11 = vpop.f32.mrf.mxu2  ;;  %v3786_v2 = vmul.f32 %v5979_v29, %v9788_v48  ;;  %v9793_v29 = vld [vmem:[#allocation177_spill] sm:$0xff] }
 0x390   : > { %v2411_v25 = vpop.f32.mrf.mxu3 }
 0x391   : > { %v3013_v41 = vmax.f32 %v2981_v16, 0.0  ;;  %v2412_v3 = vadd.f32 %v2411_v25, %v8077_v34  ;;  %v9789_v16 = vld [vmem:[#allocation65_spill] sm:$0xff] }
 0x392   : > { %v9790_v25 = vld [vmem:[#allocation45_spill] sm:$0xff] }
 0x393   : > { %5567 = vst.msk [vmem:[%s7482_s23 + $0x140] sm:$0xff] %vm1840_vm1, %v3013_v41  ;;  %v2680_v35 = vadd.f32 %v9787_v37, %v2412_v3  ;;  %v8269_v7 = vpop.f32.mrf.mxu1  ;;  %v9792_v1 = vpack.c.bf16 %v9790_v25, %v9791_v19  ;;  %v3811_v41 = vpack.c.bf16 %v3787_v10, %v3786_v2  ;;  %v8288_v25 = vpop.f32.mrf.mxu0  ;;  %v9795_v10 = vld [vmem:[#allocation153_spill] sm:$0xff] }
 0x394   : > { %9794 = vst [vmem:[#allocation163_spill] sm:$0xff] %v8288_v25 }
 0x395   : > { %v2946_v34 = vadd.f32 %v9789_v16, %v2680_v35  ;;  %5500 = vmatmul.msk.bf16.gmra.mxu3 %vm570_vm0, %v8266_v31  ;;  %5609 = vmatmul.msk.bf16.gmra.mxu2 %vm570_vm0, %v9792_v1 }
 0x396   : > { %5694 = vmatmul.msk.bf16.gmra.mxu1 %vm570_vm0, %v3811_v41 }
 0x397   : > { %v2982_v3 = vadd.f32 %v8106_v6, %v2946_v34  ;;  %v8280_v24 = vpop.f32.mrf.mxu2 }
 0x398   : > { %v2414_v54 = vpop.f32.mrf.mxu3 }
 0x399   : > { %v3014_v37 = vmax.f32 %v2982_v3, 0.0  ;;  %v2415_v35 = vadd.f32 %v2414_v54, %v8097_v56  ;;  %v5980_v3 = vld [vmem:[#allocation2 + $0xb7] sm:$0xff]  ;;  %v9796_v54 = vld [vmem:[#allocation19_spill] sm:$0xff] }
 0x39b   : > { %5568 = vst.msk [vmem:[%s7482_s23 + $0x148] sm:$0xff] %vm1840_vm1, %v3014_v37  ;;  %v2681_v48 = vadd.f32 %v9793_v29, %v2415_v35  ;;  %v8286_v16 = vpop.f32.mrf.mxu1  ;;  %v3789_v37 = vmul.f32 %v5980_v3, %v9796_v54  ;;  %v9797_v35 = vld [vmem:[#allocation180_spill] sm:$0xff] }
 0x39d   : > { %v2947_v2 = vadd.f32 %v9795_v10, %v2681_v48  ;;  %v5981_v48 = vld [vmem:[#allocation2 + $0xaf] sm:$0xff]  ;;  %v9798_v10 = vld [vmem:[#allocation18_spill] sm:$0xff] }
 0x39e   : > { %5809 = vmatmul.msk.bf16.gmra.mxu0 %vm570_vm0, %v8049_v63  ;;  %v9799_v63 = vld [vmem:[#allocation155_spill] sm:$0xff] }
 0x39f   : > { %v2983_v34 = vadd.f32 %v8106_v6, %v2947_v2  ;;  %v8294_v19 = vpop.f32.mrf.mxu2  ;;  %v3788_v2 = vmul.f32 %v5981_v48, %v9798_v10 }
 0x3a0   : > { %v2416_v1 = vpop.f32.mrf.mxu3 }
 0x3a1   : > { %v3015_v41 = vmax.f32 %v2983_v34, 0.0  ;;  %v2417_v56 = vadd.f32 %v2416_v1, %v8118_v20  ;;  %v9801_v34 = vld [vmem:[#allocation50_spill] sm:$0xff]  ;;  %v9802_v20 = vld [vmem:[#allocation49_spill] sm:$0xff]  ;;  %v3812_v3 = vpack.c.bf16 %v3789_v37, %v3788_v2  ;;  %v5930_v37 = vld [vmem:[%s9251_s3 + $0x88] sm:$0xff] }
 0x3a2   : > { %v9803_v1 = vpack.c.bf16 %v9801_v34, %v9802_v20  ;;  %4311 = vmatpush.bf16.msra.mxu2 %v5930_v37  ;;  %v9809_v37 = vld [vmem:[#allocation186_spill] sm:$0xff] }
 0x3a3   : > { %5569 = vst.msk [vmem:[%s7482_s23 + $0x150] sm:$0xff] %vm1840_vm1, %v3015_v41  ;;  %v2682_v29 = vadd.f32 %v9797_v35, %v2417_v56  ;;  %v8302_v25 = vpop.f32.mrf.mxu1  ;;  %v8311_v41 = vpop.f32.mrf.mxu0 }
 0x3a4   : > { %9804 = vst [vmem:[#allocation194_spill] sm:$0xff] %v8311_v41 }
 0x3a5   : > { %v2948_v17 = vadd.f32 %v9799_v63, %v2682_v29  ;;  %5501 = vmatmul.msk.bf16.gmra.mxu3 %vm570_vm0, %v9800_v21  ;;  %5610 = vmatmul.msk.bf16.gmra.mxu2 %vm570_vm0, %v9803_v1  ;;  %v9805_v21 = vld [vmem:[#allocation183_spill] sm:$0xff]  ;;  %v9806_v63 = vld [vmem:[#allocation73_spill] sm:$0xff] }
 0x3a6   : > { %5695 = vmatmul.msk.bf16.gmra.mxu1 %vm570_vm0, %v3812_v3  ;;  %v1904_v3 = vld [vmem:[#allocation2 + $0x118] sm:$0xff] }
 0x3a7   : > { %v2984_v56 = vadd.f32 %v8106_v6, %v2948_v17  ;;  %v8315_v54 = vpop.f32.mrf.mxu2  ;;  %v5928_v17 = vld [vmem:[%s9251_s3 + $0xa8] sm:$0xff] }
 0x3a8   : > { %v2419_v35 = vpop.f32.mrf.mxu3  ;;  %4460 = vmatpush.bf16.msra.mxu3 %v5928_v17 }
 0x3a9   : > { %v3016_v48 = vmax.f32 %v2984_v56, 0.0  ;;  %v2420_v29 = vadd.f32 %v2419_v35, %v8140_v8 }
 0x3ab   : > { %5570 = vst.msk [vmem:[%s7482_s23 + $0x158] sm:$0xff] %vm1840_vm1, %v3016_v48  ;;  %v2683_v10 = vadd.f32 %v9805_v21, %v2420_v29  ;;  %v8327_v2 = vpop.f32.mrf.mxu1  ;;  %v8335_v56 = vpop.f32.mrf.mxu0  ;;  %v5982_v29 = vld [vmem:[#allocation2 + $0xc7] sm:$0xff]  ;;  %v9808_v21 = vld [vmem:[#allocation25_spill] sm:$0xff] }
 0x3ac   : > { %9807 = vst [vmem:[#allocation89_spill] sm:$0xff] %v8335_v56  ;;  %v3791_v41 = vmul.f32 %v5982_v29, %v9808_v21  ;;  %v9813_v29 = vld [vmem:[#allocation60_spill] sm:$0xff] }
 0x3ad   : > { %v2949_v34 = vadd.f32 %v9806_v63, %v2683_v10  ;;  %v1903_v10 = vld [vmem:[#allocation2 + $0x110] sm:$0xff] }
 0x3ae   : > { %5810 = vmatmul.msk.bf16.gmra.mxu0 %vm570_vm0, %v8087_v59  ;;  %v8342_v63 = vpack.c.bf16 %v1904_v3, %v1903_v10  ;;  %v5983_v59 = vld [vmem:[#allocation2 + $0xbf] sm:$0xff] }
 0x3af   : > { %v2985_v8 = vadd.f32 %v8106_v6, %v2949_v34  ;;  %v8333_v20 = vpop.f32.mrf.mxu2  ;;  %v9810_v34 = vld [vmem:[#allocation24_spill] sm:$0xff] }
 0x3b0   : > { %v2421_v1 = vpop.f32.mrf.mxu3  ;;  %v3790_v57 = vmul.f32 %v5983_v59, %v9810_v34 }
 0x3b1   : > { %v3017_v35 = vmax.f32 %v2985_v8, 0.0  ;;  %v2422_v48 = vadd.f32 %v2421_v1, %v8154_v42  ;;  %v5934_v8 = vld [vmem:[%s9251_s3 + $0x8] sm:$0xff]  ;;  %v9811_v42 = vld [vmem:[#allocation157_spill] sm:$0xff] }
 0x3b2   : > { %v3813_v3 = vpack.c.bf16 %v3791_v41, %v3790_v57  ;;  %4927 = vmatpush.bf16.msra.mxu1 %v5934_v8 }
 0x3b3   : > { %5571 = vst.msk [vmem:[%s7482_s23 + $0x160] sm:$0xff] %vm1840_vm1, %v3017_v35  ;;  %v2684_v17 = vadd.f32 %v9809_v37, %v2422_v48  ;;  %v8348_v56 = vpop.f32.mrf.mxu1  ;;  %v9812_v35 = vld [vmem:[#allocation61_spill] sm:$0xff]  ;;  %v8362_v34 = vpop.f32.mrf.mxu0 }
 0x3b4   : > { %v9814_v48 = vpack.c.bf16 %v9812_v35, %v9813_v29  ;;  %9815 = vst [vmem:[#allocation88_spill] sm:$0xff] %v8362_v34  ;;  %v9819_v34 = vld [vmem:[#allocation29_spill] sm:$0xff] }
 0x3b5   : > { %v2950_v1 = vadd.f32 %v9811_v42, %v2684_v17  ;;  %5502 = vmatmul.msk.bf16.gmra.mxu3 %vm570_vm0, %v8342_v63  ;;  %v9816_v42 = vld [vmem:[#allocation189_spill] sm:$0xff] }
 0x3b6   : > { %5611 = vmatmul.msk.bf16.gmra.mxu2 %vm570_vm0, %v9814_v48  ;;  %5696 = vmatmul.msk.bf16.gmra.mxu1 %vm570_vm0, %v3813_v3 }
 0x3b7   : > { %v2986_v21 = vadd.f32 %v8106_v6, %v2950_v1  ;;  %v8359_v10 = vpop.f32.mrf.mxu2 }
 0x3b8   : > { %v2424_v37 = vpop.f32.mrf.mxu3 }
 0x3b9   : > { %v3018_v59 = vmax.f32 %v2986_v21, 0.0  ;;  %v2425_v17 = vadd.f32 %v2424_v37, %v8174_v27  ;;  %v3071_v27 = vld [vmem:[#allocation2 + $0x28] sm:$0xff]  ;;  %v5984_v21 = vld [vmem:[#allocation2 + $0xd7] sm:$0xff] }
 0x3ba   : > { %v9817_v37 = vld [vmem:[#allocation30_spill] sm:$0xff] }
 0x3bb   : > { %5572 = vst.msk [vmem:[%s7482_s23 + $0x168] sm:$0xff] %vm1840_vm1, %v3018_v59  ;;  %v2685_v35 = vadd.f32 %v9816_v42, %v2425_v17  ;;  %v8367_v29 = vpop.f32.mrf.mxu1  ;;  %v3793_v59 = vmul.f32 %v5984_v21, %v9817_v37  ;;  %v3070_v17 = vld [vmem:[#allocation2 + $0x20] sm:$0xff]  ;;  %v9818_v42 = vld [vmem:[#allocation192_spill] sm:$0xff]  ;;  %v8383_v22 = vpop.f32.mrf.mxu0 }
 0x3bd   : > { %v2951_v57 = vadd.f32 %v7966_v12, %v2685_v35  ;;  %v3102_v35 = vpack.c.bf16 %v3071_v27, %v3070_v17 }
 0x3be   : > { %5811 = vmatmul.msk.bf16.gmra.mxu0 %vm570_vm0, %v8127_v9 }
 0x3bf   : > { %v2987_v41 = vadd.f32 %v8106_v6, %v2951_v57  ;;  %v8373_v8 = vpop.f32.mrf.mxu2  ;;  %v5985_v57 = vld [vmem:[#allocation2 + $0xcf] sm:$0xff] }
 0x3c0   : > { %v2426_v1 = vpop.f32.mrf.mxu3  ;;  %v3792_v9 = vmul.f32 %v5985_v57, %v9819_v34 }
 0x3c1   : > { %v3019_v48 = vmax.f32 %v2987_v41, 0.0  ;;  %v2427_v3 = vadd.f32 %v2426_v1, %v8188_v45  ;;  %v9820_v45 = vld [vmem:[#allocation70_spill] sm:$0xff]  ;;  %v9821_v1 = vld [vmem:[#allocation69_spill] sm:$0xff] }
 0x3c2   : > { %v9822_v30 = vpack.c.bf16 %v9820_v45, %v9821_v1  ;;  %v5986_v45 = vld [vmem:[#allocation2 + $0xe7] sm:$0xff]  ;;  %v9825_v1 = vld [vmem:[#allocation9_spill] sm:$0xff] }
 0x3c3   : > { %5573 = vst.msk [vmem:[%s7482_s23 + $0x170] sm:$0xff] %vm1840_vm1, %v3019_v48  ;;  %v2686_v12 = vadd.f32 %v9818_v42, %v2427_v3  ;;  %v8381_v53 = vpop.f32.mrf.mxu1  ;;  %v3814_v48 = vpack.c.bf16 %v3793_v59, %v3792_v9  ;;  %v8402_v59 = vpop.f32.mrf.mxu0 }
 0x3c4   : > { %9824 = vst [vmem:[#allocation165_spill] sm:$0xff] %v8402_v59  ;;  %v9829_v59 = vld [vmem:[#allocation77_spill] sm:$0xff] }
 0x3c5   : > { %v2952_v41 = vadd.f32 %v7985_v32, %v2686_v12  ;;  %5631 = vmatmul.msk.bf16.vlgmr.msrb.gmra.mxu3 %vm570_vm0, %v3102_v35  ;;  %v9823_v32 = vld [vmem:[#allocation195_spill] sm:$0xff] }
 0x3c6   : > { %5612 = vmatmul.msk.bf16.gmra.mxu2 %vm570_vm0, %v9822_v30  ;;  %5697 = vmatmul.msk.bf16.gmra.mxu1 %vm570_vm0, %v3814_v48  ;;  %v3795_v48 = vmul.f32 %v5986_v45, %v9825_v1 }
 0x3c7   : > { %v2988_v3 = vadd.f32 %v8106_v6, %v2952_v41  ;;  %v8393_v27 = vpop.f32.mrf.mxu2 }
 0x3c8   : > { %v2429_v34 = vpop.f32.mrf.mxu3 }
 0x3c9   : > { %v3020_v21 = vmax.f32 %v2988_v3, 0.0  ;;  %v2430_v37 = vadd.f32 %v2429_v34, %v8209_v52  ;;  %v3073_v52 = vld [vmem:[#allocation2 + $0x38] sm:$0xff]  ;;  %v3072_v3 = vld [vmem:[#allocation2 + $0x30] sm:$0xff] }
 0x3cb   : > { %5574 = vst.msk [vmem:[%s7482_s23 + $0x178] sm:$0xff] %vm1840_vm1, %v3020_v21  ;;  %v2687_v17 = vadd.f32 %v9823_v32, %v2430_v37  ;;  %v8399_v42 = vpop.f32.mrf.mxu1  ;;  %v3103_v21 = vpack.c.bf16 %v3073_v52, %v3072_v3  ;;  %v5987_v37 = vld [vmem:[#allocation2 + $0xdf] sm:$0xff]  ;;  %v8427_v45 = vpop.f32.mrf.mxu0 }
 0x3cc   : > { %v9827_v32 = vld [vmem:[#allocation6_spill] sm:$0xff] }
 0x3cd   : > { %v2953_v30 = vadd.f32 %v8006_v58, %v2687_v17  ;;  %v9826_v58 = vld [vmem:[#allocation42_spill] sm:$0xff] }
 0x3ce   : > { %5812 = vmatmul.msk.bf16.gmra.mxu0 %vm570_vm0, %v8163_v40  ;;  %v3794_v40 = vmul.f32 %v5987_v37, %v9827_v32  ;;  %v3075_v32 = vld [vmem:[#allocation2 + $0x48] sm:$0xff] }
 0x3cf   : > { %v2989_v12 = vadd.f32 %v8106_v6, %v2953_v30  ;;  %v8407_v35 = vpop.f32.mrf.mxu2 }
 0x3d0   : > { %v2431_v57 = vpop.f32.mrf.mxu3 }
 0x3d1   : > { %v3021_v9 = vmax.f32 %v2989_v12, 0.0  ;;  %v2432_v41 = vadd.f32 %v2431_v57, %v8224_v55  ;;  %v9828_v12 = vld [vmem:[#allocation78_spill] sm:$0xff]  ;;  %v3815_v57 = vpack.c.bf16 %v3795_v48, %v3794_v40 }
 0x3d2   : > { %v9830_v55 = vpack.c.bf16 %v9828_v12, %v9829_v59  ;;  %v9831_v59 = vld [vmem:[#allocation198_spill] sm:$0xff]  ;;  %v9832_v12 = vld [vmem:[#allocation15_spill] sm:$0xff] }
 0x3d3   : > { %5575 = vst.msk [vmem:[%s7482_s23 + $0x180] sm:$0xff] %vm1840_vm1, %v3021_v9  ;;  %v2688_v34 = vadd.f32 %v9826_v58, %v2432_v41  ;;  %v8415_v17 = vpop.f32.mrf.mxu1 }
 0x3d5   : > { %v2954_v30 = vadd.f32 %v8031_v44, %v2688_v34  ;;  %5632 = vmatmul.msk.bf16.gmra.mxu3 %vm570_vm0, %v3103_v21 }
 0x3d6   : > { %5613 = vmatmul.msk.bf16.gmra.mxu2 %vm570_vm0, %v9830_v55  ;;  %5698 = vmatmul.msk.bf16.gmra.mxu1 %vm570_vm0, %v3815_v57  ;;  %v3074_v57 = vld [vmem:[#allocation2 + $0x40] sm:$0xff] }
 0x3d7   : > { %v2990_v9 = vadd.f32 %v8106_v6, %v2954_v30  ;;  %v8425_v52 = vpop.f32.mrf.mxu2  ;;  %v5988_v30 = vld [vmem:[#allocation2 + $0xf7] sm:$0xff] }
 0x3d8   : > { %v2434_v41 = vpop.f32.mrf.mxu3  ;;  %v3797_v55 = vmul.f32 %v5988_v30, %v9832_v12 }
 0x3d9   : > { %v3022_v1 = vmax.f32 %v2990_v9, 0.0  ;;  %v2435_v44 = vadd.f32 %v2434_v41, %v8243_v62  ;;  %v8443_v9 = vpop.f32.mrf.mxu0 }
 0x3db   : > { %5576 = vst.msk [vmem:[%s7482_s23 + $0x188] sm:$0xff] %vm1840_vm1, %v3022_v1  ;;  %v2689_v3 = vadd.f32 %v9831_v59, %v2435_v44  ;;  %v8433_v58 = vpop.f32.mrf.mxu1  ;;  %v3104_v1 = vpack.c.bf16 %v3075_v32, %v3074_v57  ;;  %v9834_v44 = vld [vmem:[#allocation5_spill] sm:$0xff] }
 0x3dd   : > { %v2955_v48 = vadd.f32 %v8052_v38, %v2689_v3  ;;  %v9833_v38 = vld [vmem:[#allocation53_spill] sm:$0xff] }
 0x3de   : > { %5813 = vmatmul.msk.bf16.gmra.mxu0 %vm570_vm0, %v8195_v33  ;;  %v5989_v33 = vld [vmem:[#allocation2 + $0xef] sm:$0xff] }
 0x3df   : > { %v2991_v34 = vadd.f32 %v8106_v6, %v2955_v48  ;;  %v8439_v21 = vpop.f32.mrf.mxu2  ;;  %v3796_v59 = vmul.f32 %v5989_v33, %v9834_v44 }
 0x3e0   : > { %v2436_v37 = vpop.f32.mrf.mxu3 }
 0x3e1   : > { %v3023_v40 = vmax.f32 %v2991_v34, 0.0  ;;  %v2437_v62 = vadd.f32 %v2436_v37, %v8257_v11  ;;  %v9835_v11 = vld [vmem:[#allocation86_spill] sm:$0xff]  ;;  %v9836_v34 = vld [vmem:[#allocation85_spill] sm:$0xff]  ;;  %v3816_v30 = vpack.c.bf16 %v3797_v55, %v3796_v59  ;;  %v8467_v33 = vpop.f32.mrf.mxu0 }
 0x3e2   : > { %v9837_v37 = vpack.c.bf16 %v9835_v11, %v9836_v34  ;;  %9839 = vst [vmem:[#allocation46_spill] sm:$0xff] %v8467_v33  ;;  %v5990_v34 = vld [vmem:[#allocation2 + $0x107] sm:$0xff]  ;;  %v9844_v33 = vld [vmem:[#allocation93_spill] sm:$0xff] }
 0x3e3   : > { %5577 = vst.msk [vmem:[%s7482_s23 + $0x190] sm:$0xff] %vm1840_vm1, %v3023_v40  ;;  %v2690_v41 = vadd.f32 %v9833_v38, %v2437_v62  ;;  %v8449_v3 = vpop.f32.mrf.mxu1 }
 0x3e5   : > { %v2956_v48 = vadd.f32 %v8068_v39, %v2690_v41  ;;  %5633 = vmatmul.msk.bf16.gmra.mxu3 %vm570_vm0, %v3104_v1  ;;  %v9838_v39 = vld [vmem:[#allocation51_spill] sm:$0xff] }
 0x3e6   : > { %5614 = vmatmul.msk.bf16.gmra.mxu2 %vm570_vm0, %v9837_v37  ;;  %5699 = vmatmul.msk.bf16.gmra.mxu1 %vm570_vm0, %v3816_v30  ;;  %v9840_v37 = vld [vmem:[#allocation21_spill] sm:$0xff] }
 0x3e7   : > { %v2992_v40 = vadd.f32 %v8106_v6, %v2956_v48  ;;  %v8459_v32 = vpop.f32.mrf.mxu2  ;;  %v3799_v30 = vmul.f32 %v5990_v34, %v9840_v37 }
 0x3e8   : > { %v2439_v62 = vpop.f32.mrf.mxu3 }
 0x3e9   : > { %v3024_v12 = vmax.f32 %v2992_v40, 0.0  ;;  %v2440_v57 = vadd.f32 %v2439_v62, %v8280_v24  ;;  %v3077_v24 = vld [vmem:[#allocation2 + $0x58] sm:$0xff]  ;;  %v3076_v40 = vld [vmem:[#allocation2 + $0x50] sm:$0xff]  ;;  %v9841_v62 = vld [vmem:[#allocation63_spill] sm:$0xff] }
 0x3eb   : > { %5578 = vst.msk [vmem:[%s7482_s23 + $0x198] sm:$0xff] %vm1840_vm1, %v3024_v12  ;;  %v2691_v38 = vadd.f32 %v9838_v39, %v2440_v57  ;;  %v8465_v41 = vpop.f32.mrf.mxu1  ;;  %v3105_v12 = vpack.c.bf16 %v3077_v24, %v3076_v40  ;;  %v5991_v57 = vld [vmem:[#allocation2 + $0xff] sm:$0xff] }
 0x3ec   : > { %v9842_v39 = vld [vmem:[#allocation11_spill] sm:$0xff] }
 0x3ed   : > { %v2957_v55 = vadd.f32 %v8090_v43, %v2691_v38 }
 0x3ee   : > { %5814 = vmatmul.msk.bf16.gmra.mxu0 %vm570_vm0, %v8232_v26  ;;  %v3798_v26 = vmul.f32 %v5991_v57, %v9842_v39  ;;  %v3079_v39 = vld [vmem:[#allocation2 + $0x68] sm:$0xff] }
 0x3ef   : > { %v2993_v1 = vadd.f32 %v8106_v6, %v2957_v55  ;;  %v8473_v44 = vpop.f32.mrf.mxu2 }
 0x3f0   : > { %v2441_v59 = vpop.f32.mrf.mxu3 }
 0x3f1   : > { %v3025_v48 = vmax.f32 %v2993_v1, 0.0  ;;  %v2442_v11 = vadd.f32 %v2441_v59, %v8294_v19  ;;  %v9843_v1 = vld [vmem:[#allocation94_spill] sm:$0xff]  ;;  %v3817_v59 = vpack.c.bf16 %v3799_v30, %v3798_v26 }
 0x3f2   : > { %v9845_v19 = vpack.c.bf16 %v9843_v1, %v9844_v33  ;;  %v9847_v33 = vld [vmem:[#allocation59_spill] sm:$0xff]  ;;  %v5992_v1 = vld [vmem:[#allocation2 + $0x117] sm:$0xff] }
 0x3f3   : > { %5579 = vst.msk [vmem:[%s7482_s23 + $0x1a0] sm:$0xff] %vm1840_vm1, %v3025_v48  ;;  %v2692_v43 = vadd.f32 %v9841_v62, %v2442_v11  ;;  %v8482_v55 = vpop.f32.mrf.mxu1  ;;  %v8489_v48 = vpop.f32.mrf.mxu0 }
 0x3f4   : > { %9846 = vst [vmem:[#allocation167_spill] sm:$0xff] %v8489_v48  ;;  %v9861_v48 = vld [vmem:[#allocation113_spill] sm:$0xff] }
 0x3f5   : > { %v2958_v38 = vadd.f32 %v8108_v47, %v2692_v43  ;;  %5634 = vmatmul.msk.bf16.gmra.mxu3 %vm570_vm0, %v3105_v12 }
 0x3f6   : > { %5615 = vmatmul.msk.bf16.gmra.mxu2 %vm570_vm0, %v9845_v19  ;;  %5700 = vmatmul.msk.bf16.gmra.mxu1 %vm570_vm0, %v3817_v59  ;;  %v9849_v19 = vld [vmem:[#allocation27_spill] sm:$0xff] }
 0x3f7   : > { %v2994_v11 = vadd.f32 %v8106_v6, %v2958_v38  ;;  %v8493_v34 = vpop.f32.mrf.mxu2  ;;  %v3801_v59 = vmul.f32 %v5992_v1, %v9849_v19  ;;  %v4570_v19 = vld [vmem:[#allocation2 + $0x108] sm:$0xff] }
 0x3f8   : > { %v2444_v24 = vpop.f32.mrf.mxu3 }
 0x3f9   : > { %v3026_v47 = vmax.f32 %v2994_v11, 0.0  ;;  %v2445_v37 = vadd.f32 %v2444_v24, %v8315_v54  ;;  %v9850_v11 = vld [vmem:[#allocation199_spill] sm:$0xff] }
 0x3fb   : > { %5580 = vst.msk [vmem:[%s7482_s23 + $0x1a8] sm:$0xff] %vm1840_vm1, %v3026_v47  ;;  %v2693_v40 = vadd.f32 %v9847_v33, %v2445_v37  ;;  %v8501_v43 = vpop.f32.mrf.mxu1  ;;  %v8507_v26 = vpop.f32.mrf.mxu0  ;;  %v5993_v37 = vld [vmem:[#allocation2 + $0x10f] sm:$0xff] }
 0x3fc   : > { %9848 = vst [vmem:[#allocation197_spill] sm:$0xff] %v8507_v26  ;;  %v9853_v26 = vld [vmem:[#allocation103_spill] sm:$0xff] }
 0x3fd   : > { %v2959_v62 = vadd.f32 %v8130_v51, %v2693_v40  ;;  %v3078_v51 = vld [vmem:[#allocation2 + $0x60] sm:$0xff] }
 0x3fe   : > { %5815 = vmatmul.msk.bf16.gmra.mxu0 %vm570_vm0, %v8266_v31  ;;  %v3106_v47 = vpack.c.bf16 %v3079_v39, %v3078_v51  ;;  %v9851_v31 = vld [vmem:[#allocation17_spill] sm:$0xff] }
 0x3ff   : > { %v2995_v30 = vadd.f32 %v8106_v6, %v2959_v62  ;;  %v8505_v57 = vpop.f32.mrf.mxu2  ;;  %v3800_v33 = vmul.f32 %v5993_v37, %v9851_v31  ;;  %v9852_v62 = vld [vmem:[#allocation104_spill] sm:$0xff]  ;;  %v3770_v31 = vld [vmem:[#allocation2 + $0x11f] sm:$0xff] }
 0x400   : > { %v2446_v12 = vpop.f32.mrf.mxu3 }
 0x401   : > { %v3027_v54 = vmax.f32 %v2995_v30, 0.0  ;;  %v2447_v38 = vadd.f32 %v2446_v12, %v8333_v20  ;;  %v9854_v30 = vpack.c.bf16 %v9852_v62, %v9853_v26  ;;  %v3818_v20 = vpack.c.bf16 %v3801_v59, %v3800_v33  ;;  %v5933_v12 = vld [vmem:[%s9251_s3] sm:$0xff]  ;;  %v9856_v59 = vld [vmem:[#allocation200_spill] sm:$0xff] }
 0x402   : > { %4928 = vmatpush.bf16.msra.mxu1 %v5933_v12 }
 0x403   : > { %5581 = vst.msk [vmem:[%s7482_s23 + $0x1b0] sm:$0xff] %vm1840_vm1, %v3027_v54  ;;  %v2694_v24 = vadd.f32 %v9850_v11, %v2447_v38  ;;  %v8528_v1 = vpop.f32.mrf.mxu1  ;;  %v8531_v51 = vpop.f32.mrf.mxu0 }
 0x404   : > { %9855 = vst [vmem:[#allocation99_spill] sm:$0xff] %v8531_v51 }
 0x405   : > { %v2960_v40 = vadd.f32 %v8146_v14, %v2694_v24  ;;  %5635 = vmatmul.msk.bf16.gmra.mxu3 %vm570_vm0, %v3106_v47  ;;  %v4569_v24 = vld [vmem:[#allocation2 + $0x100] sm:$0xff] }
 0x406   : > { %5616 = vmatmul.msk.bf16.gmra.mxu2 %vm570_vm0, %v9854_v30  ;;  %5701 = vmatmul.msk.bf16.gmra.mxu1 %vm570_vm0, %v3818_v20  ;;  %v8537_v37 = vpack.c.bf16 %v4570_v19, %v4569_v24  ;;  %v3081_v30 = vld [vmem:[#allocation2 + $0x78] sm:$0xff] }
 0x407   : > { %v2996_v39 = vadd.f32 %v8106_v6, %v2960_v40  ;;  %v8526_v38 = vpop.f32.mrf.mxu2 }
 0x408   : > { %v2449_v54 = vpop.f32.mrf.mxu3 }
 0x409   : > { %v3028_v14 = vmax.f32 %v2996_v39, 0.0  ;;  %v2450_v26 = vadd.f32 %v2449_v54, %v8359_v10  ;;  %v3771_v10 = vld [vmem:[#allocation2 + $0x127] sm:$0xff] }
 0x40a   : > { %v9857_v39 = vld [vmem:[#allocation23_spill] sm:$0xff] }
 0x40b   : > { %5582 = vst.msk [vmem:[%s7482_s23 + $0x1b8] sm:$0xff] %vm1840_vm1, %v3028_v14  ;;  %v2695_v11 = vadd.f32 %v9856_v59, %v2450_v26  ;;  %v3802_v54 = vmul.f32 %v3770_v31, %v9857_v39  ;;  %v3080_v14 = vld [vmem:[#allocation2 + $0x70] sm:$0xff]  ;;  %v8549_v19 = vpop.f32.mrf.mxu1 }
 0x40c   : > { %v9859_v59 = vld [vmem:[#allocation201_spill] sm:$0xff]  ;;  %v3107_v24 = vpack.c.bf16 %v3081_v30, %v3080_v14 }
 0x40d   : > { %v2961_v47 = vadd.f32 %v8166_v5, %v2695_v11  ;;  %v9858_v5 = vld [vmem:[#allocation31_spill] sm:$0xff] }
 0x40e   : > { %5816 = vmatmul.msk.bf16.gmra.mxu0 %vm570_vm0, %v8537_v37  ;;  %v3803_v26 = vmul.f32 %v3771_v10, %v9858_v5 }
 0x40f   : > { %v2997_v33 = vadd.f32 %v8106_v6, %v2961_v47  ;;  %v8542_v62 = vpop.f32.mrf.mxu2  ;;  %v8552_v47 = vpop.f32.mrf.mxu0 }
 0x410   : > { %v2451_v40 = vpop.f32.mrf.mxu3  ;;  %v3819_v31 = vpack.c.bf16 %v3803_v26, %v3802_v54 }
 0x411   : > { %v3029_v20 = vmax.f32 %v2997_v33, 0.0  ;;  %v2452_v12 = vadd.f32 %v2451_v40, %v8373_v8  ;;  %v9860_v33 = vld [vmem:[#allocation114_spill] sm:$0xff] }
 0x412   : > { %v9862_v8 = vpack.c.bf16 %v9860_v33, %v9861_v48  ;;  %v9864_v33 = vld [vmem:[#allocation202_spill] sm:$0xff] }
 0x413   : > { %5583 = vst.msk [vmem:[%s7482_s23 + $0x1c0] sm:$0xff] %vm1840_vm1, %v3029_v20  ;;  %v2696_v11 = vadd.f32 %v9859_v59, %v2452_v12  ;;  %v8568_v39 = vpop.f32.mrf.mxu1  ;;  %v3083_v59 = vld [vmem:[#allocation2 + $0x88] sm:$0xff] }
 0x415   : > { %v2962_v51 = vadd.f32 %v8182_v61, %v2696_v11  ;;  %5636 = vmatmul.msk.bf16.gmra.mxu3 %vm570_vm0, %v3107_v24  ;;  %v9863_v61 = vld [vmem:[#allocation40_spill] sm:$0xff]  ;;  %v3082_v24 = vld [vmem:[#allocation2 + $0x80] sm:$0xff] }
 0x416   : > { %5617 = vmatmul.msk.bf16.gmra.mxu2 %vm570_vm0, %v9862_v8  ;;  %5702 = vmatmul.msk.bf16.gmra.mxu1 %vm570_vm0, %v3819_v31  ;;  %v3108_v8 = vpack.c.bf16 %v3083_v59, %v3082_v24  ;;  %v9871_v59 = vld [vmem:[#allocation203_spill] sm:$0xff] }
 0x417   : > { %v2998_v10 = vadd.f32 %v8106_v6, %v2962_v51  ;;  %v8571_v54 = vpop.f32.mrf.mxu0  ;;  %v5927_v24 = vld [vmem:[%s9251_s3 + $0xa0] sm:$0xff] }
 0x418   : > { %v2454_v40 = vpop.f32.mrf.mxu3  ;;  %v8562_v20 = vpop.f32.mrf.mxu2  ;;  %4461 = vmatpush.bf16.msra.mxu3 %v5927_v24 }
 0x419   : > { %v3030_v30 = vmax.f32 %v2998_v10, 0.0  ;;  %v2455_v12 = vadd.f32 %v2454_v40, %v8393_v27  ;;  %v9865_v10 = vld [vmem:[#allocation122_spill] sm:$0xff]  ;;  %v9866_v40 = vld [vmem:[#allocation121_spill] sm:$0xff] }
 0x41b   : > { %5584 = vst.msk [vmem:[%s7482_s23 + $0x1c8] sm:$0xff] %vm1840_vm1, %v3030_v30  ;;  %v2697_v48 = vadd.f32 %v9863_v61, %v2455_v12  ;;  %v9867_v30 = vpack.c.bf16 %v9865_v10, %v9866_v40  ;;  %v9869_v61 = vld [vmem:[#allocation35_spill] sm:$0xff] }
 0x41d   : > { %v2963_v14 = vadd.f32 %v8198_v28, %v2697_v48 }
 0x41e   : > { %5817 = vmatmul.msk.bf16.gmra.mxu0 %vm570_vm0, %v8342_v63  ;;  %v8588_v63 = vpop.f32.mrf.mxu1 }
 0x41f   : > { %v2999_v51 = vadd.f32 %v8106_v6, %v2963_v14 }
 0x420   : > { %v2456_v5 = vpop.f32.mrf.mxu3  ;;  %v8576_v26 = vpop.f32.mrf.mxu2 }
 0x421   : > { %v3031_v27 = vmax.f32 %v2999_v51, 0.0  ;;  %v2457_v11 = vadd.f32 %v2456_v5, %v8407_v35  ;;  %v9868_v35 = vld [vmem:[#allocation38_spill] sm:$0xff] }
 0x422   : > { %v9870_v48 = vpack.c.bf16 %v9868_v35, %v9869_v61  ;;  %v9872_v35 = vld [vmem:[#allocation97_spill] sm:$0xff] }
 0x423   : > { %5585 = vst.msk [vmem:[%s7482_s23 + $0x1d0] sm:$0xff] %vm1840_vm1, %v3031_v27  ;;  %v2698_v28 = vadd.f32 %v9864_v33, %v2457_v11  ;;  %v5929_v11 = vld [vmem:[%s9251_s3 + $0x80] sm:$0xff] }
 0x424   : > { %4312 = vmatpush.bf16.msra.mxu2 %v5929_v11  ;;  %v9877_v11 = vld [vmem:[#allocation43_spill] sm:$0xff] }
 0x425   : > { %v2964_v31 = vadd.f32 %v8215_v0, %v2698_v28  ;;  %5637 = vmatmul.msk.bf16.gmra.mxu3 %vm570_vm0, %v3108_v8 }
 0x426   : > { %5618 = vmatmul.msk.bf16.gmra.mxu2 %vm570_vm0, %v9867_v30  ;;  %5827 = vmatmul.msk.bf16.vlgmr.msra.gmra.mxu1 %vm570_vm0, %v9870_v48  ;;  %v8611_v10 = vpop.f32.mrf.mxu1 }
 0x427   : > { %v3000_v12 = vadd.f32 %v8106_v6, %v2964_v31  ;;  %v3085_v31 = vld [vmem:[#allocation2 + $0x98] sm:$0xff] }
 0x428   : > { %v2459_v14 = vpop.f32.mrf.mxu3  ;;  %v8595_v51 = vpop.f32.mrf.mxu2 }
 0x429   : > { %v3032_v0 = vmax.f32 %v3000_v12, 0.0  ;;  %v2460_v5 = vadd.f32 %v2459_v14, %v8425_v52  ;;  %v3084_v12 = vld [vmem:[#allocation2 + $0x90] sm:$0xff]  ;;  %v9873_v14 = vld [vmem:[#allocation128_spill] sm:$0xff] }
 0x42b   : > { %5586 = vst.msk [vmem:[%s7482_s23 + $0x1d8] sm:$0xff] %vm1840_vm1, %v3032_v0  ;;  %v2699_v27 = vadd.f32 %v9871_v59, %v2460_v5  ;;  %v9874_v0 = vld [vmem:[#allocation127_spill] sm:$0xff] }
 0x42c   : > { %v9875_v5 = vpack.c.bf16 %v9873_v14, %v9874_v0  ;;  %v3086_v0 = vld [vmem:[#allocation2 + $0xa0] sm:$0xff] }
 0x42d   : > { %v2965_v33 = vadd.f32 %v8235_v36, %v2699_v27  ;;  %v3109_v36 = vpack.c.bf16 %v3085_v31, %v3084_v12  ;;  %v9876_v27 = vld [vmem:[#allocation48_spill] sm:$0xff]  ;;  %v9879_v31 = vld [vmem:[#allocation95_spill] sm:$0xff] }
 0x42f   : > { %v3001_v28 = vadd.f32 %v8106_v6, %v2965_v33 }
 0x430   : > { %v2461_v52 = vpop.f32.mrf.mxu3  ;;  %v8609_v8 = vpop.f32.mrf.mxu2 }
 0x431   : > { %v3033_v40 = vmax.f32 %v3001_v28, 0.0  ;;  %v2462_v30 = vadd.f32 %v2461_v52, %v8439_v21  ;;  %v9878_v21 = vpack.c.bf16 %v9876_v27, %v9877_v11  ;;  %v8631_v52 = vpop.f32.mrf.mxu1  ;;  %v9881_v11 = vld [vmem:[#allocation134_spill] sm:$0xff] }
 0x433   : > { %5587 = vst.msk [vmem:[%s7482_s23 + $0x1e0] sm:$0xff] %vm1840_vm1, %v3033_v40  ;;  %v2700_v61 = vadd.f32 %v9872_v35, %v2462_v30 }
 0x435   : > { %v2966_v48 = vadd.f32 %v8251_v23, %v2700_v61  ;;  %5638 = vmatmul.msk.bf16.gmra.mxu3 %vm570_vm0, %v3109_v36  ;;  %v3087_v36 = vld [vmem:[#allocation2 + $0xa8] sm:$0xff] }
 0x436   : > { %5619 = vmatmul.msk.bf16.gmra.mxu2 %vm570_vm0, %v9875_v5  ;;  %5828 = vmatmul.msk.bf16.gmra.mxu1 %vm570_vm0, %v9878_v21  ;;  %v9882_v21 = vld [vmem:[#allocation133_spill] sm:$0xff] }
 0x437   : > { %v3002_v59 = vadd.f32 %v8106_v6, %v2966_v48 }
 0x438   : > { %v2464_v24 = vpop.f32.mrf.mxu3 }
 0x439   : > { %v8628_v33 = vpop.f32.mrf.mxu2  ;;  %v3034_v28 = vmax.f32 %v3002_v59, 0.0  ;;  %v2465_v23 = vadd.f32 %v2464_v24, %v8459_v32  ;;  %v9880_v32 = vld [vmem:[#allocation170_spill] sm:$0xff]  ;;  %v3110_v59 = vpack.c.bf16 %v3087_v36, %v3086_v0  ;;  %v8644_v27 = vpop.f32.mrf.mxu1  ;;  %v9883_v24 = vpack.c.bf16 %v9881_v11, %v9882_v21  ;;  %v3088_v11 = vld [vmem:[#allocation2 + $0xb0] sm:$0xff] }
 0x43a   : > { %v9888_v21 = vld [vmem:[#allocation54_spill] sm:$0xff] }
 0x43b   : > { %5588 = vst.msk [vmem:[%s7482_s23 + $0x1e8] sm:$0xff] %vm1840_vm1, %v3034_v28  ;;  %v2701_v40 = vadd.f32 %v9879_v31, %v2465_v23  ;;  %v9885_v23 = vld [vmem:[#allocation56_spill] sm:$0xff] }
 0x43d   : > { %v2967_v30 = vadd.f32 %v8269_v7, %v2701_v40 }
 0x43f   : > { %v3003_v12 = vadd.f32 %v8106_v6, %v2967_v30 }
 0x440   : > { %v2466_v35 = vpop.f32.mrf.mxu3 }
 0x441   : > { %v8638_v61 = vpop.f32.mrf.mxu2  ;;  %v3035_v48 = vmax.f32 %v3003_v12, 0.0  ;;  %v2467_v14 = vadd.f32 %v2466_v35, %v8473_v44  ;;  %v9884_v44 = vld [vmem:[#allocation57_spill] sm:$0xff]  ;;  %v9887_v35 = vld [vmem:[#allocation55_spill] sm:$0xff] }
 0x442   : > { %v9886_v31 = vpack.c.bf16 %v9884_v44, %v9885_v23  ;;  %v9889_v44 = vld [vmem:[#allocation140_spill] sm:$0xff]  ;;  %v9890_v23 = vld [vmem:[#allocation139_spill] sm:$0xff] }
 0x443   : > { %5589 = vst.msk [vmem:[%s7482_s23 + $0x1f0] sm:$0xff] %vm1840_vm1, %v3035_v48  ;;  %v2702_v5 = vadd.f32 %v9880_v32, %v2467_v14  ;;  %v8669_v14 = vpop.f32.mrf.mxu1 }
 0x445   : > { %v2968_v7 = vadd.f32 %v8286_v16, %v2702_v5  ;;  %5639 = vmatmul.msk.bf16.gmra.mxu3 %vm570_vm0, %v3110_v59  ;;  %v3089_v59 = vld [vmem:[#allocation2 + $0xb8] sm:$0xff] }
 0x446   : > { %5620 = vmatmul.msk.bf16.gmra.mxu2 %vm570_vm0, %v9883_v24  ;;  %5829 = vmatmul.msk.bf16.gmra.mxu1 %vm570_vm0, %v9886_v31  ;;  %v9891_v31 = vpack.c.bf16 %v9889_v44, %v9890_v23  ;;  %v3090_v44 = vld [vmem:[#allocation2 + $0xc0] sm:$0xff] }
 0x447   : > { %v3004_v28 = vadd.f32 %v8106_v6, %v2968_v7  ;;  %v8666_v6 = vld [vmem:[%s9252_s4] ss:$0 sm:$0xff] }
 0x448   : > { %v3426_v30 = vpop.f32.mrf.mxu3 }
 0x449   : > { %v8657_v40 = vpop.f32.mrf.mxu2  ;;  %v3036_v12 = vmax.f32 %v3004_v28, 0.0  ;;  %v3427_v16 = vadd.f32 %v3426_v30, %v8493_v34  ;;  %v3111_v28 = vpack.c.bf16 %v3089_v59, %v3088_v11 }
 0x44b   : > { %5590 = vst.msk [vmem:[%s7482_s23 + $0x1f8] sm:$0xff] %vm1840_vm1, %v3036_v12  ;;  %v3708_v36 = vadd.f32 %v9887_v35, %v3427_v16  ;;  %v9892_v12 = vld [vmem:[#allocation67_spill] sm:$0xff]  ;;  %v9893_v16 = vld [vmem:[#allocation66_spill] sm:$0xff] }
 0x44d   : > { %v3974_v48 = vadd.f32 %v8302_v25, %v3708_v36 }
 0x44f   : > { %v4010_v0 = vadd.f32 %v8666_v6, %v3974_v48  ;;  %v8691_v48 = vpop.f32.mrf.mxu1 }
 0x450   : > { %v3428_v5 = vpop.f32.mrf.mxu3 }
 0x451   : > { %v8672_v32 = vpop.f32.mrf.mxu2  ;;  %v4042_v34 = vmax.f32 %v4010_v0, 0.0  ;;  %v3429_v7 = vadd.f32 %v3428_v5, %v8505_v57  ;;  %v9894_v57 = vpack.c.bf16 %v9892_v12, %v9893_v16  ;;  %v9895_v5 = vld [vmem:[#allocation141_spill] sm:$0xff]  ;;  %v9897_v12 = vld [vmem:[#allocation148_spill] sm:$0xff]  ;;  %v9898_v16 = vld [vmem:[#allocation147_spill] sm:$0xff] }
 0x453   : > { %5703 = vst.msk [vmem:[%s7482_s23 + $0x200] sm:$0xff] %vm1840_vm1, %v4042_v34  ;;  %v3709_v24 = vadd.f32 %v9888_v21, %v3429_v7 }
 0x455   : > { %v3975_v25 = vadd.f32 %v8327_v2, %v3709_v24  ;;  %5640 = vmatmul.msk.bf16.gmra.mxu3 %vm570_vm0, %v3111_v28  ;;  %v3091_v24 = vld [vmem:[#allocation2 + $0xc8] sm:$0xff] }
 0x456   : > { %5621 = vmatmul.msk.bf16.gmra.mxu2 %vm570_vm0, %v9891_v31  ;;  %5830 = vmatmul.msk.bf16.gmra.mxu1 %vm570_vm0, %v9894_v57  ;;  %v9899_v57 = vpack.c.bf16 %v9897_v12, %v9898_v16  ;;  %v3092_v12 = vld [vmem:[#allocation2 + $0xd0] sm:$0xff] }
 0x457   : > { %v4011_v30 = vadd.f32 %v8666_v6, %v3975_v25  ;;  %v8702_v23 = vpop.f32.mrf.mxu1 }
 0x458   : > { %v3431_v36 = vpop.f32.mrf.mxu3 }
 0x459   : > { %v8689_v35 = vpop.f32.mrf.mxu2  ;;  %v4043_v2 = vmax.f32 %v4011_v30, 0.0  ;;  %v3432_v0 = vadd.f32 %v3431_v36, %v8526_v38  ;;  %v9896_v38 = vld [vmem:[#allocation173_spill] sm:$0xff]  ;;  %v3112_v30 = vpack.c.bf16 %v3091_v24, %v3090_v44 }
 0x45b   : > { %5704 = vst.msk [vmem:[%s7482_s23 + $0x208] sm:$0xff] %vm1840_vm1, %v4043_v2  ;;  %v3710_v59 = vadd.f32 %v9895_v5, %v3432_v0  ;;  %v9901_v2 = vld [vmem:[#allocation74_spill] sm:$0xff] }
 0x45d   : > { %v3976_v34 = vadd.f32 %v8348_v56, %v3710_v59 }
 0x45f   : > { %v4012_v7 = vadd.f32 %v8666_v6, %v3976_v34  ;;  %v8724_v24 = vpop.f32.mrf.mxu1 }
 0x460   : > { %v3433_v21 = vpop.f32.mrf.mxu3 }
 0x461   : > { %v8699_v11 = vpop.f32.mrf.mxu2  ;;  %v4044_v28 = vmax.f32 %v4012_v7, 0.0  ;;  %v3434_v25 = vadd.f32 %v3433_v21, %v8542_v62  ;;  %v9900_v62 = vld [vmem:[#allocation75_spill] sm:$0xff] }
 0x462   : > { %v9902_v0 = vpack.c.bf16 %v9900_v62, %v9901_v2  ;;  %v9903_v7 = vld [vmem:[#allocation107_spill] sm:$0xff] }
 0x463   : > { %5705 = vst.msk [vmem:[%s7482_s23 + $0x210] sm:$0xff] %vm1840_vm1, %v4044_v28  ;;  %v3711_v31 = vadd.f32 %v9896_v38, %v3434_v25 }
 0x465   : > { %v3977_v56 = vadd.f32 %v8367_v29, %v3711_v31  ;;  %5641 = vmatmul.msk.bf16.gmra.mxu3 %vm570_vm0, %v3112_v30  ;;  %v3093_v31 = vld [vmem:[#allocation2 + $0xd8] sm:$0xff] }
 0x466   : > { %5622 = vmatmul.msk.bf16.gmra.mxu2 %vm570_vm0, %v9899_v57  ;;  %5831 = vmatmul.msk.bf16.gmra.mxu1 %vm570_vm0, %v9902_v0  ;;  %v8734_v57 = vpack.c.bf16 %v3093_v31, %v3092_v12  ;;  %v9907_v0 = vld [vmem:[#allocation82_spill] sm:$0xff] }
 0x467   : > { %v4013_v36 = vadd.f32 %v8666_v6, %v3977_v56  ;;  %v8741_v62 = vpop.f32.mrf.mxu1 }
 0x468   : > { %v3436_v59 = vpop.f32.mrf.mxu3 }
 0x469   : > { %v8718_v5 = vpop.f32.mrf.mxu2  ;;  %v4045_v34 = vmax.f32 %v4013_v36, 0.0  ;;  %v3437_v29 = vadd.f32 %v3436_v59, %v8562_v20  ;;  %v9904_v20 = vld [vmem:[#allocation176_spill] sm:$0xff] }
 0x46b   : > { %5706 = vst.msk [vmem:[%s7482_s23 + $0x218] sm:$0xff] %vm1840_vm1, %v4045_v34  ;;  %v3712_v21 = vadd.f32 %v9903_v7, %v3437_v29 }
 0x46d   : > { %v3978_v28 = vadd.f32 %v8381_v53, %v3712_v21  ;;  %v9905_v53 = vld [vmem:[#allocation39_spill] sm:$0xff]  ;;  %v9909_v21 = vld [vmem:[#allocation64_spill] sm:$0xff] }
 0x46f   : > { %v4014_v25 = vadd.f32 %v8666_v6, %v3978_v28  ;;  %v8758_v12 = vpop.f32.mrf.mxu1 }
 0x470   : > { %v3438_v38 = vpop.f32.mrf.mxu3 }
 0x471   : > { %v8728_v44 = vpop.f32.mrf.mxu2  ;;  %v4046_v30 = vmax.f32 %v4014_v25, 0.0  ;;  %v3439_v56 = vadd.f32 %v3438_v38, %v8576_v26  ;;  %v9906_v26 = vld [vmem:[#allocation83_spill] sm:$0xff] }
 0x472   : > { %v9908_v59 = vpack.c.bf16 %v9906_v26, %v9907_v0  ;;  %v9911_v26 = vld [vmem:[#allocation41_spill] sm:$0xff] }
 0x473   : > { %5707 = vst.msk [vmem:[%s7482_s23 + $0x220] sm:$0xff] %vm1840_vm1, %v4046_v30  ;;  %v3713_v16 = vadd.f32 %v9904_v20, %v3439_v56  ;;  %v3095_v56 = vld [vmem:[#allocation2 + $0xe8] sm:$0xff]  ;;  %v9912_v0 = vld [vmem:[#allocation37_spill] sm:$0xff] }
 0x475   : > { %v3979_v36 = vadd.f32 %v8399_v42, %v3713_v16  ;;  %5642 = vmatmul.msk.bf16.gmra.mxu3 %vm570_vm0, %v8734_v57 }
 0x476   : > { %5751 = vmatmul.msk.bf16.vlgmr.msra.gmra.mxu2 %vm570_vm0, %v9905_v53  ;;  %5832 = vmatmul.msk.bf16.gmra.mxu1 %vm570_vm0, %v9908_v59  ;;  %v9913_v59 = vpack.c.bf16 %v9911_v26, %v9912_v0  ;;  %v3096_v0 = vld [vmem:[#allocation2 + $0xf0] sm:$0xff] }
 0x477   : > { %v4015_v2 = vadd.f32 %v8666_v6, %v3979_v36  ;;  %v3094_v36 = vld [vmem:[#allocation2 + $0xe0] sm:$0xff] }
 0x478   : > { %v3441_v29 = vpop.f32.mrf.mxu3 }
 0x479   : > { %v8748_v34 = vpop.f32.mrf.mxu2  ;;  %v4047_v42 = vmax.f32 %v4015_v2, 0.0  ;;  %v3442_v7 = vadd.f32 %v3441_v29, %v8595_v51  ;;  %v9910_v51 = vld [vmem:[#allocation179_spill] sm:$0xff]  ;;  %v8764_v2 = vpack.c.bf16 %v3095_v56, %v3094_v36 }
 0x47b   : > { %5708 = vst.msk [vmem:[%s7482_s23 + $0x228] sm:$0xff] %vm1840_vm1, %v4047_v42  ;;  %v3714_v28 = vadd.f32 %v9909_v21, %v3442_v7  ;;  %v9915_v42 = vld [vmem:[#allocation90_spill] sm:$0xff] }
 0x47d   : > { %v3980_v25 = vadd.f32 %v8415_v17, %v3714_v28 }
 0x47f   : > { %v4016_v38 = vadd.f32 %v8666_v6, %v3980_v25 }
 0x480   : > { %v3443_v30 = vpop.f32.mrf.mxu3 }
 0x481   : > { %v8756_v31 = vpop.f32.mrf.mxu2  ;;  %v4048_v20 = vmax.f32 %v4016_v38, 0.0  ;;  %v3444_v16 = vadd.f32 %v3443_v30, %v8609_v8  ;;  %v9914_v8 = vld [vmem:[#allocation91_spill] sm:$0xff]  ;;  %v8781_v38 = vpop.f32.mrf.mxu1  ;;  %v9917_v30 = vld [vmem:[#allocation182_spill] sm:$0xff] }
 0x482   : > { %v9916_v7 = vpack.c.bf16 %v9914_v8, %v9915_v42  ;;  %v9919_v42 = vld [vmem:[#allocation47_spill] sm:$0xff] }
 0x483   : > { %5709 = vst.msk [vmem:[%s7482_s23 + $0x230] sm:$0xff] %vm1840_vm1, %v4048_v20  ;;  %v3715_v53 = vadd.f32 %v9910_v51, %v3444_v16 }
 0x485   : > { %v3981_v17 = vadd.f32 %v8433_v58, %v3715_v53  ;;  %5643 = vmatmul.msk.bf16.gmra.mxu3 %vm570_vm0, %v8764_v2  ;;  %v3097_v53 = vld [vmem:[#allocation2 + $0xf8] sm:$0xff] }
 0x486   : > { %5752 = vmatmul.msk.bf16.gmra.mxu2 %vm570_vm0, %v9913_v59  ;;  %5833 = vmatmul.msk.bf16.gmra.mxu1 %vm570_vm0, %v9916_v7  ;;  %v9920_v7 = vld [vmem:[#allocation101_spill] sm:$0xff] }
 0x487   : > { %v4017_v29 = vadd.f32 %v8666_v6, %v3981_v17 }
 0x488   : > { %v3446_v28 = vpop.f32.mrf.mxu3 }
 0x489   : > { %v8778_v21 = vpop.f32.mrf.mxu2  ;;  %v4049_v58 = vmax.f32 %v4017_v29, 0.0  ;;  %v3447_v25 = vadd.f32 %v3446_v28, %v8628_v33  ;;  %v9918_v33 = vld [vmem:[#allocation72_spill] sm:$0xff]  ;;  %v8794_v29 = vpack.c.bf16 %v3097_v53, %v3096_v0  ;;  %v8796_v8 = vpop.f32.mrf.mxu1 }
 0x48a   : > { %v9921_v28 = vld [vmem:[#allocation100_spill] sm:$0xff] }
 0x48b   : > { %5710 = vst.msk [vmem:[%s7482_s23 + $0x238] sm:$0xff] %vm1840_vm1, %v4049_v58  ;;  %v3716_v56 = vadd.f32 %v9917_v30, %v3447_v25  ;;  %v9922_v58 = vpack.c.bf16 %v9920_v7, %v9921_v28  ;;  %v9927_v7 = vld [vmem:[#allocation110_spill] sm:$0xff] }
 0x48d   : > { %v3982_v20 = vadd.f32 %v8449_v3, %v3716_v56 }
 0x48f   : > { %v4018_v16 = vadd.f32 %v8666_v6, %v3982_v20 }
 0x490   : > { %v3448_v51 = vpop.f32.mrf.mxu3 }
 0x491   : > { %v8788_v36 = vpop.f32.mrf.mxu2  ;;  %v4050_v17 = vmax.f32 %v4018_v16, 0.0  ;;  %v3449_v26 = vadd.f32 %v3448_v51, %v8638_v61  ;;  %v8815_v51 = vpop.f32.mrf.mxu1 }
 0x493   : > { %5711 = vst.msk [vmem:[%s7482_s23 + $0x240] sm:$0xff] %vm1840_vm1, %v4050_v17  ;;  %v3717_v59 = vadd.f32 %v9918_v33, %v3449_v26 }
 0x495   : > { %v3983_v3 = vadd.f32 %v8465_v41, %v3717_v59  ;;  %5644 = vmatmul.msk.bf16.gmra.mxu3 %vm570_vm0, %v8794_v29 }
 0x496   : > { %5753 = vmatmul.msk.bf16.gmra.mxu2 %vm570_vm0, %v9919_v42  ;;  %5834 = vmatmul.msk.bf16.gmra.mxu1 %vm570_vm0, %v9922_v58 }
 0x497   : > { %v4019_v61 = vadd.f32 %v8666_v6, %v3983_v3 }
 0x498   : > { %v3451_v30 = vpop.f32.mrf.mxu3 }
 0x499   : > { %v8808_v25 = vpop.f32.mrf.mxu2  ;;  %v4051_v56 = vmax.f32 %v4019_v61, 0.0  ;;  %v3452_v41 = vadd.f32 %v3451_v30, %v8657_v40  ;;  %v9926_v61 = vld [vmem:[#allocation111_spill] sm:$0xff] }
 0x49a   : > { %v9928_v28 = vpack.c.bf16 %v9926_v61, %v9927_v7  ;;  %v9934_v61 = vld [vmem:[#allocation118_spill] sm:$0xff] }
 0x49b   : > { %5712 = vst.msk [vmem:[%s7482_s23 + $0x248] sm:$0xff] %vm1840_vm1, %v4051_v56  ;;  %v3718_v20 = vadd.f32 %v7955_v4, %v3452_v41  ;;  %v9923_v4 = vld [vmem:[#allocation58_spill] sm:$0xff] }
 0x49d   : > { %v3984_v16 = vadd.f32 %v8482_v55, %v3718_v20  ;;  %v9924_v55 = vld [vmem:[#allocation52_spill] sm:$0xff] }
 0x49e   : > { %v9925_v3 = vpack.c.bf16 %v9923_v4, %v9924_v55  ;;  %v9930_v4 = vld [vmem:[#allocation68_spill] sm:$0xff]  ;;  %v9931_v55 = vld [vmem:[#allocation62_spill] sm:$0xff] }
 0x49f   : > { %v4020_v53 = vadd.f32 %v8666_v6, %v3984_v16 }
 0x4a0   : > { %v3453_v26 = vpop.f32.mrf.mxu3 }
 0x4a1   : > { %v8818_v17 = vpop.f32.mrf.mxu2  ;;  %v4052_v0 = vmax.f32 %v4020_v53, 0.0  ;;  %v3454_v33 = vadd.f32 %v3453_v26, %v8672_v32  ;;  %v3101_v53 = vld [vmem:[#allocation2 + $0x118] sm:$0xff] }
 0x4a3   : > { %5713 = vst.msk [vmem:[%s7482_s23 + $0x250] sm:$0xff] %vm1840_vm1, %v4052_v0  ;;  %v3719_v40 = vadd.f32 %v7982_v15, %v3454_v33  ;;  %v3100_v33 = vld [vmem:[#allocation2 + $0x110] sm:$0xff] }
 0x4a5   : > { %v3985_v59 = vadd.f32 %v8501_v43, %v3719_v40  ;;  %5645 = vmatmul.msk.bf16.gmra.mxu3 %vm570_vm0, %v8537_v37  ;;  %v8838_v43 = vpop.f32.mrf.mxu1 }
 0x4a6   : > { %5754 = vmatmul.msk.bf16.gmra.mxu2 %vm570_vm0, %v9925_v3  ;;  %5835 = vmatmul.msk.bf16.gmra.mxu1 %vm570_vm0, %v9928_v28  ;;  %v9932_v3 = vpack.c.bf16 %v9930_v4, %v9931_v55  ;;  %v5995_v4 = vld [vmem:[#allocation2 + $0xd1] sm:$0xff]  ;;  %v9937_v55 = vld [vmem:[#allocation115_spill] sm:$0xff] }
 0x4a7   : > { %v4021_v42 = vadd.f32 %v8666_v6, %v3985_v59 }
 0x4a8   : > { %v3456_v15 = vpop.f32.mrf.mxu3 }
 0x4a9   : > { %v8836_v32 = vpop.f32.mrf.mxu2  ;;  %v4053_v58 = vmax.f32 %v4021_v42, 0.0  ;;  %v3457_v37 = vadd.f32 %v3456_v15, %v8689_v35  ;;  %v9929_v35 = vld [vmem:[#allocation159_spill] sm:$0xff] }
 0x4aa   : > { %v9933_v42 = vld [vmem:[#allocation119_spill] sm:$0xff] }
 0x4ab   : > { %5714 = vst.msk [vmem:[%s7482_s23 + $0x258] sm:$0xff] %vm1840_vm1, %v4053_v58  ;;  %v3720_v30 = vadd.f32 %v8008_v49, %v3457_v37  ;;  %v8854_v49 = vpack.c.bf16 %v3101_v53, %v3100_v33  ;;  %v9935_v7 = vpack.c.bf16 %v9933_v42, %v9934_v61  ;;  %v4108_v53 = vld [vmem:[#allocation2 + $0x28] sm:$0xff]  ;;  %v5994_v33 = vld [vmem:[#allocation2 + $0xd9] sm:$0xff] }
 0x4ac   : > { %v9938_v42 = vld [vmem:[#allocation76_spill] sm:$0xff]  ;;  %v9939_v61 = vld [vmem:[#allocation71_spill] sm:$0xff] }
 0x4ad   : > { %v3986_v56 = vadd.f32 %v8528_v1, %v3720_v30  ;;  %v8849_v40 = vpop.f32.mrf.mxu1 }
 0x4af   : > { %v4022_v41 = vadd.f32 %v8666_v6, %v3986_v56 }
 0x4b0   : > { %v3458_v16 = vpop.f32.mrf.mxu3 }
 0x4b1   : > { %v8846_v20 = vpop.f32.mrf.mxu2  ;;  %v4054_v26 = vmax.f32 %v4022_v41, 0.0  ;;  %v3459_v0 = vadd.f32 %v3458_v16, %v8699_v11 }
 0x4b3   : > { %5715 = vst.msk [vmem:[%s7482_s23 + $0x260] sm:$0xff] %vm1840_vm1, %v4054_v26  ;;  %v3721_v59 = vadd.f32 %v9929_v35, %v3459_v0  ;;  %v9936_v35 = vld [vmem:[#allocation117_spill] sm:$0xff] }
 0x4b5   : > { %v3987_v1 = vadd.f32 %v8549_v19, %v3721_v59  ;;  %5646 = vmatmul.msk.bf16.gmra.mxu3 %vm570_vm0, %v8854_v49  ;;  %v8874_v30 = vpop.f32.mrf.mxu1  ;;  %v4107_v59 = vld [vmem:[#allocation2 + $0x20] sm:$0xff] }
 0x4b6   : > { %5755 = vmatmul.msk.bf16.gmra.mxu2 %vm570_vm0, %v9932_v3  ;;  %5836 = vmatmul.msk.bf16.gmra.mxu1 %vm570_vm0, %v9935_v7 }
 0x4b7   : > { %v4023_v11 = vadd.f32 %v8666_v6, %v3987_v1  ;;  %v4139_v1 = vpack.c.bf16 %v4108_v53, %v4107_v59  ;;  %v9941_v59 = vld [vmem:[#allocation124_spill] sm:$0xff] }
 0x4b8   : > { %v3461_v28 = vpop.f32.mrf.mxu3 }
 0x4b9   : > { %v4055_v15 = vmax.f32 %v4023_v11, 0.0  ;;  %v3462_v19 = vadd.f32 %v3461_v28, %v8718_v5  ;;  %v8869_v58 = vpop.f32.mrf.mxu2  ;;  %v4830_v5 = vmul.f32 %v5994_v33, %v9936_v35 }
 0x4bb   : > { %5716 = vst.msk [vmem:[%s7482_s23 + $0x268] sm:$0xff] %vm1840_vm1, %v4055_v15  ;;  %v3722_v37 = vadd.f32 %v8063_v50, %v3462_v19 }
 0x4bd   : > { %v3988_v56 = vadd.f32 %v8568_v39, %v3722_v37  ;;  %v4829_v39 = vmul.f32 %v5995_v4, %v9937_v55  ;;  %v8892_v28 = vpop.f32.mrf.mxu1  ;;  %v9942_v4 = vld [vmem:[#allocation123_spill] sm:$0xff] }
 0x4bf   : > { %v4024_v41 = vadd.f32 %v8666_v6, %v3988_v56  ;;  %v4851_v7 = vpack.c.bf16 %v4830_v5, %v4829_v39  ;;  %v5996_v5 = vld [vmem:[#allocation2 + $0xe9] sm:$0xff] }
 0x4c0   : > { %v3463_v16 = vpop.f32.mrf.mxu3 }
 0x4c1   : > { %v4056_v26 = vmax.f32 %v4024_v41, 0.0  ;;  %v3464_v0 = vadd.f32 %v3463_v16, %v8728_v44  ;;  %v8884_v3 = vpop.f32.mrf.mxu2  ;;  %v9940_v44 = vpack.c.bf16 %v9938_v42, %v9939_v61  ;;  %v9944_v42 = vld [vmem:[#allocation79_spill] sm:$0xff] }
 0x4c3   : > { %5717 = vst.msk [vmem:[%s7482_s23 + $0x270] sm:$0xff] %vm1840_vm1, %v4056_v26  ;;  %v3723_v50 = vadd.f32 %v8084_v18, %v3464_v0  ;;  %v4110_v26 = vld [vmem:[#allocation2 + $0x38] sm:$0xff] }
 0x4c5   : > { %v3989_v11 = vadd.f32 %v8588_v63, %v3723_v50  ;;  %5775 = vmatmul.msk.bf16.vlgmr.msra.gmra.mxu3 %vm570_vm0, %v4139_v1  ;;  %v8904_v0 = vpop.f32.mrf.mxu1  ;;  %v4109_v50 = vld [vmem:[#allocation2 + $0x30] sm:$0xff]  ;;  %v5997_v1 = vld [vmem:[#allocation2 + $0xe1] sm:$0xff] }
 0x4c6   : > { %5756 = vmatmul.msk.bf16.gmra.mxu2 %vm570_vm0, %v9940_v44  ;;  %5837 = vmatmul.msk.bf16.gmra.mxu1 %vm570_vm0, %v4851_v7  ;;  %v4831_v55 = vmul.f32 %v5997_v1, %v9942_v4 }
 0x4c7   : > { %v4025_v18 = vadd.f32 %v8666_v6, %v3989_v11  ;;  %v9943_v11 = vld [vmem:[#allocation84_spill] sm:$0xff] }
 0x4c8   : > { %v3466_v15 = vpop.f32.mrf.mxu3  ;;  %v9945_v61 = vpack.c.bf16 %v9943_v11, %v9944_v42 }
 0x4c9   : > { %v4057_v19 = vmax.f32 %v4025_v18, 0.0  ;;  %v3467_v37 = vadd.f32 %v3466_v15, %v8748_v34  ;;  %v8901_v41 = vpop.f32.mrf.mxu2  ;;  %v4832_v34 = vmul.f32 %v5996_v5, %v9941_v59 }
 0x4cb   : > { %5718 = vst.msk [vmem:[%s7482_s23 + $0x278] sm:$0xff] %vm1840_vm1, %v4057_v19  ;;  %v3724_v63 = vadd.f32 %v8110_v46, %v3467_v37 }
 0x4cd   : > { %v3990_v56 = vadd.f32 %v8611_v10, %v3724_v63  ;;  %v4140_v10 = vpack.c.bf16 %v4110_v26, %v4109_v50 }
 0x4cf   : > { %v4026_v16 = vadd.f32 %v8666_v6, %v3990_v56 }
 0x4d0   : > { %v3468_v53 = vpop.f32.mrf.mxu3 }
 0x4d1   : > { %v4058_v33 = vmax.f32 %v4026_v16, 0.0  ;;  %v3469_v35 = vadd.f32 %v3468_v53, %v8756_v31  ;;  %v4852_v31 = vpack.c.bf16 %v4832_v34, %v4831_v55  ;;  %v8920_v7 = vpop.f32.mrf.mxu2  ;;  %v4112_v16 = vld [vmem:[#allocation2 + $0x48] sm:$0xff]  ;;  %v9950_v55 = vld [vmem:[#allocation87_spill] sm:$0xff] }
 0x4d2   : > { %v9947_v34 = vld [vmem:[#allocation188_spill] sm:$0xff] }
 0x4d3   : > { %5719 = vst.msk [vmem:[%s7482_s23 + $0x280] sm:$0xff] %vm1840_vm1, %v4058_v33  ;;  %v3725_v46 = vadd.f32 %v8136_v13, %v3469_v35  ;;  %v5998_v33 = vld [vmem:[#allocation2 + $0xf9] sm:$0xff] }
 0x4d4   : > { %v9946_v35 = vld [vmem:[#allocation130_spill] sm:$0xff] }
 0x4d5   : > { %v3991_v39 = vadd.f32 %v8631_v52, %v3725_v46  ;;  %5776 = vmatmul.msk.bf16.gmra.mxu3 %vm570_vm0, %v4140_v10  ;;  %v8923_v52 = vpop.f32.mrf.mxu1  ;;  %v4834_v5 = vmul.f32 %v5998_v33, %v9946_v35  ;;  %v9948_v46 = vld [vmem:[#allocation129_spill] sm:$0xff]  ;;  %v9953_v33 = vld [vmem:[#allocation135_spill] sm:$0xff] }
 0x4d6   : > { %5757 = vmatmul.msk.bf16.gmra.mxu2 %vm570_vm0, %v9945_v61  ;;  %5838 = vmatmul.msk.bf16.gmra.mxu1 %vm570_vm0, %v4852_v31  ;;  %v4113_v35 = vld [vmem:[#allocation2 + $0x50] sm:$0xff] }
 0x4d7   : > { %v4027_v44 = vadd.f32 %v8666_v6, %v3991_v39 }
 0x4d8   : > { %v3471_v13 = vpop.f32.mrf.mxu3 }
 0x4d9   : > { %v4059_v18 = vmax.f32 %v4027_v44, 0.0  ;;  %v3472_v15 = vadd.f32 %v3471_v13, %v8778_v21  ;;  %v8932_v59 = vpop.f32.mrf.mxu2  ;;  %v4111_v21 = vld [vmem:[#allocation2 + $0x40] sm:$0xff] }
 0x4da   : > { %v4141_v50 = vpack.c.bf16 %v4112_v16, %v4111_v21 }
 0x4db   : > { %5720 = vst.msk [vmem:[%s7482_s23 + $0x288] sm:$0xff] %vm1840_vm1, %v4059_v18  ;;  %v3726_v19 = vadd.f32 %v8156_v60, %v3472_v15 }
 0x4dd   : > { %v3992_v37 = vadd.f32 %v8644_v27, %v3726_v19  ;;  %v5999_v27 = vld [vmem:[#allocation2 + $0xf1] sm:$0xff]  ;;  %v8938_v1 = vpop.f32.mrf.mxu1 }
 0x4de   : > { %v4833_v10 = vmul.f32 %v5999_v27, %v9948_v46  ;;  %v9956_v46 = vld [vmem:[#allocation102_spill] sm:$0xff] }
 0x4df   : > { %v4028_v63 = vadd.f32 %v8666_v6, %v3992_v37 }
 0x4e0   : > { %v3473_v56 = vpop.f32.mrf.mxu3  ;;  %v4853_v11 = vpack.c.bf16 %v4834_v5, %v4833_v10  ;;  %v9954_v5 = vld [vmem:[#allocation80_spill] sm:$0xff] }
 0x4e1   : > { %v4060_v53 = vmax.f32 %v4028_v63, 0.0  ;;  %v3474_v26 = vadd.f32 %v3473_v56, %v8788_v36  ;;  %v9949_v36 = vld [vmem:[#allocation92_spill] sm:$0xff]  ;;  %v8952_v18 = vpop.f32.mrf.mxu2  ;;  %v4114_v56 = vld [vmem:[#allocation2 + $0x58] sm:$0xff] }
 0x4e2   : > { %v9951_v39 = vpack.c.bf16 %v9949_v36, %v9950_v55  ;;  %v9957_v10 = vld [vmem:[#allocation96_spill] sm:$0xff] }
 0x4e3   : > { %5721 = vst.msk [vmem:[%s7482_s23 + $0x290] sm:$0xff] %vm1840_vm1, %v4060_v53  ;;  %v3727_v60 = vadd.f32 %v9947_v34, %v3474_v26  ;;  %v6000_v26 = vld [vmem:[#allocation2 + $0x109] sm:$0xff]  ;;  %v4142_v34 = vpack.c.bf16 %v4114_v56, %v4113_v35  ;;  %v4115_v35 = vld [vmem:[#allocation2 + $0x60] sm:$0xff] }
 0x4e5   : > { %v3993_v4 = vadd.f32 %v8669_v14, %v3727_v60  ;;  %5777 = vmatmul.msk.bf16.gmra.mxu3 %vm570_vm0, %v4141_v50  ;;  %v9952_v14 = vld [vmem:[#allocation81_spill] sm:$0xff]  ;;  %v8955_v19 = vpop.f32.mrf.mxu1  ;;  %v9955_v60 = vld [vmem:[#allocation136_spill] sm:$0xff] }
 0x4e6   : > { %5758 = vmatmul.msk.bf16.gmra.mxu2 %vm570_vm0, %v9951_v39  ;;  %5839 = vmatmul.msk.bf16.gmra.mxu1 %vm570_vm0, %v4853_v11 }
 0x4e7   : > { %v4029_v42 = vadd.f32 %v8666_v6, %v3993_v4  ;;  %v9958_v4 = vpack.c.bf16 %v9956_v46, %v9957_v10 }
 0x4e8   : > { %v3476_v61 = vpop.f32.mrf.mxu3 }
 0x4e9   : > { %v4061_v31 = vmax.f32 %v4029_v42, 0.0  ;;  %v3477_v44 = vadd.f32 %v3476_v61, %v8808_v25  ;;  %v4836_v25 = vmul.f32 %v6000_v26, %v9953_v33  ;;  %v8970_v36 = vpop.f32.mrf.mxu2  ;;  %v9959_v61 = vld [vmem:[#allocation161_spill] sm:$0xff]  ;;  %v9961_v33 = vld [vmem:[#allocation143_spill] sm:$0xff] }
 0x4eb   : > { %5722 = vst.msk [vmem:[%s7482_s23 + $0x298] sm:$0xff] %vm1840_vm1, %v4061_v31  ;;  %v3728_v13 = vadd.f32 %v9952_v14, %v3477_v44 }
 0x4ed   : > { %v3994_v15 = vadd.f32 %v8691_v48, %v3728_v13  ;;  %v6001_v48 = vld [vmem:[#allocation2 + $0x101] sm:$0xff]  ;;  %v8974_v11 = vpop.f32.mrf.mxu1 }
 0x4ee   : > { %v4835_v50 = vmul.f32 %v6001_v48, %v9955_v60  ;;  %v9963_v60 = vld [vmem:[#allocation112_spill] sm:$0xff] }
 0x4ef   : > { %v4030_v37 = vadd.f32 %v8666_v6, %v3994_v15 }
 0x4f0   : > { %v3478_v63 = vpop.f32.mrf.mxu3 }
 0x4f1   : > { %v4062_v16 = vmax.f32 %v4030_v37, 0.0  ;;  %v3479_v53 = vadd.f32 %v3478_v63, %v8818_v17  ;;  %v4854_v17 = vpack.c.bf16 %v4836_v25, %v4835_v50  ;;  %v8982_v13 = vpop.f32.mrf.mxu2  ;;  %v4116_v37 = vld [vmem:[#allocation2 + $0x68] sm:$0xff]  ;;  %v9964_v50 = vld [vmem:[#allocation106_spill] sm:$0xff] }
 0x4f3   : > { %5723 = vst.msk [vmem:[%s7482_s23 + $0x2a0] sm:$0xff] %vm1840_vm1, %v4062_v16  ;;  %v3729_v21 = vadd.f32 %v9954_v5, %v3479_v53  ;;  %v6002_v16 = vld [vmem:[#allocation2 + $0x111] sm:$0xff] }
 0x4f4   : > { %v9960_v53 = vld [vmem:[#allocation142_spill] sm:$0xff] }
 0x4f5   : > { %v3995_v27 = vadd.f32 %v8702_v23, %v3729_v21  ;;  %5778 = vmatmul.msk.bf16.gmra.mxu3 %vm570_vm0, %v4142_v34  ;;  %v4837_v26 = vmul.f32 %v6002_v16, %v9960_v53  ;;  %v8987_v5 = vpop.f32.mrf.mxu1  ;;  %v4143_v34 = vpack.c.bf16 %v4116_v37, %v4115_v35  ;;  %v9967_v37 = vld [vmem:[#allocation149_spill] sm:$0xff] }
 0x4f6   : > { %5759 = vmatmul.msk.bf16.gmra.mxu2 %vm570_vm0, %v9958_v4  ;;  %5840 = vmatmul.msk.bf16.gmra.mxu1 %vm570_vm0, %v4854_v17 }
 0x4f7   : > { %v4031_v55 = vadd.f32 %v8666_v6, %v3995_v27 }
 0x4f8   : > { %v3481_v39 = vpop.f32.mrf.mxu3 }
 0x4f9   : > { %v4063_v42 = vmax.f32 %v4031_v55, 0.0  ;;  %v3482_v23 = vadd.f32 %v3481_v39, %v8836_v32  ;;  %v6003_v32 = vld [vmem:[#allocation2 + $0x119] sm:$0xff]  ;;  %v9001_v55 = vpop.f32.mrf.mxu2 }
 0x4fa   : > { %v4838_v25 = vmul.f32 %v6003_v32, %v9961_v33  ;;  %v9969_v32 = vld [vmem:[#allocation194_spill] sm:$0xff] }
 0x4fb   : > { %5724 = vst.msk [vmem:[%s7482_s23 + $0x2a8] sm:$0xff] %vm1840_vm1, %v4063_v42  ;;  %v3730_v31 = vadd.f32 %v9959_v61, %v3482_v23  ;;  %v4807_v61 = vld [vmem:[#allocation2 + $0x121] sm:$0xff] }
 0x4fc   : > { %v4855_v27 = vpack.c.bf16 %v4838_v25, %v4837_v26  ;;  %v4117_v26 = vld [vmem:[#allocation2 + $0x70] sm:$0xff] }
 0x4fd   : > { %v3996_v44 = vadd.f32 %v8724_v24, %v3730_v31  ;;  %v9962_v24 = vld [vmem:[#allocation191_spill] sm:$0xff]  ;;  %v9006_v42 = vpop.f32.mrf.mxu1  ;;  %v4808_v31 = vld [vmem:[#allocation2 + $0x129] sm:$0xff] }
 0x4ff   : > { %v4032_v14 = vadd.f32 %v8666_v6, %v3996_v44 }
 0x500   : > { %v3483_v15 = vpop.f32.mrf.mxu3 }
 0x501   : > { %v4064_v63 = vmax.f32 %v4032_v14, 0.0  ;;  %v3484_v56 = vadd.f32 %v3483_v15, %v8846_v20  ;;  %v9965_v20 = vpack.c.bf16 %v9963_v60, %v9964_v50  ;;  %v4118_v15 = vld [vmem:[#allocation2 + $0x78] sm:$0xff]  ;;  %v9016_v25 = vpop.f32.mrf.mxu2 }
 0x503   : > { %5725 = vst.msk [vmem:[%s7482_s23 + $0x2b0] sm:$0xff] %vm1840_vm1, %v4064_v63  ;;  %v3731_v21 = vadd.f32 %v9962_v24, %v3484_v56  ;;  %v4839_v63 = vmul.f32 %v4807_v61, %v9967_v37  ;;  %v9975_v37 = vld [vmem:[#allocation126_spill] sm:$0xff] }
 0x505   : > { %v3997_v48 = vadd.f32 %v8741_v62, %v3731_v21  ;;  %5779 = vmatmul.msk.bf16.gmra.mxu3 %vm570_vm0, %v4143_v34  ;;  %v9966_v62 = vld [vmem:[#allocation163_spill] sm:$0xff]  ;;  %v9970_v21 = vld [vmem:[#allocation120_spill] sm:$0xff] }
 0x506   : > { %5760 = vmatmul.msk.bf16.gmra.mxu2 %vm570_vm0, %v9965_v20  ;;  %5841 = vmatmul.msk.bf16.gmra.mxu1 %vm570_vm0, %v4855_v27  ;;  %v9971_v34 = vld [vmem:[#allocation116_spill] sm:$0xff] }
 0x507   : > { %v4033_v46 = vadd.f32 %v8666_v6, %v3997_v48  ;;  %v9972_v48 = vpack.c.bf16 %v9970_v21, %v9971_v34  ;;  %v4121_v34 = vld [vmem:[#allocation2 + $0x90] sm:$0xff] }
 0x508   : > { %v3486_v10 = vpop.f32.mrf.mxu3 }
 0x509   : > { %v4065_v4 = vmax.f32 %v4033_v46, 0.0  ;;  %v3487_v17 = vadd.f32 %v3486_v10, %v8869_v58  ;;  %v9968_v58 = vld [vmem:[#allocation150_spill] sm:$0xff] }
 0x50a   : > { %v4840_v56 = vmul.f32 %v4808_v31, %v9968_v58  ;;  %v4119_v31 = vld [vmem:[#allocation2 + $0x80] sm:$0xff] }
 0x50b   : > { %5726 = vst.msk [vmem:[%s7482_s23 + $0x2b8] sm:$0xff] %vm1840_vm1, %v4065_v4  ;;  %v3732_v39 = vadd.f32 %v9966_v62, %v3487_v17  ;;  %v9033_v4 = vpop.f32.mrf.mxu2 }
 0x50c   : > { %v4856_v35 = vpack.c.bf16 %v4840_v56, %v4839_v63 }
 0x50d   : > { %v3998_v23 = vadd.f32 %v8758_v12, %v3732_v39  ;;  %v4144_v12 = vpack.c.bf16 %v4118_v15, %v4117_v26  ;;  %v4120_v39 = vld [vmem:[#allocation2 + $0x88] sm:$0xff] }
 0x50f   : > { %v4034_v44 = vadd.f32 %v8666_v6, %v3998_v23 }
 0x510   : > { %v3488_v14 = vpop.f32.mrf.mxu3 }
 0x511   : > { %v4066_v16 = vmax.f32 %v4034_v44, 0.0  ;;  %v3489_v53 = vadd.f32 %v3488_v14, %v8884_v3  ;;  %v9024_v3 = vpop.f32.mrf.mxu1  ;;  %v4145_v14 = vpack.c.bf16 %v4120_v39, %v4119_v31 }
 0x513   : > { %5727 = vst.msk [vmem:[%s7482_s23 + $0x2c0] sm:$0xff] %vm1840_vm1, %v4066_v16  ;;  %v3733_v33 = vadd.f32 %v9969_v32, %v3489_v53  ;;  %v9047_v56 = vpop.f32.mrf.mxu2 }
 0x515   : > { %v3999_v24 = vadd.f32 %v8781_v38, %v3733_v33  ;;  %5780 = vmatmul.msk.bf16.gmra.mxu3 %vm570_vm0, %v4144_v12  ;;  %v9973_v38 = vld [vmem:[#allocation89_spill] sm:$0xff]  ;;  %v4122_v12 = vld [vmem:[#allocation2 + $0x98] sm:$0xff] }
 0x516   : > { %5761 = vmatmul.msk.bf16.gmra.mxu2 %vm570_vm0, %v9972_v48  ;;  %5842 = vmatmul.msk.bf16.gmra.mxu1 %vm570_vm0, %v4856_v35 }
 0x517   : > { %v4035_v60 = vadd.f32 %v8666_v6, %v3999_v24 }
 0x518   : > { %v3491_v50 = vpop.f32.mrf.mxu3 }
 0x519   : > { %v4067_v20 = vmax.f32 %v4035_v60, 0.0  ;;  %v3492_v27 = vadd.f32 %v3491_v50, %v8901_v41  ;;  %v9974_v41 = vld [vmem:[#allocation88_spill] sm:$0xff]  ;;  %v4146_v60 = vpack.c.bf16 %v4122_v12, %v4121_v34  ;;  %v4125_v12 = vld [vmem:[#allocation2 + $0xb0] sm:$0xff] }
 0x51a   : > { %v9979_v50 = vld [vmem:[#allocation132_spill] sm:$0xff] }
 0x51b   : > { %5728 = vst.msk [vmem:[%s7482_s23 + $0x2c8] sm:$0xff] %vm1840_vm1, %v4067_v20  ;;  %v3734_v46 = vadd.f32 %v9973_v38, %v3492_v27  ;;  %v9056_v21 = vpop.f32.mrf.mxu2 }
 0x51d   : > { %v4000_v10 = vadd.f32 %v8796_v8, %v3734_v46  ;;  %v9976_v8 = vld [vmem:[#allocation125_spill] sm:$0xff] }
 0x51e   : > { %v9977_v63 = vpack.c.bf16 %v9975_v37, %v9976_v8 }
 0x51f   : > { %v4036_v17 = vadd.f32 %v8666_v6, %v4000_v10 }
 0x520   : > { %v3493_v62 = vpop.f32.mrf.mxu3 }
 0x521   : > { %v4068_v23 = vmax.f32 %v4036_v17, 0.0  ;;  %v3494_v61 = vadd.f32 %v3493_v62, %v8920_v7 }
 0x523   : > { %5729 = vst.msk [vmem:[%s7482_s23 + $0x2d0] sm:$0xff] %vm1840_vm1, %v4068_v23  ;;  %v3735_v44 = vadd.f32 %v9974_v41, %v3494_v61  ;;  %v9072_v17 = vpop.f32.mrf.mxu2  ;;  %v4124_v23 = vld [vmem:[#allocation2 + $0xa8] sm:$0xff]  ;;  %v4123_v41 = vld [vmem:[#allocation2 + $0xa0] sm:$0xff] }
 0x525   : > { %v4001_v15 = vadd.f32 %v8815_v51, %v3735_v44  ;;  %5781 = vmatmul.msk.bf16.gmra.mxu3 %vm570_vm0, %v4145_v14  ;;  %v4147_v44 = vpack.c.bf16 %v4124_v23, %v4123_v41  ;;  %v9982_v14 = vld [vmem:[#allocation138_spill] sm:$0xff] }
 0x526   : > { %5762 = vmatmul.msk.bf16.gmra.mxu2 %vm570_vm0, %v9977_v63  ;;  %v9089_v63 = vpop.f32.mrf.mxu0 }
 0x527   : > { %v4037_v58 = vadd.f32 %v8666_v6, %v4001_v15  ;;  %v9983_v15 = vld [vmem:[#allocation137_spill] sm:$0xff] }
 0x528   : > { %v3496_v7 = vpop.f32.mrf.mxu3  ;;  %v9984_v37 = vpack.c.bf16 %v9982_v14, %v9983_v15  ;;  %v9992_v14 = vld [vmem:[#allocation152_spill] sm:$0xff] }
 0x529   : > { %v4069_v16 = vmax.f32 %v4037_v58, 0.0  ;;  %v3497_v53 = vadd.f32 %v3496_v7, %v8932_v59  ;;  %v9978_v59 = vld [vmem:[#allocation165_spill] sm:$0xff] }
 0x52b   : > { %5730 = vst.msk [vmem:[%s7482_s23 + $0x2d8] sm:$0xff] %vm1840_vm1, %v4069_v16  ;;  %v3736_v51 = vadd.f32 %v8383_v22, %v3497_v53  ;;  %v9098_v16 = vld [vmem:[%s9252_s4] ss:$0 sm:$0xff] }
 0x52d   : > { %v4002_v26 = vadd.f32 %v8838_v43, %v3736_v51  ;;  %v9980_v43 = vld [vmem:[#allocation131_spill] sm:$0xff] }
 0x52e   : > { %v9981_v20 = vpack.c.bf16 %v9979_v50, %v9980_v43 }
 0x52f   : > { %v4038_v32 = vadd.f32 %v8666_v6, %v4002_v26 }
 0x530   : > { %v3498_v33 = vpop.f32.mrf.mxu3 }
 0x531   : > { %v4070_v35 = vmax.f32 %v4038_v32, 0.0  ;;  %v3499_v24 = vadd.f32 %v3498_v33, %v8952_v18  ;;  %v4126_v32 = vld [vmem:[#allocation2 + $0xb8] sm:$0xff] }
 0x533   : > { %5731 = vst.msk [vmem:[%s7482_s23 + $0x2e0] sm:$0xff] %vm1840_vm1, %v4070_v35  ;;  %v3737_v48 = vadd.f32 %v9978_v59, %v3499_v24  ;;  %v9105_v35 = vpop.f32.mrf.mxu0  ;;  %v9986_v24 = vld [vmem:[#allocation167_spill] sm:$0xff]  ;;  %v4148_v59 = vpack.c.bf16 %v4126_v32, %v4125_v12 }
 0x535   : > { %v4003_v22 = vadd.f32 %v8849_v40, %v3737_v48  ;;  %5782 = vmatmul.msk.bf16.gmra.mxu3 %vm570_vm0, %v4146_v60  ;;  %v9987_v48 = vld [vmem:[#allocation145_spill] sm:$0xff]  ;;  %v9988_v60 = vld [vmem:[#allocation144_spill] sm:$0xff] }
 0x536   : > { %5763 = vmatmul.msk.bf16.gmra.mxu2 %vm570_vm0, %v9981_v20 }
 0x537   : > { %v4039_v18 = vadd.f32 %v8666_v6, %v4003_v22  ;;  %v9989_v22 = vpack.c.bf16 %v9987_v48, %v9988_v60 }
 0x538   : > { %v3501_v27 = vpop.f32.mrf.mxu3 }
 0x539   : > { %v4071_v38 = vmax.f32 %v4039_v18, 0.0  ;;  %v3502_v46 = vadd.f32 %v3501_v27, %v8970_v36  ;;  %v9990_v27 = vld [vmem:[#allocation197_spill] sm:$0xff] }
 0x53b   : > { %5732 = vst.msk [vmem:[%s7482_s23 + $0x2e8] sm:$0xff] %vm1840_vm1, %v4071_v38  ;;  %v3738_v10 = vadd.f32 %v8427_v45, %v3502_v46  ;;  %v4685_v38 = vpop.f32.mrf.mxu0 }
 0x53d   : > { %v4004_v40 = vadd.f32 %v8874_v30, %v3738_v10  ;;  %v9086_v30 = vpop.f32.mrf.mxu2  ;;  %v4950_v10 = vpop.f32.mrf.mxu1 }
 0x53f   : > { %v4040_v62 = vadd.f32 %v8666_v6, %v4004_v40 }
 0x540   : > { %v3503_v39 = vpop.f32.mrf.mxu3 }
 0x541   : > { %v4072_v61 = vmax.f32 %v4040_v62, 0.0  ;;  %v3504_v31 = vadd.f32 %v3503_v39, %v8982_v13  ;;  %v4128_v39 = vld [vmem:[#allocation2 + $0xc8] sm:$0xff] }
 0x543   : > { %5733 = vst.msk [vmem:[%s7482_s23 + $0x2f0] sm:$0xff] %vm1840_vm1, %v4072_v61  ;;  %v3739_v36 = vadd.f32 %v8443_v9, %v3504_v31  ;;  %v4127_v31 = vld [vmem:[#allocation2 + $0xc0] sm:$0xff] }
 0x545   : > { %v4005_v45 = vadd.f32 %v8892_v28, %v3739_v36  ;;  %5783 = vmatmul.msk.bf16.gmra.mxu3 %vm570_vm0, %v4147_v44  ;;  %v9985_v28 = vld [vmem:[#allocation46_spill] sm:$0xff]  ;;  %v9102_v51 = vpop.f32.mrf.mxu2  ;;  %v4149_v36 = vpack.c.bf16 %v4128_v39, %v4127_v31 }
 0x546   : > { %5764 = vmatmul.msk.bf16.gmra.mxu2 %vm570_vm0, %v9984_v37  ;;  %v4687_v37 = vpop.f32.mrf.mxu0 }
 0x547   : > { %v4041_v8 = vadd.f32 %v8666_v6, %v4005_v45 }
 0x548   : > { %v4463_v13 = vpop.f32.mrf.mxu3 }
 0x549   : > { %v4073_v58 = vmax.f32 %v4041_v8, 0.0  ;;  %v4464_v9 = vadd.f32 %v4463_v13, %v9001_v55  ;;  %v4952_v8 = vpop.f32.mrf.mxu1 }
 0x54b   : > { %5734 = vst.msk [vmem:[%s7482_s23 + $0x2f8] sm:$0xff] %vm1840_vm1, %v4073_v58  ;;  %v4745_v7 = vadd.f32 %v9985_v28, %v4464_v9 }
 0x54d   : > { %v5010_v53 = vadd.f32 %v8904_v0, %v4745_v7  ;;  %v9118_v18 = vpop.f32.mrf.mxu2 }
 0x54f   : > { %v5046_v6 = vadd.f32 %v9098_v16, %v5010_v53 }
 0x550   : > { %v4465_v26 = vpop.f32.mrf.mxu3 }
 0x551   : > { %v5078_v33 = vmax.f32 %v5046_v6, 0.0  ;;  %v4466_v55 = vadd.f32 %v4465_v26, %v9016_v25  ;;  %v4690_v26 = vpop.f32.mrf.mxu0 }
 0x553   : > { %5843 = vst.msk [vmem:[%s7482_s23 + $0x300] sm:$0xff] %vm1840_vm1, %v5078_v33  ;;  %v4746_v34 = vadd.f32 %v9986_v24, %v4466_v55  ;;  %v4955_v55 = vpop.f32.mrf.mxu1 }
 0x555   : > { %v5011_v0 = vadd.f32 %v8923_v52, %v4746_v34  ;;  %5784 = vmatmul.msk.bf16.gmra.mxu3 %vm570_vm0, %v4148_v59  ;;  %v4336_v44 = vpop.f32.mrf.mxu2 }
 0x556   : > { %5765 = vmatmul.msk.bf16.gmra.mxu2 %vm570_vm0, %v9989_v22 }
 0x557   : > { %v5047_v50 = vadd.f32 %v9098_v16, %v5011_v0 }
 0x558   : > { %v4468_v25 = vpop.f32.mrf.mxu3 }
 0x559   : > { %v5079_v43 = vmax.f32 %v5047_v50, 0.0  ;;  %v4469_v20 = vadd.f32 %v4468_v25, %v9033_v4  ;;  %v9991_v4 = vld [vmem:[#allocation99_spill] sm:$0xff]  ;;  %v4692_v0 = vpop.f32.mrf.mxu0 }
 0x55b   : > { %5844 = vst.msk [vmem:[%s7482_s23 + $0x308] sm:$0xff] %vm1840_vm1, %v5079_v43  ;;  %v4747_v52 = vadd.f32 %v9990_v27, %v4469_v20  ;;  %v4957_v48 = vpop.f32.mrf.mxu1 }
 0x55d   : > { %v5012_v46 = vadd.f32 %v8938_v1, %v4747_v52  ;;  %v9993_v1 = vld [vmem:[#allocation151_spill] sm:$0xff]  ;;  %v4339_v7 = vpop.f32.mrf.mxu2 }
 0x55e   : > { %v9994_v15 = vpack.c.bf16 %v9992_v14, %v9993_v1 }
 0x55f   : > { %v5048_v40 = vadd.f32 %v9098_v16, %v5012_v46 }
 0x560   : > { %v4470_v62 = vpop.f32.mrf.mxu3 }
 0x561   : > { %v5080_v23 = vmax.f32 %v5048_v40, 0.0  ;;  %v4471_v61 = vadd.f32 %v4470_v62, %v9047_v56  ;;  %v4695_v25 = vpop.f32.mrf.mxu0 }
 0x563   : > { %5845 = vst.msk [vmem:[%s7482_s23 + $0x310] sm:$0xff] %vm1840_vm1, %v5080_v23  ;;  %v4748_v41 = vadd.f32 %v9991_v4, %v4471_v61  ;;  %v4573_v4 = vld [vmem:[#allocation2 + $0x120] sm:$0xff] }
 0x565   : > { %v5013_v45 = vadd.f32 %v8955_v19, %v4748_v41  ;;  %5785 = vmatmul.msk.bf16.gmra.mxu3 %vm570_vm0, %v4149_v36 }
 0x566   : > { %5766 = vmatmul.msk.bf16.gmra.mxu2 %vm570_vm0, %v9994_v15 }
 0x567   : > { %v5049_v56 = vadd.f32 %v9098_v16, %v5013_v45 }
 0x568   : > { %v4473_v13 = vpop.f32.mrf.mxu3 }
 0x569   : > { %v5081_v58 = vmax.f32 %v5049_v56, 0.0  ;;  %v4474_v9 = vadd.f32 %v4473_v13, %v9056_v21  ;;  %v4136_v13 = vld [vmem:[#allocation2 + $0x108] sm:$0xff] }
 0x56b   : > { %5846 = vst.msk [vmem:[%s7482_s23 + $0x318] sm:$0xff] %vm1840_vm1, %v5081_v58  ;;  %v4749_v19 = vadd.f32 %v8552_v47, %v4474_v9 }
 0x56d   : > { %v5014_v28 = vadd.f32 %v8974_v11, %v4749_v19  ;;  %v4341_v11 = vpop.f32.mrf.mxu2  ;;  %v4135_v19 = vld [vmem:[#allocation2 + $0x100] sm:$0xff] }
 0x56f   : > { %v5050_v53 = vadd.f32 %v9098_v16, %v5014_v28 }
 0x570   : > { %v4475_v6 = vpop.f32.mrf.mxu3 }
 0x571   : > { %v5082_v32 = vmax.f32 %v5050_v53, 0.0  ;;  %v4476_v33 = vadd.f32 %v4475_v6, %v9072_v17  ;;  %v4153_v53 = vpack.c.bf16 %v4136_v13, %v4135_v19 }
 0x573   : > { %5847 = vst.msk [vmem:[%s7482_s23 + $0x320] sm:$0xff] %vm1840_vm1, %v5082_v32  ;;  %v4750_v21 = vadd.f32 %v8571_v54, %v4476_v33 }
 0x575   : > { %v5015_v12 = vadd.f32 %v8987_v5, %v4750_v21  ;;  %5786 = vmatmul.msk.bf16.gmra.mxu3 %vm570_vm0, %v8734_v57  ;;  %v4344_v50 = vpop.f32.mrf.mxu2 }
 0x577   : > { %v5051_v47 = vadd.f32 %v9098_v16, %v5015_v12 }
 0x578   : > { %v4478_v24 = vpop.f32.mrf.mxu3 }
 0x579   : > { %v5083_v34 = vmax.f32 %v5051_v47, 0.0  ;;  %v4479_v59 = vadd.f32 %v4478_v24, %v9086_v30 }
 0x57b   : > { %5848 = vst.msk [vmem:[%s7482_s23 + $0x328] sm:$0xff] %vm1840_vm1, %v5083_v34  ;;  %v4751_v17 = vadd.f32 %v9089_v63, %v4479_v59 }
 0x57d   : > { %v5016_v54 = vadd.f32 %v9006_v42, %v4751_v17  ;;  %v4960_v42 = vpop.f32.mrf.mxu1  ;;  %v4346_v46 = vpop.f32.mrf.mxu2 }
 0x57f   : > { %v5052_v5 = vadd.f32 %v9098_v16, %v5016_v54 }
 0x580   : > { %v4480_v57 = vpop.f32.mrf.mxu3 }
 0x581   : > { %v5084_v60 = vmax.f32 %v5052_v5, 0.0  ;;  %v4481_v22 = vadd.f32 %v4480_v57, %v9102_v51 }
 0x583   : > { %5849 = vst.msk [vmem:[%s7482_s23 + $0x330] sm:$0xff] %vm1840_vm1, %v5084_v60  ;;  %v4752_v30 = vadd.f32 %v9105_v35, %v4481_v22  ;;  %v4697_v35 = vpop.f32.mrf.mxu0 }
 0x585   : > { %v5017_v43 = vadd.f32 %v9024_v3, %v4752_v30  ;;  %5787 = vmatmul.msk.bf16.gmra.mxu3 %vm570_vm0, %v8764_v2  ;;  %v4962_v3 = vpop.f32.mrf.mxu1 }
 0x587   : > { %v5053_v63 = vadd.f32 %v9098_v16, %v5017_v43 }
 0x588   : > { %v4483_v20 = vpop.f32.mrf.mxu3 }
 0x589   : > { %v5085_v27 = vmax.f32 %v5053_v63, 0.0  ;;  %v4484_v52 = vadd.f32 %v4483_v20, %v9118_v18  ;;  %v4349_v18 = vpop.f32.mrf.mxu2 }
 0x58b   : > { %5850 = vst.msk [vmem:[%s7482_s23 + $0x338] sm:$0xff] %vm1840_vm1, %v5085_v27  ;;  %v4753_v51 = vadd.f32 %v4685_v38, %v4484_v52  ;;  %v4700_v45 = vpop.f32.mrf.mxu0 }
 0x58d   : > { %v5018_v40 = vadd.f32 %v4950_v10, %v4753_v51  ;;  %v4574_v10 = vld [vmem:[#allocation2 + $0x128] sm:$0xff] }
 0x58e   : > { %v4590_v36 = vpack.c.bf16 %v4574_v10, %v4573_v4 }
 0x58f   : > { %v5054_v62 = vadd.f32 %v9098_v16, %v5018_v40 }
 0x590   : > { %v4485_v39 = vpop.f32.mrf.mxu3  ;;  %5818 = vmatmul.msk.bf16.gmra.mxu0 %vm570_vm0, %v4590_v36 }
 0x591   : > { %v5086_v23 = vmax.f32 %v5054_v62, 0.0  ;;  %v4486_v2 = vadd.f32 %v4485_v39, %v4336_v44  ;;  %v4965_v44 = vpop.f32.mrf.mxu1  ;;  %v4351_v56 = vpop.f32.mrf.mxu2 }
 0x593   : > { %5851 = vst.msk [vmem:[%s7482_s23 + $0x340] sm:$0xff] %vm1840_vm1, %v5086_v23  ;;  %v4754_v61 = vadd.f32 %v4687_v37, %v4486_v2  ;;  %v4702_v28 = vpop.f32.mrf.mxu0 }
 0x595   : > { %v5019_v31 = vadd.f32 %v4952_v8, %v4754_v61  ;;  %5788 = vmatmul.msk.bf16.gmra.mxu3 %vm570_vm0, %v8794_v29 }
 0x597   : > { %v5055_v38 = vadd.f32 %v9098_v16, %v5019_v31 }
 0x598   : > { %v4488_v41 = vpop.f32.mrf.mxu3 }
 0x599   : > { %v5087_v14 = vmax.f32 %v5055_v38, 0.0  ;;  %v4489_v1 = vadd.f32 %v4488_v41, %v4339_v7  ;;  %v4967_v6 = vpop.f32.mrf.mxu1  ;;  %v4354_v12 = vpop.f32.mrf.mxu2 }
 0x59b   : > { %5852 = vst.msk [vmem:[%s7482_s23 + $0x348] sm:$0xff] %vm1840_vm1, %v5087_v14  ;;  %v4755_v15 = vadd.f32 %v4690_v26, %v4489_v1 }
 0x59d   : > { %v5020_v37 = vadd.f32 %v4955_v55, %v4755_v15 }
 0x59f   : > { %v5056_v29 = vadd.f32 %v9098_v16, %v5020_v37 }
 0x5a0   : > { %v4490_v8 = vpop.f32.mrf.mxu3 }
 0x5a1   : > { %v5088_v58 = vmax.f32 %v5056_v29, 0.0  ;;  %v4491_v9 = vadd.f32 %v4490_v8, %v4341_v11  ;;  %v4705_v11 = vpop.f32.mrf.mxu0  ;;  %v4970_v34 = vpop.f32.mrf.mxu1 }
 0x5a2   : > { %v4356_v5 = vpop.f32.mrf.mxu2 }
 0x5a3   : > { %5853 = vst.msk [vmem:[%s7482_s23 + $0x350] sm:$0xff] %vm1840_vm1, %v5088_v58  ;;  %v4756_v7 = vadd.f32 %v4692_v0, %v4491_v9 }
 0x5a5   : > { %v5021_v32 = vadd.f32 %v4957_v48, %v4756_v7  ;;  %5789 = vmatmul.msk.bf16.gmra.mxu3 %vm570_vm0, %v4153_v53 }
 0x5a7   : > { %v5057_v26 = vadd.f32 %v9098_v16, %v5021_v32 }
 0x5a8   : > { %v4493_v33 = vpop.f32.mrf.mxu3 }
 0x5a9   : > { %v5089_v55 = vmax.f32 %v5057_v26, 0.0  ;;  %v4494_v21 = vadd.f32 %v4493_v33, %v4344_v50  ;;  %v4707_v60 = vpop.f32.mrf.mxu0  ;;  %v4972_v50 = vpop.f32.mrf.mxu1 }
 0x5aa   : > { %v4359_v20 = vpop.f32.mrf.mxu2 }
 0x5ab   : > { %5854 = vst.msk [vmem:[%s7482_s23 + $0x358] sm:$0xff] %vm1840_vm1, %v5089_v55  ;;  %v4757_v47 = vadd.f32 %v4695_v25, %v4494_v21 }
 0x5ad   : > { %v5022_v24 = vadd.f32 %v4960_v42, %v4757_v47 }
 0x5af   : > { %v5058_v59 = vadd.f32 %v9098_v16, %v5022_v24 }
 0x5b0   : > { %v4495_v0 = vpop.f32.mrf.mxu3 }
 0x5b1   : > { %v5090_v17 = vmax.f32 %v5058_v59, 0.0  ;;  %v4496_v48 = vadd.f32 %v4495_v0, %v4346_v46  ;;  %v4710_v51 = vpop.f32.mrf.mxu0  ;;  %v4975_v40 = vpop.f32.mrf.mxu1 }
 0x5b2   : > { %v4361_v39 = vpop.f32.mrf.mxu2 }
 0x5b3   : > { %5855 = vst.msk [vmem:[%s7482_s23 + $0x360] sm:$0xff] %vm1840_vm1, %v5090_v17  ;;  %v4758_v54 = vadd.f32 %v4697_v35, %v4496_v48 }
 0x5b5   : > { %v5023_v57 = vadd.f32 %v4962_v3, %v4758_v54  ;;  %5790 = vmatmul.msk.bf16.gmra.mxu3 %vm570_vm0, %v8854_v49 }
 0x5b7   : > { %v5059_v22 = vadd.f32 %v9098_v16, %v5023_v57 }
 0x5b8   : > { %v4498_v30 = vpop.f32.mrf.mxu3 }
 0x5b9   : > { %v5091_v25 = vmax.f32 %v5059_v22, 0.0  ;;  %v4499_v43 = vadd.f32 %v4498_v30, %v4349_v18  ;;  %v4712_v31 = vpop.f32.mrf.mxu0  ;;  %v4977_v38 = vpop.f32.mrf.mxu1 }
 0x5ba   : > { %v4364_v14 = vpop.f32.mrf.mxu2 }
 0x5bb   : > { %5856 = vst.msk [vmem:[%s7482_s23 + $0x368] sm:$0xff] %vm1840_vm1, %v5091_v25  ;;  %v4759_v42 = vadd.f32 %v4700_v45, %v4499_v43 }
 0x5bd   : > { %v5024_v63 = vadd.f32 %v4965_v44, %v4759_v42 }
 0x5bf   : > { %v5060_v27 = vadd.f32 %v9098_v16, %v5024_v63 }
 0x5c0   : > { %v4500_v52 = vpop.f32.mrf.mxu3 }
 0x5c1   : > { %v5092_v46 = vmax.f32 %v5060_v27, 0.0  ;;  %v4501_v49 = vadd.f32 %v4500_v52, %v4351_v56  ;;  %v4715_v44 = vpop.f32.mrf.mxu0  ;;  %v4980_v37 = vpop.f32.mrf.mxu1 }
 0x5c2   : > { %v4366_v9 = vpop.f32.mrf.mxu2 }
 0x5c3   : > { %5857 = vst.msk [vmem:[%s7482_s23 + $0x370] sm:$0xff] %vm1840_vm1, %v5092_v46  ;;  %v4760_v35 = vadd.f32 %v4702_v28, %v4501_v49 }
 0x5c5   : > { %v5025_v62 = vadd.f32 %v4967_v6, %v4760_v35 }
 0x5c7   : > { %v5061_v3 = vadd.f32 %v9098_v16, %v5025_v62 }
 0x5c8   : > { %v4503_v23 = vpop.f32.mrf.mxu3 }
 0x5c9   : > { %v5093_v2 = vmax.f32 %v5061_v3, 0.0  ;;  %v4504_v61 = vadd.f32 %v4503_v23, %v4354_v12  ;;  %v4717_v28 = vpop.f32.mrf.mxu0  ;;  %v4982_v53 = vpop.f32.mrf.mxu1 }
 0x5ca   : > { %v4369_v21 = vpop.f32.mrf.mxu2 }
 0x5cb   : > { %5858 = vst.msk [vmem:[%s7482_s23 + $0x378] sm:$0xff] %vm1840_vm1, %v5093_v2  ;;  %v4761_v18 = vadd.f32 %v4705_v11, %v4504_v61 }
 0x5cd   : > { %v5026_v4 = vadd.f32 %v4970_v34, %v4761_v18 }
 0x5cf   : > { %v5062_v10 = vadd.f32 %v9098_v16, %v5026_v4 }
 0x5d0   : > { %v4505_v41 = vpop.f32.mrf.mxu3 }
 0x5d1   : > { %v5094_v36 = vmax.f32 %v5062_v10, 0.0  ;;  %v4506_v45 = vadd.f32 %v4505_v41, %v4356_v5  ;;  %v4720_v11 = vpop.f32.mrf.mxu0  ;;  %v4985_v59 = vpop.f32.mrf.mxu1 }
 0x5d2   : > { %v4371_v54 = vpop.f32.mrf.mxu2 }
 0x5d3   : > { %5859 = vst.msk [vmem:[%s7482_s23 + $0x380] sm:$0xff] %vm1840_vm1, %v5094_v36  ;;  %v4762_v1 = vadd.f32 %v4707_v60, %v4506_v45 }
 0x5d5   : > { %v5027_v15 = vadd.f32 %v4972_v50, %v4762_v1 }
 0x5d7   : > { %v5063_v29 = vadd.f32 %v9098_v16, %v5027_v15 }
 0x5d8   : > { %v4508_v56 = vpop.f32.mrf.mxu3 }
 0x5d9   : > { %v5095_v8 = vmax.f32 %v5063_v29, 0.0  ;;  %v4509_v13 = vadd.f32 %v4508_v56, %v4359_v20  ;;  %v4722_v22 = vpop.f32.mrf.mxu0  ;;  %v4987_v30 = vpop.f32.mrf.mxu1 }
 0x5da   : > { %v4374_v27 = vpop.f32.mrf.mxu2 }
 0x5db   : > { %5860 = vst.msk [vmem:[%s7482_s23 + $0x388] sm:$0xff] %vm1840_vm1, %v5095_v8  ;;  %v4763_v58 = vadd.f32 %v4710_v51, %v4509_v13 }
 0x5dd   : > { %v5028_v19 = vadd.f32 %v4975_v40, %v4763_v58 }
 0x5df   : > { %v5064_v7 = vadd.f32 %v9098_v16, %v5028_v19 }
 0x5e0   : > { %v4510_v6 = vpop.f32.mrf.mxu3 }
 0x5e1   : > { %v5096_v32 = vmax.f32 %v5064_v7, 0.0  ;;  %v4511_v26 = vadd.f32 %v4510_v6, %v4361_v39  ;;  %v4725_v51 = vpop.f32.mrf.mxu0  ;;  %v4990_v49 = vpop.f32.mrf.mxu1 }
 0x5e2   : > { %v4376_v23 = vpop.f32.mrf.mxu2 }
 0x5e3   : > { %5861 = vst.msk [vmem:[%s7482_s23 + $0x390] sm:$0xff] %vm1840_vm1, %v5096_v32  ;;  %v4764_v33 = vadd.f32 %v4712_v31, %v4511_v26 }
 0x5e5   : > { %v5029_v55 = vadd.f32 %v4977_v38, %v4764_v33 }
 0x5e7   : > { %v5065_v12 = vadd.f32 %v9098_v16, %v5029_v55 }
 0x5e8   : > { %v4513_v47 = vpop.f32.mrf.mxu3 }
 0x5e9   : > { %v5097_v24 = vmax.f32 %v5065_v12, 0.0  ;;  %v4514_v34 = vadd.f32 %v4513_v47, %v4364_v14  ;;  %v4727_v61 = vpop.f32.mrf.mxu0  ;;  %v4992_v18 = vpop.f32.mrf.mxu1 }
 0x5ea   : > { %v4379_v45 = vpop.f32.mrf.mxu2 }
 0x5eb   : > { %5862 = vst.msk [vmem:[%s7482_s23 + $0x398] sm:$0xff] %vm1840_vm1, %v5097_v24  ;;  %v4765_v0 = vadd.f32 %v4715_v44, %v4514_v34 }
 0x5ed   : > { %v5030_v17 = vadd.f32 %v4980_v37, %v4765_v0 }
 0x5ef   : > { %v5066_v48 = vadd.f32 %v9098_v16, %v5030_v17 }
 0x5f0   : > { %v4515_v5 = vpop.f32.mrf.mxu3 }
 0x5f1   : > { %v5098_v57 = vmax.f32 %v5066_v48, 0.0  ;;  %v4516_v60 = vadd.f32 %v4515_v5, %v4366_v9  ;;  %v4730_v44 = vpop.f32.mrf.mxu0  ;;  %v4995_v29 = vpop.f32.mrf.mxu1 }
 0x5f2   : > { %v4381_v58 = vpop.f32.mrf.mxu2 }
 0x5f3   : > { %5863 = vst.msk [vmem:[%s7482_s23 + $0x3a0] sm:$0xff] %vm1840_vm1, %v5098_v57  ;;  %v4766_v50 = vadd.f32 %v4717_v28, %v4516_v60 }
 0x5f5   : > { %v5031_v25 = vadd.f32 %v4982_v53, %v4766_v50 }
 0x5f7   : > { %v5067_v43 = vadd.f32 %v9098_v16, %v5031_v25 }
 0x5f8   : > { %v4518_v42 = vpop.f32.mrf.mxu3 }
 0x5f9   : > { %v5099_v63 = vmax.f32 %v5067_v43, 0.0  ;;  %v4519_v20 = vadd.f32 %v4518_v42, %v4369_v21  ;;  %v4732_v7 = vpop.f32.mrf.mxu0  ;;  %v4997_v6 = vpop.f32.mrf.mxu1 }
 0x5fa   : > { %v4384_v12 = vpop.f32.mrf.mxu2 }
 0x5fb   : > { %5864 = vst.msk [vmem:[%s7482_s23 + $0x3a8] sm:$0xff] %vm1840_vm1, %v5099_v63  ;;  %v4767_v52 = vadd.f32 %v4720_v11, %v4519_v20 }
 0x5fd   : > { %v5032_v46 = vadd.f32 %v4985_v59, %v4767_v52 }
 0x5ff   : > { %v5068_v40 = vadd.f32 %v9098_v16, %v5032_v46 }
 0x600   : > { %v4520_v35 = vpop.f32.mrf.mxu3 }
 0x601   : > { %v5100_v62 = vmax.f32 %v5068_v40, 0.0  ;;  %v4521_v3 = vadd.f32 %v4520_v35, %v4371_v54  ;;  %v4735_v11 = vpop.f32.mrf.mxu0  ;;  %v5000_v34 = vpop.f32.mrf.mxu1 }
 0x602   : > { %v4386_v5 = vpop.f32.mrf.mxu2 }
 0x603   : > { %5865 = vst.msk [vmem:[%s7482_s23 + $0x3b0] sm:$0xff] %vm1840_vm1, %v5100_v62  ;;  %v4768_v39 = vadd.f32 %v4722_v22, %v4521_v3 }
 0x605   : > { %v5033_v2 = vadd.f32 %v4987_v30, %v4768_v39 }
 0x607   : > { %v5069_v31 = vadd.f32 %v9098_v16, %v5033_v2 }
 0x608   : > { %v4523_v38 = vpop.f32.mrf.mxu3 }
 0x609   : > { %v5101_v4 = vmax.f32 %v5069_v31, 0.0  ;;  %v4524_v10 = vadd.f32 %v4523_v38, %v4374_v27  ;;  %v4737_v60 = vpop.f32.mrf.mxu0  ;;  %v5002_v50 = vpop.f32.mrf.mxu1 }
 0x60a   : > { %v4389_v20 = vpop.f32.mrf.mxu2 }
 0x60b   : > { %5866 = vst.msk [vmem:[%s7482_s23 + $0x3b8] sm:$0xff] %vm1840_vm1, %v5101_v4  ;;  %v4769_v41 = vadd.f32 %v4725_v51, %v4524_v10 }
 0x60d   : > { %v5034_v36 = vadd.f32 %v4990_v49, %v4769_v41 }
 0x60f   : > { %v5070_v14 = vadd.f32 %v9098_v16, %v5034_v36 }
 0x610   : > { %v4525_v1 = vpop.f32.mrf.mxu3 }
 0x611   : > { %v5102_v15 = vmax.f32 %v5070_v14, 0.0  ;;  %v4526_v37 = vadd.f32 %v4525_v1, %v4376_v23  ;;  %v4740_v52 = vpop.f32.mrf.mxu0  ;;  %v5005_v40 = vpop.f32.mrf.mxu1 }
 0x612   : > { %v4391_v39 = vpop.f32.mrf.mxu2 }
 0x613   : > { %5867 = vst.msk [vmem:[%s7482_s23 + $0x3c0] sm:$0xff] %vm1840_vm1, %v5102_v15  ;;  %v4770_v56 = vadd.f32 %v4727_v61, %v4526_v37 }
 0x615   : > { %v5035_v8 = vadd.f32 %v4992_v18, %v4770_v56 }
 0x617   : > { %v5071_v13 = vadd.f32 %v9098_v16, %v5035_v8 }
 0x618   : > { %v4528_v9 = vpop.f32.mrf.mxu3 }
 0x619   : > { %v5103_v19 = vmax.f32 %v5071_v13, 0.0  ;;  %v4529_v28 = vadd.f32 %v4528_v9, %v4379_v45  ;;  %v4742_v31 = vpop.f32.mrf.mxu0  ;;  %v5007_v38 = vpop.f32.mrf.mxu1 }
 0x61b   : > { %5868 = vst.msk [vmem:[%s7482_s23 + $0x3c8] sm:$0xff] %vm1840_vm1, %v5103_v19  ;;  %v4771_v53 = vadd.f32 %v4730_v44, %v4529_v28 }
 0x61d   : > { %v5036_v32 = vadd.f32 %v4995_v29, %v4771_v53 }
 0x61f   : > { %v5072_v26 = vadd.f32 %v9098_v16, %v5036_v32 }
 0x620   : > { %v4530_v33 = vpop.f32.mrf.mxu3 }
 0x621   : > { %v5104_v55 = vmax.f32 %v5072_v26, 0.0  ;;  %v4531_v21 = vadd.f32 %v4530_v33, %v4381_v58 }
 0x623   : > { %5869 = vst.msk [vmem:[%s7482_s23 + $0x3d0] sm:$0xff] %vm1840_vm1, %v5104_v55  ;;  %v4772_v47 = vadd.f32 %v4732_v7, %v4531_v21 }
 0x625   : > { %v5037_v24 = vadd.f32 %v4997_v6, %v4772_v47 }
 0x627   : > { %v5073_v59 = vadd.f32 %v9098_v16, %v5037_v24 }
 0x628   : > { %v4533_v0 = vpop.f32.mrf.mxu3 }
 0x629   : > { %v5105_v17 = vmax.f32 %v5073_v59, 0.0  ;;  %v4534_v48 = vadd.f32 %v4533_v0, %v4384_v12 }
 0x62b   : > { %5870 = vst.msk [vmem:[%s7482_s23 + $0x3d8] sm:$0xff] %vm1840_vm1, %v5105_v17  ;;  %v4773_v54 = vadd.f32 %v4735_v11, %v4534_v48 }
 0x62d   : > { %v5038_v57 = vadd.f32 %v5000_v34, %v4773_v54 }
 0x62f   : > { %v5074_v22 = vadd.f32 %v9098_v16, %v5038_v57 }
 0x630   : > { %v4535_v30 = vpop.f32.mrf.mxu3 }
 0x631   : > { %v5106_v25 = vmax.f32 %v5074_v22, 0.0  ;;  %v4536_v43 = vadd.f32 %v4535_v30, %v4386_v5 }
 0x633   : > { %5871 = vst.msk [vmem:[%s7482_s23 + $0x3e0] sm:$0xff] %vm1840_vm1, %v5106_v25  ;;  %v4774_v42 = vadd.f32 %v4737_v60, %v4536_v43 }
 0x635   : > { %v5039_v63 = vadd.f32 %v5002_v50, %v4774_v42 }
 0x637   : > { %v5075_v27 = vadd.f32 %v9098_v16, %v5039_v63 }
 0x638   : > { %v4538_v51 = vpop.f32.mrf.mxu3 }
 0x639   : > { %v5107_v46 = vmax.f32 %v5075_v27, 0.0  ;;  %v4539_v49 = vadd.f32 %v4538_v51, %v4389_v20 }
 0x63b   : > { %5872 = vst.msk [vmem:[%s7482_s23 + $0x3e8] sm:$0xff] %vm1840_vm1, %v5107_v46  ;;  %v4775_v35 = vadd.f32 %v4740_v52, %v4539_v49 }
 0x63d   : > { %v5040_v62 = vadd.f32 %v5005_v40, %v4775_v35 }
 0x63f   : > { %v5076_v3 = vadd.f32 %v9098_v16, %v5040_v62 }
 0x640   : > { %v4540_v23 = vpop.f32.mrf.mxu3 }
 0x641   : > { %v5108_v2 = vmax.f32 %v5076_v3, 0.0  ;;  %v4541_v61 = vadd.f32 %v4540_v23, %v4391_v39 }
 0x643   : > { %5873 = vst.msk [vmem:[%s7482_s23 + $0x3f0] sm:$0xff] %vm1840_vm1, %v5108_v2  ;;  %v4776_v18 = vadd.f32 %v4742_v31, %v4541_v61 }
 0x645   : > { %v5041_v4 = vadd.f32 %v5007_v38, %v4776_v18 }
 0x647   : > { %v5077_v10 = vadd.f32 %v9098_v16, %v5041_v4 }
 0x649   : > { %v5109_v41 = vmax.f32 %v5077_v10, 0.0 }
 0x64b   : > { %5874 = vst.msk [vmem:[%s7482_s23 + $0x3f8] sm:$0xff] %vm1840_vm1, %v5109_v41 }
 0x64c PF: > { %s16_s21 = sadd.s32 1, %s6010_s21  }
 0x64d   : > { %p13_p4 = scmp.ge.s32.totalorder %s16_s21, 4  }
 0x64f   :  { %15 = sbr.rel (!%p13_p4) target bundleno = 1 (0x1), region = 93 }

</bundles_post_ra>
